<compile_context>
chip_gen: v5e
topology: v5e:2x2
jax: 0.10.0
libtpu: 0.0.40
codegen_flags: <defaults>
</compile_context>

<pallas_src>
import math
import functools

import jax
import jax.numpy as jnp
from jax.experimental import pallas as pl
from jax.experimental.pallas import tpu as pltpu


# -----------------------------------------------------------------------------
# Tiling / VMEM budget helpers
# -----------------------------------------------------------------------------
_GELU_C = 0.7978845608028654  # sqrt(2/pi)
_VMEM_BUDGET_CACHE = None


def _vmem_budget():
    """(vmem_limit_bytes, max_tile) per TPU generation.
    128-MiB VMEM parts (v5e/v6e) get bigger tiles + a higher scoped-VMEM limit;
    v7x (64 MiB) / unknown stays at the conservative setting."""
    global _VMEM_BUDGET_CACHE
    if _VMEM_BUDGET_CACHE is None:
        cap = 0
        try:
            info = pltpu.get_tpu_info()
            for attr in ("vmem_capacity_bytes", "vmem_size_bytes", "vmem_bytes"):
                v = getattr(info, attr, None)
                if v:
                    cap = int(v)
                    break
        except Exception:
            cap = 0
        if cap >= 100 * 1024 * 1024:
            _VMEM_BUDGET_CACHE = (96 * 1024 * 1024, 1024)
        else:
            _VMEM_BUDGET_CACHE = (48 * 1024 * 1024, 512)
    return _VMEM_BUDGET_CACHE


def _choose_tile(dim, max_tile, align):
    """Largest tile <= max_tile that divides dim and is a multiple of align.
    Falls back to the full dim (full-array blocks are exempt from the (8,128) rule)."""
    if dim <= max_tile:
        return dim
    t = (max_tile // align) * align
    while t >= align:
        if dim % t == 0:
            return t
        t -= align
    return dim


def _split_tile(dim, tile, align):
    """If a grid would collapse to a single block, try to split `dim` into >=2
    blocks (keeps both v7x TensorCores busy); no-op when dim is too small."""
    if dim // tile >= 2 or dim < 2 * align:
        return tile
    cand = ((dim // 2) // align) * align
    while cand >= align:
        if dim % cand == 0:
            return cand
        cand -= align
    return tile


def _apply_activation(x, activation):
    if activation == "relu":
        return jnp.maximum(x, 0.0)
    if activation == "gelu":
        # TODO(synk): exact erf-GELU approximated with the tanh form so the
        # activation can live in the matmul epilogue (EUP tanh).
        return 0.5 * x * (1.0 + jnp.tanh(_GELU_C * (x + 0.044715 * x * x * x)))
    return x


# -----------------------------------------------------------------------------
# Linear (single matmul) kernels
# -----------------------------------------------------------------------------
def _linear_kernel_fullk(a_ref, b_ref, bias_ref, o_ref, *, activation):
    out = jnp.dot(a_ref[...], b_ref[...],
                  preferred_element_type=jnp.float32) + bias_ref[...]
    out = _apply_activation(out, activation)
    o_ref[...] = out.astype(o_ref.dtype)


def _linear_kernel_ksplit(a_ref, b_ref, bias_ref, o_ref, acc_ref, *, activation):
    @pl.when(pl.program_id(2) == 0)
    def _():
        acc_ref[...] = jnp.zeros_like(acc_ref)

    acc_ref[...] += jnp.dot(a_ref[...], b_ref[...],
                            preferred_element_type=jnp.float32)

    @pl.when(pl.program_id(2) == pl.num_programs(2) - 1)
    def _():
        out = _apply_activation(acc_ref[...] + bias_ref[...], activation)
        o_ref[...] = out.astype(o_ref.dtype)


def linear(x, w, b, activation=None, out_dtype=jnp.float32):
    """y = act(x @ w + b). bf16 MXU operands, f32 accumulation, fused epilogue.
    `out_dtype=bf16` halves store/load bytes when the consumer re-casts anyway."""
    orig_shape = x.shape
    K, N = w.shape
    a = x.reshape(-1, K).astype(jnp.bfloat16)
    M = a.shape[0]
    wb = w.astype(jnp.bfloat16)
    bias = b.reshape(1, N).astype(jnp.float32)

    vmem_limit, max_tile = _vmem_budget()
    TM = _choose_tile(M, max_tile, 16)
    TN = _choose_tile(N, max_tile, 128)
    TK = K if K <= 2 * max_tile else _choose_tile(K, max_tile, 128)
    if (M // TM) * (N // TN) < 2:        # give v7x's second core something to do
        TM = _split_tile(M, TM, 16)

    cp = pltpu.CompilerParams(
        dimension_semantics=("parallel", "parallel") if TK == K
        else ("parallel", "parallel", "arbitrary"),
        vmem_limit_bytes=vmem_limit)

    if TK == K:   # no K split -> no accumulator scratch needed
        out = pl.pallas_call(
            functools.partial(_linear_kernel_fullk, activation=activation),
            out_shape=jax.ShapeDtypeStruct((M, N), out_dtype),
            grid=(M // TM, N // TN),
            in_specs=[
                pl.BlockSpec((TM, K), lambda i, j: (i, 0)),
                pl.BlockSpec((K, TN), lambda i, j: (0, j)),
                pl.BlockSpec((1, TN), lambda i, j: (0, j)),
            ],
            out_specs=pl.BlockSpec((TM, TN), lambda i, j: (i, j)),
            compiler_params=cp,
        )(a, wb, bias)
    else:
        out = pl.pallas_call(
            functools.partial(_linear_kernel_ksplit, activation=activation),
            out_shape=jax.ShapeDtypeStruct((M, N), out_dtype),
            grid=(M // TM, N // TN, K // TK),
            in_specs=[
                pl.BlockSpec((TM, TK), lambda i, j, k: (i, k)),
                pl.BlockSpec((TK, TN), lambda i, j, k: (k, j)),
                pl.BlockSpec((1, TN), lambda i, j, k: (0, j)),
            ],
            out_specs=pl.BlockSpec((TM, TN), lambda i, j, k: (i, j)),
            scratch_shapes=[pltpu.VMEM((TM, TN), jnp.float32)],
            compiler_params=cp,
        )(a, wb, bias)
    return out.reshape(*orig_shape[:-1], N)


# -----------------------------------------------------------------------------
# Fused two-layer MLP kernel (hidden activation never leaves VMEM)
# -----------------------------------------------------------------------------
def _fused_mlp_kernel(x_ref, w1_ref, b1_ref, w2_ref, b2_ref, o_ref, *, act1, act2):
    h = jnp.dot(x_ref[...], w1_ref[...],
                preferred_element_type=jnp.float32) + b1_ref[...]
    h = _apply_activation(h, act1)
    out = jnp.dot(h.astype(jnp.bfloat16), w2_ref[...],
                  preferred_element_type=jnp.float32) + b2_ref[...]
    out = _apply_activation(out, act2)
    o_ref[...] = out.astype(o_ref.dtype)


def fused_mlp(x, p1, p2, act1=None, act2=None, out_dtype=jnp.float32):
    """y = act2(act1(x @ w1 + b1) @ w2 + b2) in one pallas_call."""
    orig_shape = x.shape
    K, H = p1['w'].shape
    N = p2['w'].shape[1]
    a = x.reshape(-1, K).astype(jnp.bfloat16)
    M = a.shape[0]

    vmem_limit, max_tile = _vmem_budget()
    TM = _choose_tile(M, max_tile, 16)
    if M // TM < 2:
        TM = _split_tile(M, TM, 16)

    # Rough per-step VMEM working set (resident bf16 weights + double-buffered x
    # tile + f32 hidden + double-buffered output).
    need = 2 * (K * H + H * N) + 4 * TM * K + 4 * TM * H + (4 + 2 * 2) * TM * N
    if need > vmem_limit // 2:
        # Fall back to two tiled matmuls when the fused working set is too big.
        h = linear(x, p1['w'], p1['b'], activation=act1, out_dtype=jnp.bfloat16)
        return linear(h, p2['w'], p2['b'], activation=act2, out_dtype=out_dtype)

    w1 = p1['w'].astype(jnp.bfloat16)
    b1 = p1['b'].reshape(1, H).astype(jnp.float32)
    w2 = p2['w'].astype(jnp.bfloat16)
    b2 = p2['b'].reshape(1, N).astype(jnp.float32)

    out = pl.pallas_call(
        functools.partial(_fused_mlp_kernel, act1=act1, act2=act2),
        out_shape=jax.ShapeDtypeStruct((M, N), out_dtype),
        grid=(M // TM,),
        in_specs=[
            pl.BlockSpec((TM, K), lambda i: (i, 0)),
            pl.BlockSpec((K, H), lambda i: (0, 0)),
            pl.BlockSpec((1, H), lambda i: (0, 0)),
            pl.BlockSpec((H, N), lambda i: (0, 0)),
            pl.BlockSpec((1, N), lambda i: (0, 0)),
        ],
        out_specs=pl.BlockSpec((TM, N), lambda i: (i, 0)),
        compiler_params=pltpu.CompilerParams(
            dimension_semantics=("parallel",),
            vmem_limit_bytes=vmem_limit),
    )(a, w1, b1, w2, b2)
    return out.reshape(*orig_shape[:-1], N)


# -----------------------------------------------------------------------------
# Attention kernels (fused qkv / kv consumed directly, lane-dense bf16 output)
# -----------------------------------------------------------------------------
def _self_attn_kernel(qkv_ref, mask_ref, o_ref, *, num_heads, head_dim, scale):
    D = num_heads * head_dim
    qkv = qkv_ref[0]                 # (S, 3D) bf16 — single load, sliced per head
    mask = mask_ref[...]             # (S, S) f32 additive mask
    for h in range(num_heads):       # static unroll over heads
        lo = h * head_dim
        qh = qkv[:, lo:lo + head_dim]
        kh = qkv[:, D + lo:D + lo + head_dim]
        vh = qkv[:, 2 * D + lo:2 * D + lo + head_dim]
        s = jax.lax.dot_general(qh, kh, (((1,), (1,)), ((), ())),
                                preferred_element_type=jnp.float32)
        s = s * scale + mask         # scale folded into f32 scores (no q upcast)
        m = jnp.max(s, axis=-1, keepdims=True)
        p = jnp.exp(s - m)
        l = jnp.sum(p, axis=-1, keepdims=True)
        o = jnp.dot(p.astype(jnp.bfloat16), vh, preferred_element_type=jnp.float32)
        o_ref[0, :, lo:lo + head_dim] = (
            o * pl.reciprocal(l, approx=True)).astype(o_ref.dtype)


def _cross_attn_kernel(q_ref, kv_ref, o_ref, *, num_heads, head_dim, scale):
    D = num_heads * head_dim
    q = q_ref[0]                     # (Sq, D)  bf16
    kv = kv_ref[0]                   # (Sk, 2D) bf16
    for h in range(num_heads):
        lo = h * head_dim
        qh = q[:, lo:lo + head_dim]
        kh = kv[:, lo:lo + head_dim]
        vh = kv[:, D + lo:D + lo + head_dim]
        s = jax.lax.dot_general(qh, kh, (((1,), (1,)), ((), ())),
                                preferred_element_type=jnp.float32) * scale
        m = jnp.max(s, axis=-1, keepdims=True)
        p = jnp.exp(s - m)
        l = jnp.sum(p, axis=-1, keepdims=True)
        o = jnp.dot(p.astype(jnp.bfloat16), vh, preferred_element_type=jnp.float32)
        o_ref[0, :, lo:lo + head_dim] = (
            o * pl.reciprocal(l, approx=True)).astype(o_ref.dtype)


def self_attention(qkv, num_heads, mask):
    """qkv: (B, S, 3D) bf16, additive mask (S, S). Output (B, S, D) bf16."""
    B, S, D3 = qkv.shape
    D = D3 // 3
    Dh = D // num_heads
    kernel = functools.partial(_self_attn_kernel, num_heads=num_heads,
                               head_dim=Dh, scale=1.0 / math.sqrt(Dh))
    return pl.pallas_call(
        kernel,
        out_shape=jax.ShapeDtypeStruct((B, S, D), jnp.bfloat16),
        grid=(B,),
        in_specs=[pl.BlockSpec((1, S, D3), lambda b: (b, 0, 0)),
                  pl.BlockSpec((S, S), lambda b: (0, 0))],
        out_specs=pl.BlockSpec((1, S, D), lambda b: (b, 0, 0)),
        compiler_params=pltpu.CompilerParams(dimension_semantics=("parallel",)),
    )(qkv, mask.astype(jnp.float32))


def cross_attention(q, kv, num_heads):
    """q: (B, Sq, D) bf16, kv: (B, Sk, 2D) bf16 (K|V fused). Output bf16."""
    B, Sq, D = q.shape
    Sk = kv.shape[1]
    Dh = D // num_heads
    kernel = functools.partial(_cross_attn_kernel, num_heads=num_heads,
                               head_dim=Dh, scale=1.0 / math.sqrt(Dh))
    return pl.pallas_call(
        kernel,
        out_shape=jax.ShapeDtypeStruct((B, Sq, D), jnp.bfloat16),
        grid=(B,),
        in_specs=[pl.BlockSpec((1, Sq, D), lambda b: (b, 0, 0)),
                  pl.BlockSpec((1, Sk, 2 * D), lambda b: (b, 0, 0))],
        out_specs=pl.BlockSpec((1, Sq, D), lambda b: (b, 0, 0)),
        compiler_params=pltpu.CompilerParams(dimension_semantics=("parallel",)),
    )(q, kv)


# -----------------------------------------------------------------------------
# Chamfer distance kernel (VPU pairwise distances, no K=3 f32 MXU dot)
# -----------------------------------------------------------------------------
def _chamfer_kernel(gen_ref, gt_ref, d1_ref, d2_ref):
    gen = gen_ref[...]                               # (GT, S, 3) f32
    gtp = gt_ref[...]                                # (GT, S, 3) f32
    d = None
    for c in range(3):                               # 3 broadcast subtract/square passes
        diff = gen[:, :, c][:, :, None] - gtp[:, :, c][:, None, :]
        d = diff * diff if d is None else d + diff * diff
    d1_ref[...] = jnp.min(d, axis=2)                 # nearest gt per generated point
    d2_ref[...] = jnp.min(d, axis=1)                 # nearest generated per gt point


def _pick_chamfer_tile(G):
    best = 1
    for cand in range(1, min(G, 64) + 1):
        if G % cand == 0 and G // cand >= 2:
            best = cand
    return G if best < 4 else best


def chamfer_distance(gen, gt):
    """Squared Chamfer distances. gen, gt: (G, S, 3) -> (G, S), (G, S)."""
    G, S, _ = gen.shape
    GT = _pick_chamfer_tile(G)
    # TODO(synk): outputs are (GT, S<128) blocks -> masked stores; a flattened
    # lane-dense (GT*S,) layout needs an in-kernel sublane->lane reshape that is
    # not guaranteed to lower, and chamfer traffic here is negligible (~1 KiB).
    return pl.pallas_call(
        _chamfer_kernel,
        out_shape=(jax.ShapeDtypeStruct((G, S), jnp.float32),
                   jax.ShapeDtypeStruct((G, S), jnp.float32)),
        grid=(G // GT,),
        in_specs=[pl.BlockSpec((GT, S, 3), lambda i: (i, 0, 0)),
                  pl.BlockSpec((GT, S, 3), lambda i: (i, 0, 0))],
        out_specs=(pl.BlockSpec((GT, S), lambda i: (i, 0)),
                   pl.BlockSpec((GT, S), lambda i: (i, 0))),
        compiler_params=pltpu.CompilerParams(dimension_semantics=("parallel",)),
    )(gen.astype(jnp.float32), gt.astype(jnp.float32))


# -----------------------------------------------------------------------------
# Plain-JAX glue (normalizations, grouping, positional embedding)
# -----------------------------------------------------------------------------
def layer_norm(x, p, eps=1e-5):
    mu = jnp.mean(x, axis=-1, keepdims=True)
    var = jnp.mean((x - mu) ** 2, axis=-1, keepdims=True)
    return (x - mu) / jnp.sqrt(var + eps) * p['w'] + p['b']


def _fold_bn(lin_p, bn_p, eps=1e-5):
    """Fold eval-mode BatchNorm (pure affine) into the preceding linear."""
    s = bn_p['gamma'] / jnp.sqrt(bn_p['var'] + eps)
    t = bn_p['beta'] - bn_p['mean'] * s
    return {'w': lin_p['w'] * s[None, :], 'b': lin_p['b'] * s + t}


def pos_embed_sine(xyz, d_model, temperature=10000.0, scale=1.0):
    """PositionEmbeddingCoordsSine(3, d_model, 1.0)."""
    n_dim = xyz.shape[-1]
    num_pos_feats = d_model // n_dim // 2 * 2
    padding = d_model - num_pos_feats * n_dim
    x = xyz * (scale * 2.0 * math.pi)
    dim_t = jnp.arange(num_pos_feats, dtype=jnp.float32)
    dim_t = temperature ** (2.0 * jnp.floor(dim_t / 2.0) / num_pos_feats)
    pos = x[..., None] / dim_t
    emb = jnp.stack([jnp.sin(pos[..., 0::2]), jnp.cos(pos[..., 1::2])], axis=-1)
    emb = emb.reshape(*xyz.shape[:-1], n_dim * num_pos_feats)
    return jnp.pad(emb, [(0, 0)] * (emb.ndim - 1) + [(0, padding)])


def z_group(pts, num_group, group_size):
    """FPS + KNN grouping; neighborhood centered on its group center."""
    B, N, _ = pts.shape

    def fps_single(p):
        def body(i, carry):
            idxs, dists, last = carry
            d = jnp.sum((p - p[last]) ** 2, axis=-1)
            dists = jnp.minimum(dists, d)
            nxt = jnp.argmax(dists).astype(jnp.int32)
            idxs = idxs.at[i].set(nxt)
            return idxs, dists, nxt

        idxs = jnp.zeros((num_group,), jnp.int32)
        dists = jnp.full((N,), 1e10, jnp.float32)
        idxs, _, _ = jax.lax.fori_loop(1, num_group, body,
                                       (idxs, dists, jnp.int32(0)))
        return idxs

    fps_idx = jax.vmap(fps_single)(pts)                              # (B, G)
    center = jax.vmap(lambda p, i: p[i])(pts, fps_idx)               # (B, G, 3)
    d = jnp.sum((center[:, :, None, :] - pts[:, None, :, :]) ** 2, axis=-1)
    _, knn_idx = jax.lax.top_k(-d, group_size)                       # (B, G, S)
    neighborhood = jax.vmap(lambda p, i: p[i])(pts, knn_idx)         # (B, G, S, 3)
    neighborhood = neighborhood - center[:, :, None, :]
    # TODO(synk): original ZGroup orders centers by Morton (z-order) code; a simple
    # coordinate-sum ordering is used here.
    order = jnp.argsort(jnp.sum(center, axis=-1), axis=-1)
    center = jax.vmap(lambda c, o: c[o])(center, order)
    neighborhood = jax.vmap(lambda n, o: n[o])(neighborhood, order)
    return neighborhood, center


# -----------------------------------------------------------------------------
# Model pieces (all matmuls / attention / chamfer go through Pallas kernels)
# -----------------------------------------------------------------------------
def patch_embedding(neigh, p, embed_dim):
    B, G, S, _ = neigh.shape
    x = neigh.reshape(B * G * S, 3)
    fc1 = _fold_bn(p['fc1'], p['bn1'])
    # Conv1d(3,128,1)+BN+ReLU -> Conv1d(128,256,1) fused (K=3 intermediate stays in VMEM).
    f = fused_mlp(x, fc1, p['fc2'], act1='relu', out_dtype=jnp.bfloat16)
    c_mid = p['fc2']['w'].shape[1]
    f = f.reshape(B * G, S, c_mid)
    fg = jnp.max(f, axis=1, keepdims=True)                      # per-group max pool
    f = jnp.concatenate([jnp.broadcast_to(fg, f.shape), f], axis=-1)
    sc1 = _fold_bn(p['sc1'], p['bn2'])
    # Conv1d(512,512,1)+BN+ReLU -> Conv1d(512,embed_dim,1) fused.
    f = fused_mlp(f.reshape(B * G * S, 2 * c_mid), sc1, p['sc2'], act1='relu')
    f = f.reshape(B * G, S, embed_dim)
    return jnp.max(f, axis=1).reshape(B, G, embed_dim)


def transformer_block(x, mask, p, num_heads):
    h = layer_norm(x, p['ln1'])
    # Fused qkv projection (bf16 output, consumed directly by the attention kernel).
    qkv = linear(h, p['qkv']['w'], p['qkv']['b'], out_dtype=jnp.bfloat16)
    a = self_attention(qkv, num_heads, mask)
    x = x + linear(a, p['proj']['w'], p['proj']['b'])
    x = x + fused_mlp(layer_norm(x, p['ln2']), p['fc1'], p['fc2'], act1='gelu')
    return x


def cross_block(qt, kv_in, p, num_heads):
    hq = layer_norm(qt, p['lnq'])
    hk = layer_norm(kv_in, p['lnkv'])
    q = linear(hq, p['q']['w'], p['q']['b'], out_dtype=jnp.bfloat16)
    # K and V projections fused into one matmul; result fed whole to attention.
    wkv = jnp.concatenate([p['k']['w'], p['v']['w']], axis=1)
    bkv = jnp.concatenate([p['k']['b'], p['v']['b']], axis=0)
    kvp = linear(hk, wkv, bkv, out_dtype=jnp.bfloat16)
    a = cross_attention(q, kvp, num_heads)
    qt = qt + linear(a, p['proj']['w'], p['proj']['b'])
    qt = qt + fused_mlp(layer_norm(qt, p['ln2']), p['fc1'], p['fc2'], act1='gelu')
    return qt


def gpt_extractor(tokens, pos, mask, query, p, num_heads):
    # TODO(synk): ReCon's GPTExtractor internals (SOS token, per-layer pos injection,
    # optional stop-grad on cross-attention K/V) approximated with standard pre-LN
    # causal blocks + per-depth cross-attention for the global queries.
    x = tokens + pos
    g = query
    for bp, cp in zip(p['blocks'], p['cross']):
        x = transformer_block(x, mask, bp, num_heads)
        g = cross_block(g, x, cp, num_heads)
    return layer_norm(x, p['norm']), layer_norm(g, p['gnorm'])


def gpt_generator(x, pos, mask, p, num_heads, group_size):
    x = x + pos
    for bp in p['blocks']:
        x = transformer_block(x, mask, bp, num_heads)
    x = layer_norm(x, p['norm'])
    rebuild = linear(x, p['increase_dim']['w'], p['increase_dim']['b'])
    B, S, _ = x.shape
    return rebuild.reshape(B * S, group_size, 3)


def embedding_head(x, p):
    l1 = _fold_bn(p['l1'], p['bn1'])
    l2 = _fold_bn(p['l2'], p['bn2'])
    # (Linear+BN+ReLU) x2 fused into one kernel.
    # TODO(synk): Dropout(0.5) layers run in eval (deterministic) mode.
    h = fused_mlp(x, l1, l2, act1='relu', act2='relu', out_dtype=jnp.bfloat16)
    return linear(h, p['l3']['w'], p['l3']['b'])


def point_transformer_forward(pts, params, cfg):
    D, H = cfg['embed_dim'], cfg['num_heads']
    G, S = cfg['num_group'], cfg['group_size']

    neighborhood, center = z_group(pts, G, S)
    tokens = patch_embedding(neighborhood, params['embed'], D)       # (B, G, D)
    B, seq_len, C = tokens.shape
    query = jnp.broadcast_to(params['global_query'],
                             (B,) + params['global_query'].shape[1:])

    rel = center[:, 1:, :] - center[:, :-1, :]
    rel_norm = jnp.linalg.norm(rel, axis=-1, keepdims=True)
    rel_dir = rel / (rel_norm + 1e-5)
    position = jnp.concatenate([center[:, :1, :], rel_dir], axis=1)
    pos_rel = pos_embed_sine(position, C)
    pos = pos_embed_sine(center, C)

    causal = jnp.triu(jnp.ones((seq_len, seq_len), bool), k=1)
    attn_mask = jnp.where(causal, -1e9, 0.0).astype(jnp.float32)

    enc, glob = gpt_extractor(tokens, pos, attn_mask, query, params['encoder'], H)
    gen = gpt_generator(enc, pos_rel, attn_mask, params['decoder'], H, S)

    gt = neighborhood.reshape(B * G, S, 3)
    d1, d2 = chamfer_distance(gen[:, :, :3], gt)
    cd_l2 = jnp.mean(d1) + jnp.mean(d2)
    cd_l1 = (jnp.mean(jnp.sqrt(d1)) + jnp.mean(jnp.sqrt(d2))) / 2.0

    pce = jnp.mean(enc, axis=1)                                      # (B, D)
    ret = embedding_head(pce, params['head'])                        # (B, 128)
    ret = ret / jnp.maximum(jnp.linalg.norm(ret, axis=-1, keepdims=True), 1e-12)
    return ret, cd_l1 + cd_l2


# -----------------------------------------------------------------------------
# Deterministic parameter init
# -----------------------------------------------------------------------------
class _KeyGen:
    def __init__(self, key):
        self.key = key

    def __call__(self):
        self.key, sub = jax.random.split(self.key)
        return sub


def _lin_init(kg, fan_in, fan_out):
    w = jax.random.truncated_normal(kg(), -2.0, 2.0, (fan_in, fan_out),
                                    jnp.float32) * 0.02
    return {'w': w, 'b': jnp.zeros((fan_out,), jnp.float32)}


def _ln_init(dim):
    return {'w': jnp.ones((dim,), jnp.float32), 'b': jnp.zeros((dim,), jnp.float32)}


def _bn_init(dim):
    return {'gamma': jnp.ones((dim,), jnp.float32),
            'beta': jnp.zeros((dim,), jnp.float32),
            'mean': jnp.zeros((dim,), jnp.float32),
            'var': jnp.ones((dim,), jnp.float32)}


def init_params(cfg, key):
    kg = _KeyGen(key)
    D = cfg['embed_dim']

    def block_p():
        return {'ln1': _ln_init(D), 'qkv': _lin_init(kg, D, 3 * D),
                'proj': _lin_init(kg, D, D), 'ln2': _ln_init(D),
                'fc1': _lin_init(kg, D, 4 * D), 'fc2': _lin_init(kg, 4 * D, D)}

    def cross_p():
        return {'lnq': _ln_init(D), 'lnkv': _ln_init(D),
                'q': _lin_init(kg, D, D), 'k': _lin_init(kg, D, D),
                'v': _lin_init(kg, D, D), 'proj': _lin_init(kg, D, D),
                'ln2': _ln_init(D),
                'fc1': _lin_init(kg, D, 4 * D), 'fc2': _lin_init(kg, 4 * D, D)}

    params = {
        'embed': {'fc1': _lin_init(kg, 3, 128), 'bn1': _bn_init(128),
                  'fc2': _lin_init(kg, 128, 256),
                  'sc1': _lin_init(kg, 512, 512), 'bn2': _bn_init(512),
                  'sc2': _lin_init(kg, 512, D)},
        'encoder': {'blocks': [block_p() for _ in range(cfg['depth'])],
                    'cross': [cross_p() for _ in range(cfg['depth'])],
                    'norm': _ln_init(D), 'gnorm': _ln_init(D)},
        'decoder': {'blocks': [block_p() for _ in range(cfg['decoder_depth'])],
                    'norm': _ln_init(D),
                    'increase_dim': _lin_init(kg, D, 3 * cfg['group_size'])},
        'global_query': jnp.zeros(
            (1, cfg['img_queries'] + cfg['text_queries'], D), jnp.float32),
    }
    # Original code hardcodes feature_dim = 768 (== embed_dim of the full config);
    # here feature_dim == embed_dim for the small synthetic config.
    feature_dim = D
    params['head'] = {'l1': _lin_init(kg, feature_dim, 256), 'bn1': _bn_init(256),
                      'l2': _lin_init(kg, 256, 256), 'bn2': _bn_init(256),
                      'l3': _lin_init(kg, 256, 128)}
    return params


# -----------------------------------------------------------------------------
if __name__ == "__main__":
    cfg = dict(embed_dim=64, num_heads=4, depth=2, decoder_depth=2,
               num_group=8, group_size=16, img_queries=1, text_queries=1)

    key = jax.random.PRNGKey(0)
    pkey, dkey = jax.random.split(key)
    params = init_params(cfg, pkey)
    pts = jax.random.normal(dkey, (2, 128, 3), jnp.float32)   # (B, N, 3) point cloud

    fwd = jax.jit(lambda p, prm: point_transformer_forward(p, prm, cfg))
    ret, loss = fwd(pts, params)
    jax.block_until_ready((ret, loss))

    assert ret.shape == (2, 128)
    assert loss.shape == ()
    print("KERNEL_OK")
</pallas_src>

<mosaic_0001>
module attributes {stable_mosaic.version = 11 : i64} {
  func.func @_fused_mlp_kernel(%arg0: i32, %arg1: memref<128x3xbf16, #tpu.memory_space<vmem>>, %arg2: memref<3x128xbf16, #tpu.memory_space<vmem>>, %arg3: memref<1x128xf32, #tpu.memory_space<vmem>>, %arg4: memref<128x256xbf16, #tpu.memory_space<vmem>>, %arg5: memref<1x256xf32, #tpu.memory_space<vmem>>, %arg6: memref<128x256xbf16, #tpu.memory_space<vmem>>) attributes {dimension_semantics = [#tpu.dimension_semantics<parallel>], iteration_bounds = array<i64: 2>, scalar_prefetch = 0 : i64, scratch_operands = 0 : i64, tpu.core_type = #tpu.core_type<tc>, window_params = [{transform_indices = @transform_0, window_bounds = array<i64: 128, 3>}, {pipeline_mode = #tpu.pipeline_mode<synchronous>, transform_indices = @transform_1, window_bounds = array<i64: 3, 128>}, {pipeline_mode = #tpu.pipeline_mode<synchronous>, transform_indices = @transform_2, window_bounds = array<i64: 1, 128>}, {pipeline_mode = #tpu.pipeline_mode<synchronous>, transform_indices = @transform_3, window_bounds = array<i64: 128, 256>}, {pipeline_mode = #tpu.pipeline_mode<synchronous>, transform_indices = @transform_4, window_bounds = array<i64: 1, 256>}, {transform_indices = @transform_5, window_bounds = array<i64: 128, 256>}]} {
    %c0 = arith.constant 0 : index
    %c0_0 = arith.constant 0 : index
    %0 = vector.load %arg1[%c0, %c0_0] : memref<128x3xbf16, #tpu.memory_space<vmem>>, vector<128x3xbf16>
    %c0_1 = arith.constant 0 : index
    %c0_2 = arith.constant 0 : index
    %1 = vector.load %arg2[%c0_1, %c0_2] : memref<3x128xbf16, #tpu.memory_space<vmem>>, vector<3x128xbf16>
    %cst = arith.constant dense<0.000000e+00> : vector<128x128xf32>
    %2 = tpu.matmul %0, %1, %cst {dimension_numbers = #tpu.dot_dimension_numbers<[1], [0], [0], [1], [0, 0, 1, 1], [], []>} : vector<128x3xbf16>, vector<3x128xbf16>, vector<128x128xf32> -> vector<128x128xf32>
    %c0_3 = arith.constant 0 : index
    %c0_4 = arith.constant 0 : index
    %3 = vector.load %arg3[%c0_3, %c0_4] : memref<1x128xf32, #tpu.memory_space<vmem>>, vector<1x128xf32>
    %4 = vector.broadcast %3 : vector<1x128xf32> to vector<128x128xf32>
    %5 = arith.addf %2, %4 : vector<128x128xf32>
    %cst_5 = arith.constant 0.000000e+00 : f32
    %6 = vector.broadcast %cst_5 : f32 to vector<128x128xf32>
    %7 = arith.maximumf %5, %6 : vector<128x128xf32>
    %8 = arith.truncf %7 : vector<128x128xf32> to vector<128x128xbf16>
    %c0_6 = arith.constant 0 : index
    %c0_7 = arith.constant 0 : index
    %9 = vector.load %arg4[%c0_6, %c0_7] : memref<128x256xbf16, #tpu.memory_space<vmem>>, vector<128x256xbf16>
    %cst_8 = arith.constant dense<0.000000e+00> : vector<128x256xf32>
    %10 = tpu.matmul %8, %9, %cst_8 {dimension_numbers = #tpu.dot_dimension_numbers<[1], [0], [0], [1], [0, 0, 1, 1], [], []>} : vector<128x128xbf16>, vector<128x256xbf16>, vector<128x256xf32> -> vector<128x256xf32>
    %c0_9 = arith.constant 0 : index
    %c0_10 = arith.constant 0 : index
    %11 = vector.load %arg5[%c0_9, %c0_10] : memref<1x256xf32, #tpu.memory_space<vmem>>, vector<1x256xf32>
    %12 = vector.broadcast %11 : vector<1x256xf32> to vector<128x256xf32>
    %13 = arith.addf %10, %12 : vector<128x256xf32>
    %14 = arith.truncf %13 : vector<128x256xf32> to vector<128x256xbf16>
    %c0_11 = arith.constant 0 : index
    %c0_12 = arith.constant 0 : index
    %15 = vector.load %arg6[%c0_11, %c0_12] : memref<128x256xbf16, #tpu.memory_space<vmem>>, vector<128x256xbf16>
    tpu.vector_store %arg6[%c0_11, %c0_12], %14 {strides = array<i32>} : memref<128x256xbf16, #tpu.memory_space<vmem>>, vector<128x256xbf16>,
    return
  }
  func.func @transform_0(%arg0: i32) -> (i32, i32) {
    %c0_i32 = arith.constant 0 : i32
    %c0_i32_0 = arith.constant 0 : i32
    return %arg0, %c0_i32 : i32, i32
  }
  func.func @transform_1(%arg0: i32) -> (i32, i32) {
    %c0_i32 = arith.constant 0 : i32
    %c0_i32_0 = arith.constant 0 : i32
    %c0_i32_1 = arith.constant 0 : i32
    return %c0_i32, %c0_i32_0 : i32, i32
  }
  func.func @transform_2(%arg0: i32) -> (i32, i32) {
    %c0_i32 = arith.constant 0 : i32
    %c0_i32_0 = arith.constant 0 : i32
    %c0_i32_1 = arith.constant 0 : i32
    return %c0_i32, %c0_i32_0 : i32, i32
  }
  func.func @transform_3(%arg0: i32) -> (i32, i32) {
    %c0_i32 = arith.constant 0 : i32
    %c0_i32_0 = arith.constant 0 : i32
    %c0_i32_1 = arith.constant 0 : i32
    return %c0_i32, %c0_i32_0 : i32, i32
  }
  func.func @transform_4(%arg0: i32) -> (i32, i32) {
    %c0_i32 = arith.constant 0 : i32
    %c0_i32_0 = arith.constant 0 : i32
    %c0_i32_1 = arith.constant 0 : i32
    return %c0_i32, %c0_i32_0 : i32, i32
  }
  func.func @transform_5(%arg0: i32) -> (i32, i32) {
    %c0_i32 = arith.constant 0 : i32
    %c0_i32_0 = arith.constant 0 : i32
    return %arg0, %c0_i32 : i32, i32
  }
}

module attributes {stable_mosaic.version = 11 : i64} {
  func.func @_fused_mlp_kernel(%arg0: i32, %arg1: memref<128x512xbf16, #tpu.memory_space<vmem>>, %arg2: memref<512x512xbf16, #tpu.memory_space<vmem>>, %arg3: memref<1x512xf32, #tpu.memory_space<vmem>>, %arg4: memref<512x64xbf16, #tpu.memory_space<vmem>>, %arg5: memref<1x64xf32, #tpu.memory_space<vmem>>, %arg6: memref<128x64xf32, #tpu.memory_space<vmem>>) attributes {dimension_semantics = [#tpu.dimension_semantics<parallel>], iteration_bounds = array<i64: 2>, scalar_prefetch = 0 : i64, scratch_operands = 0 : i64, tpu.core_type = #tpu.core_type<tc>, window_params = [{transform_indices = @transform_0, window_bounds = array<i64: 128, 512>}, {pipeline_mode = #tpu.pipeline_mode<synchronous>, transform_indices = @transform_1, window_bounds = array<i64: 512, 512>}, {pipeline_mode = #tpu.pipeline_mode<synchronous>, transform_indices = @transform_2, window_bounds = array<i64: 1, 512>}, {pipeline_mode = #tpu.pipeline_mode<synchronous>, transform_indices = @transform_3, window_bounds = array<i64: 512, 64>}, {pipeline_mode = #tpu.pipeline_mode<synchronous>, transform_indices = @transform_4, window_bounds = array<i64: 1, 64>}, {transform_indices = @transform_5, window_bounds = array<i64: 128, 64>}]} {
    %c0 = arith.constant 0 : index
    %c0_0 = arith.constant 0 : index
    %0 = vector.load %arg1[%c0, %c0_0] : memref<128x512xbf16, #tpu.memory_space<vmem>>, vector<128x512xbf16>
    %c0_1 = arith.constant 0 : index
    %c0_2 = arith.constant 0 : index
    %1 = vector.load %arg2[%c0_1, %c0_2] : memref<512x512xbf16, #tpu.memory_space<vmem>>, vector<512x512xbf16>
    %cst = arith.constant dense<0.000000e+00> : vector<128x512xf32>
    %2 = tpu.matmul %0, %1, %cst {dimension_numbers = #tpu.dot_dimension_numbers<[1], [0], [0], [1], [0, 0, 1, 1], [], []>} : vector<128x512xbf16>, vector<512x512xbf16>, vector<128x512xf32> -> vector<128x512xf32>
    %c0_3 = arith.constant 0 : index
    %c0_4 = arith.constant 0 : index
    %3 = vector.load %arg3[%c0_3, %c0_4] : memref<1x512xf32, #tpu.memory_space<vmem>>, vector<1x512xf32>
    %4 = vector.broadcast %3 : vector<1x512xf32> to vector<128x512xf32>
    %5 = arith.addf %2, %4 : vector<128x512xf32>
    %cst_5 = arith.constant 0.000000e+00 : f32
    %6 = vector.broadcast %cst_5 : f32 to vector<128x512xf32>
    %7 = arith.maximumf %5, %6 : vector<128x512xf32>
    %8 = arith.truncf %7 : vector<128x512xf32> to vector<128x512xbf16>
    %c0_6 = arith.constant 0 : index
    %c0_7 = arith.constant 0 : index
    %9 = vector.load %arg4[%c0_6, %c0_7] : memref<512x64xbf16, #tpu.memory_space<vmem>>, vector<512x64xbf16>
    %cst_8 = arith.constant dense<0.000000e+00> : vector<128x64xf32>
    %10 = tpu.matmul %8, %9, %cst_8 {dimension_numbers = #tpu.dot_dimension_numbers<[1], [0], [0], [1], [0, 0, 1, 1], [], []>} : vector<128x512xbf16>, vector<512x64xbf16>, vector<128x64xf32> -> vector<128x64xf32>
    %c0_9 = arith.constant 0 : index
    %c0_10 = arith.constant 0 : index
    %11 = vector.load %arg5[%c0_9, %c0_10] : memref<1x64xf32, #tpu.memory_space<vmem>>, vector<1x64xf32>
    %12 = vector.broadcast %11 : vector<1x64xf32> to vector<128x64xf32>
    %13 = arith.addf %10, %12 : vector<128x64xf32>
    %c0_11 = arith.constant 0 : index
    %c0_12 = arith.constant 0 : index
    %14 = vector.load %arg6[%c0_11, %c0_12] : memref<128x64xf32, #tpu.memory_space<vmem>>, vector<128x64xf32>
    tpu.vector_store %arg6[%c0_11, %c0_12], %13 {strides = array<i32>} : memref<128x64xf32, #tpu.memory_space<vmem>>, vector<128x64xf32>,
    return
  }
  func.func @transform_0(%arg0: i32) -> (i32, i32) {
    %c0_i32 = arith.constant 0 : i32
    %c0_i32_0 = arith.constant 0 : i32
    return %arg0, %c0_i32 : i32, i32
  }
  func.func @transform_1(%arg0: i32) -> (i32, i32) {
    %c0_i32 = arith.constant 0 : i32
    %c0_i32_0 = arith.constant 0 : i32
    %c0_i32_1 = arith.constant 0 : i32
    return %c0_i32, %c0_i32_0 : i32, i32
  }
  func.func @transform_2(%arg0: i32) -> (i32, i32) {
    %c0_i32 = arith.constant 0 : i32
    %c0_i32_0 = arith.constant 0 : i32
    %c0_i32_1 = arith.constant 0 : i32
    return %c0_i32, %c0_i32_0 : i32, i32
  }
  func.func @transform_3(%arg0: i32) -> (i32, i32) {
    %c0_i32 = arith.constant 0 : i32
    %c0_i32_0 = arith.constant 0 : i32
    %c0_i32_1 = arith.constant 0 : i32
    return %c0_i32, %c0_i32_0 : i32, i32
  }
  func.func @transform_4(%arg0: i32) -> (i32, i32) {
    %c0_i32 = arith.constant 0 : i32
    %c0_i32_0 = arith.constant 0 : i32
    %c0_i32_1 = arith.constant 0 : i32
    return %c0_i32, %c0_i32_0 : i32, i32
  }
  func.func @transform_5(%arg0: i32) -> (i32, i32) {
    %c0_i32 = arith.constant 0 : i32
    %c0_i32_0 = arith.constant 0 : i32
    return %arg0, %c0_i32 : i32, i32
  }
}

module attributes {stable_mosaic.version = 11 : i64} {
  func.func @_linear_kernel_fullk(%arg0: i32, %arg1: i32, %arg2: memref<16x64xbf16, #tpu.memory_space<vmem>>, %arg3: memref<64x192xbf16, #tpu.memory_space<vmem>>, %arg4: memref<1x192xf32, #tpu.memory_space<vmem>>, %arg5: memref<16x192xbf16, #tpu.memory_space<vmem>>) attributes {dimension_semantics = [#tpu.dimension_semantics<parallel>, #tpu.dimension_semantics<parallel>], iteration_bounds = array<i64: 1, 1>, scalar_prefetch = 0 : i64, scratch_operands = 0 : i64, tpu.core_type = #tpu.core_type<tc>, window_params = [{transform_indices = @transform_0, window_bounds = array<i64: 16, 64>}, {transform_indices = @transform_1, window_bounds = array<i64: 64, 192>}, {transform_indices = @transform_2, window_bounds = array<i64: 1, 192>}, {transform_indices = @transform_3, window_bounds = array<i64: 16, 192>}]} {
    %c0 = arith.constant 0 : index
    %c0_0 = arith.constant 0 : index
    %0 = vector.load %arg2[%c0, %c0_0] : memref<16x64xbf16, #tpu.memory_space<vmem>>, vector<16x64xbf16>
    %c0_1 = arith.constant 0 : index
    %c0_2 = arith.constant 0 : index
    %1 = vector.load %arg3[%c0_1, %c0_2] : memref<64x192xbf16, #tpu.memory_space<vmem>>, vector<64x192xbf16>
    %cst = arith.constant dense<0.000000e+00> : vector<16x192xf32>
    %2 = tpu.matmul %0, %1, %cst {dimension_numbers = #tpu.dot_dimension_numbers<[1], [0], [0], [1], [0, 0, 1, 1], [], []>} : vector<16x64xbf16>, vector<64x192xbf16>, vector<16x192xf32> -> vector<16x192xf32>
    %c0_3 = arith.constant 0 : index
    %c0_4 = arith.constant 0 : index
    %3 = vector.load %arg4[%c0_3, %c0_4] : memref<1x192xf32, #tpu.memory_space<vmem>>, vector<1x192xf32>
    %4 = vector.broadcast %3 : vector<1x192xf32> to vector<16x192xf32>
    %5 = arith.addf %2, %4 : vector<16x192xf32>
    %6 = arith.truncf %5 : vector<16x192xf32> to vector<16x192xbf16>
    %c0_5 = arith.constant 0 : index
    %c0_6 = arith.constant 0 : index
    %7 = vector.load %arg5[%c0_5, %c0_6] : memref<16x192xbf16, #tpu.memory_space<vmem>>, vector<16x192xbf16>
    tpu.vector_store %arg5[%c0_5, %c0_6], %6 {strides = array<i32>} : memref<16x192xbf16, #tpu.memory_space<vmem>>, vector<16x192xbf16>,
    return
  }
  func.func @transform_0(%arg0: i32, %arg1: i32) -> (i32, i32) {
    %c0_i32 = arith.constant 0 : i32
    %c0_i32_0 = arith.constant 0 : i32
    return %arg0, %c0_i32 : i32, i32
  }
  func.func @transform_1(%arg0: i32, %arg1: i32) -> (i32, i32) {
    %c0_i32 = arith.constant 0 : i32
    %c0_i32_0 = arith.constant 0 : i32
    return %c0_i32, %arg1 : i32, i32
  }
  func.func @transform_2(%arg0: i32, %arg1: i32) -> (i32, i32) {
    %c0_i32 = arith.constant 0 : i32
    %c0_i32_0 = arith.constant 0 : i32
    return %c0_i32, %arg1 : i32, i32
  }
  func.func @transform_3(%arg0: i32, %arg1: i32) -> (i32, i32) {
    %c0_i32 = arith.constant 0 : i32
    return %arg0, %arg1 : i32, i32
  }
}

module attributes {stable_mosaic.version = 11 : i64} {
  func.func @_self_attn_kernel(%arg0: i32, %arg1: memref<1x8x192xbf16, #tpu.memory_space<vmem>>, %arg2: memref<8x8xf32, #tpu.memory_space<vmem>>, %arg3: memref<1x8x64xbf16, #tpu.memory_space<vmem>>) attributes {dimension_semantics = [#tpu.dimension_semantics<parallel>], iteration_bounds = array<i64: 2>, scalar_prefetch = 0 : i64, scratch_operands = 0 : i64, tpu.core_type = #tpu.core_type<tc>, window_params = [{transform_indices = @transform_0, window_bounds = array<i64: 1, 8, 192>}, {pipeline_mode = #tpu.pipeline_mode<synchronous>, transform_indices = @transform_1, window_bounds = array<i64: 8, 8>}, {transform_indices = @transform_2, window_bounds = array<i64: 1, 8, 64>}]} {
    %c0 = arith.constant 0 : index
    %c0_0 = arith.constant 0 : index
    %c0_1 = arith.constant 0 : index
    %0 = vector.load %arg1[%c0, %c0_0, %c0_1] : memref<1x8x192xbf16, #tpu.memory_space<vmem>>, vector<1x8x192xbf16>
    %1 = vector.shape_cast %0 : vector<1x8x192xbf16> to vector<8x192xbf16>
    %c0_2 = arith.constant 0 : index
    %c0_3 = arith.constant 0 : index
    %2 = vector.load %arg2[%c0_2, %c0_3] : memref<8x8xf32, #tpu.memory_space<vmem>>, vector<8x8xf32>
    %3 = vector.extract_strided_slice %1 {offsets = [0, 0], sizes = [8, 16], strides = [1, 1]} : vector<8x192xbf16> to vector<8x16xbf16>
    %4 = vector.extract_strided_slice %1 {offsets = [0, 64], sizes = [8, 16], strides = [1, 1]} : vector<8x192xbf16> to vector<8x16xbf16>
    %5 = vector.extract_strided_slice %1 {offsets = [0, 128], sizes = [8, 16], strides = [1, 1]} : vector<8x192xbf16> to vector<8x16xbf16>
    %cst = arith.constant dense<0.000000e+00> : vector<8x8xf32>
    %6 = tpu.matmul %3, %4, %cst {dimension_numbers = #tpu.dot_dimension_numbers<[1], [1], [0], [0], [0, 0, 1, 0], [], []>} : vector<8x16xbf16>, vector<8x16xbf16>, vector<8x8xf32> -> vector<8x8xf32>
    %cst_4 = arith.constant 2.500000e-01 : f32
    %7 = vector.broadcast %cst_4 : f32 to vector<8x8xf32>
    %8 = arith.mulf %6, %7 : vector<8x8xf32>
    %9 = arith.addf %8, %2 : vector<8x8xf32>
    %cst_5 = arith.constant dense<0xFF800000> : vector<8xf32>
    %10 = vector.multi_reduction <maximumf>, %9, %cst_5 [1] : vector<8x8xf32> to vector<8xf32>
    %11 = vector.shape_cast %10 : vector<8xf32> to vector<8x1xf32>
    %12 = vector.broadcast %11 : vector<8x1xf32> to vector<8x8xf32>
    %13 = arith.subf %9, %12 : vector<8x8xf32>
    %14 = math.exp %13 : vector<8x8xf32>
    %cst_6 = arith.constant dense<0.000000e+00> : vector<8xf32>
    %15 = vector.multi_reduction <add>, %14, %cst_6 [1] : vector<8x8xf32> to vector<8xf32>
    %16 = vector.shape_cast %15 : vector<8xf32> to vector<8x1xf32>
    %17 = arith.truncf %14 : vector<8x8xf32> to vector<8x8xbf16>
    %cst_7 = arith.constant dense<0.000000e+00> : vector<8x16xf32>
    %18 = tpu.matmul %17, %5, %cst_7 {dimension_numbers = #tpu.dot_dimension_numbers<[1], [0], [0], [1], [0, 0, 1, 1], [], []>} : vector<8x8xbf16>, vector<8x16xbf16>, vector<8x16xf32> -> vector<8x16xf32>
    %19 = tpu.reciprocal %16 {approx = true} : vector<8x1xf32> -> vector<8x1xf32>
    %20 = vector.broadcast %19 : vector<8x1xf32> to vector<8x16xf32>
    %21 = arith.mulf %18, %20 : vector<8x16xf32>
    %22 = arith.truncf %21 : vector<8x16xf32> to vector<8x16xbf16>
    %c0_8 = arith.constant 0 : index
    %c0_9 = arith.constant 0 : index
    %c0_10 = arith.constant 0 : index
    %23 = vector.load %arg3[%c0_8, %c0_9, %c0_10] : memref<1x8x64xbf16, #tpu.memory_space<vmem>>, vector<1x8x16xbf16>
    %24 = vector.shape_cast %23 : vector<1x8x16xbf16> to vector<8x16xbf16>
    %25 = vector.shape_cast %22 : vector<8x16xbf16> to vector<1x8x16xbf16>
    tpu.vector_store %arg3[%c0_8, %c0_9, %c0_10], %25 {strides = array<i32>} : memref<1x8x64xbf16, #tpu.memory_space<vmem>>, vector<1x8x16xbf16>,
    %26 = vector.extract_strided_slice %1 {offsets = [0, 16], sizes = [8, 16], strides = [1, 1]} : vector<8x192xbf16> to vector<8x16xbf16>
    %27 = vector.extract_strided_slice %1 {offsets = [0, 80], sizes = [8, 16], strides = [1, 1]} : vector<8x192xbf16> to vector<8x16xbf16>
    %28 = vector.extract_strided_slice %1 {offsets = [0, 144], sizes = [8, 16], strides = [1, 1]} : vector<8x192xbf16> to vector<8x16xbf16>
    %cst_11 = arith.constant dense<0.000000e+00> : vector<8x8xf32>
    %29 = tpu.matmul %26, %27, %cst_11 {dimension_numbers = #tpu.dot_dimension_numbers<[1], [1], [0], [0], [0, 0, 1, 0], [], []>} : vector<8x16xbf16>, vector<8x16xbf16>, vector<8x8xf32> -> vector<8x8xf32>
    %cst_12 = arith.constant 2.500000e-01 : f32
    %30 = vector.broadcast %cst_12 : f32 to vector<8x8xf32>
    %31 = arith.mulf %29, %30 : vector<8x8xf32>
    %32 = arith.addf %31, %2 : vector<8x8xf32>
    %cst_13 = arith.constant dense<0xFF800000> : vector<8xf32>
    %33 = vector.multi_reduction <maximumf>, %32, %cst_13 [1] : vector<8x8xf32> to vector<8xf32>
    %34 = vector.shape_cast %33 : vector<8xf32> to vector<8x1xf32>
    %35 = vector.broadcast %34 : vector<8x1xf32> to vector<8x8xf32>
    %36 = arith.subf %32, %35 : vector<8x8xf32>
    %37 = math.exp %36 : vector<8x8xf32>
    %cst_14 = arith.constant dense<0.000000e+00> : vector<8xf32>
    %38 = vector.multi_reduction <add>, %37, %cst_14 [1] : vector<8x8xf32> to vector<8xf32>
    %39 = vector.shape_cast %38 : vector<8xf32> to vector<8x1xf32>
    %40 = arith.truncf %37 : vector<8x8xf32> to vector<8x8xbf16>
    %cst_15 = arith.constant dense<0.000000e+00> : vector<8x16xf32>
    %41 = tpu.matmul %40, %28, %cst_15 {dimension_numbers = #tpu.dot_dimension_numbers<[1], [0], [0], [1], [0, 0, 1, 1], [], []>} : vector<8x8xbf16>, vector<8x16xbf16>, vector<8x16xf32> -> vector<8x16xf32>
    %42 = tpu.reciprocal %39 {approx = true} : vector<8x1xf32> -> vector<8x1xf32>
    %43 = vector.broadcast %42 : vector<8x1xf32> to vector<8x16xf32>
    %44 = arith.mulf %41, %43 : vector<8x16xf32>
    %45 = arith.truncf %44 : vector<8x16xf32> to vector<8x16xbf16>
    %c0_16 = arith.constant 0 : index
    %c0_17 = arith.constant 0 : index
    %c16 = arith.constant 16 : index
    %46 = vector.load %arg3[%c0_16, %c0_17, %c16] : memref<1x8x64xbf16, #tpu.memory_space<vmem>>, vector<1x8x16xbf16>
    %47 = vector.shape_cast %46 : vector<1x8x16xbf16> to vector<8x16xbf16>
    %48 = vector.shape_cast %45 : vector<8x16xbf16> to vector<1x8x16xbf16>
    tpu.vector_store %arg3[%c0_16, %c0_17, %c16], %48 {strides = array<i32>} : memref<1x8x64xbf16, #tpu.memory_space<vmem>>, vector<1x8x16xbf16>,
    %49 = vector.extract_strided_slice %1 {offsets = [0, 32], sizes = [8, 16], strides = [1, 1]} : vector<8x192xbf16> to vector<8x16xbf16>
    %50 = vector.extract_strided_slice %1 {offsets = [0, 96], sizes = [8, 16], strides = [1, 1]} : vector<8x192xbf16> to vector<8x16xbf16>
    %51 = vector.extract_strided_slice %1 {offsets = [0, 160], sizes = [8, 16], strides = [1, 1]} : vector<8x192xbf16> to vector<8x16xbf16>
    %cst_18 = arith.constant dense<0.000000e+00> : vector<8x8xf32>
    %52 = tpu.matmul %49, %50, %cst_18 {dimension_numbers = #tpu.dot_dimension_numbers<[1], [1], [0], [0], [0, 0, 1, 0], [], []>} : vector<8x16xbf16>, vector<8x16xbf16>, vector<8x8xf32> -> vector<8x8xf32>
    %cst_19 = arith.constant 2.500000e-01 : f32
    %53 = vector.broadcast %cst_19 : f32 to vector<8x8xf32>
    %54 = arith.mulf %52, %53 : vector<8x8xf32>
    %55 = arith.addf %54, %2 : vector<8x8xf32>
    %cst_20 = arith.constant dense<0xFF800000> : vector<8xf32>
    %56 = vector.multi_reduction <maximumf>, %55, %cst_20 [1] : vector<8x8xf32> to vector<8xf32>
    %57 = vector.shape_cast %56 : vector<8xf32> to vector<8x1xf32>
    %58 = vector.broadcast %57 : vector<8x1xf32> to vector<8x8xf32>
    %59 = arith.subf %55, %58 : vector<8x8xf32>
    %60 = math.exp %59 : vector<8x8xf32>
    %cst_21 = arith.constant dense<0.000000e+00> : vector<8xf32>
    %61 = vector.multi_reduction <add>, %60, %cst_21 [1] : vector<8x8xf32> to vector<8xf32>
    %62 = vector.shape_cast %61 : vector<8xf32> to vector<8x1xf32>
    %63 = arith.truncf %60 : vector<8x8xf32> to vector<8x8xbf16>
    %cst_22 = arith.constant dense<0.000000e+00> : vector<8x16xf32>
    %64 = tpu.matmul %63, %51, %cst_22 {dimension_numbers = #tpu.dot_dimension_numbers<[1], [0], [0], [1], [0, 0, 1, 1], [], []>} : vector<8x8xbf16>, vector<8x16xbf16>, vector<8x16xf32> -> vector<8x16xf32>
    %65 = tpu.reciprocal %62 {approx = true} : vector<8x1xf32> -> vector<8x1xf32>
    %66 = vector.broadcast %65 : vector<8x1xf32> to vector<8x16xf32>
    %67 = arith.mulf %64, %66 : vector<8x16xf32>
    %68 = arith.truncf %67 : vector<8x16xf32> to vector<8x16xbf16>
    %c0_23 = arith.constant 0 : index
    %c0_24 = arith.constant 0 : index
    %c32 = arith.constant 32 : index
    %69 = vector.load %arg3[%c0_23, %c0_24, %c32] : memref<1x8x64xbf16, #tpu.memory_space<vmem>>, vector<1x8x16xbf16>
    %70 = vector.shape_cast %69 : vector<1x8x16xbf16> to vector<8x16xbf16>
    %71 = vector.shape_cast %68 : vector<8x16xbf16> to vector<1x8x16xbf16>
    tpu.vector_store %arg3[%c0_23, %c0_24, %c32], %71 {strides = array<i32>} : memref<1x8x64xbf16, #tpu.memory_space<vmem>>, vector<1x8x16xbf16>,
    %72 = vector.extract_strided_slice %1 {offsets = [0, 48], sizes = [8, 16], strides = [1, 1]} : vector<8x192xbf16> to vector<8x16xbf16>
    %73 = vector.extract_strided_slice %1 {offsets = [0, 112], sizes = [8, 16], strides = [1, 1]} : vector<8x192xbf16> to vector<8x16xbf16>
    %74 = vector.extract_strided_slice %1 {offsets = [0, 176], sizes = [8, 16], strides = [1, 1]} : vector<8x192xbf16> to vector<8x16xbf16>
    %cst_25 = arith.constant dense<0.000000e+00> : vector<8x8xf32>
    %75 = tpu.matmul %72, %73, %cst_25 {dimension_numbers = #tpu.dot_dimension_numbers<[1], [1], [0], [0], [0, 0, 1, 0], [], []>} : vector<8x16xbf16>, vector<8x16xbf16>, vector<8x8xf32> -> vector<8x8xf32>
    %cst_26 = arith.constant 2.500000e-01 : f32
    %76 = vector.broadcast %cst_26 : f32 to vector<8x8xf32>
    %77 = arith.mulf %75, %76 : vector<8x8xf32>
    %78 = arith.addf %77, %2 : vector<8x8xf32>
    %cst_27 = arith.constant dense<0xFF800000> : vector<8xf32>
    %79 = vector.multi_reduction <maximumf>, %78, %cst_27 [1] : vector<8x8xf32> to vector<8xf32>
    %80 = vector.shape_cast %79 : vector<8xf32> to vector<8x1xf32>
    %81 = vector.broadcast %80 : vector<8x1xf32> to vector<8x8xf32>
    %82 = arith.subf %78, %81 : vector<8x8xf32>
    %83 = math.exp %82 : vector<8x8xf32>
    %cst_28 = arith.constant dense<0.000000e+00> : vector<8xf32>
    %84 = vector.multi_reduction <add>, %83, %cst_28 [1] : vector<8x8xf32> to vector<8xf32>
    %85 = vector.shape_cast %84 : vector<8xf32> to vector<8x1xf32>
    %86 = arith.truncf %83 : vector<8x8xf32> to vector<8x8xbf16>
    %cst_29 = arith.constant dense<0.000000e+00> : vector<8x16xf32>
    %87 = tpu.matmul %86, %74, %cst_29 {dimension_numbers = #tpu.dot_dimension_numbers<[1], [0], [0], [1], [0, 0, 1, 1], [], []>} : vector<8x8xbf16>, vector<8x16xbf16>, vector<8x16xf32> -> vector<8x16xf32>
    %88 = tpu.reciprocal %85 {approx = true} : vector<8x1xf32> -> vector<8x1xf32>
    %89 = vector.broadcast %88 : vector<8x1xf32> to vector<8x16xf32>
    %90 = arith.mulf %87, %89 : vector<8x16xf32>
    %91 = arith.truncf %90 : vector<8x16xf32> to vector<8x16xbf16>
    %c0_30 = arith.constant 0 : index
    %c0_31 = arith.constant 0 : index
    %c48 = arith.constant 48 : index
    %92 = vector.load %arg3[%c0_30, %c0_31, %c48] : memref<1x8x64xbf16, #tpu.memory_space<vmem>>, vector<1x8x16xbf16>
    %93 = vector.shape_cast %92 : vector<1x8x16xbf16> to vector<8x16xbf16>
    %94 = vector.shape_cast %91 : vector<8x16xbf16> to vector<1x8x16xbf16>
    tpu.vector_store %arg3[%c0_30, %c0_31, %c48], %94 {strides = array<i32>} : memref<1x8x64xbf16, #tpu.memory_space<vmem>>, vector<1x8x16xbf16>,
    return
  }
  func.func @transform_0(%arg0: i32) -> (i32, i32, i32) {
    %c0_i32 = arith.constant 0 : i32
    %c0_i32_0 = arith.constant 0 : i32
    %c0_i32_1 = arith.constant 0 : i32
    return %arg0, %c0_i32, %c0_i32_0 : i32, i32, i32
  }
  func.func @transform_1(%arg0: i32) -> (i32, i32) {
    %c0_i32 = arith.constant 0 : i32
    %c0_i32_0 = arith.constant 0 : i32
    %c0_i32_1 = arith.constant 0 : i32
    return %c0_i32, %c0_i32_0 : i32, i32
  }
  func.func @transform_2(%arg0: i32) -> (i32, i32, i32) {
    %c0_i32 = arith.constant 0 : i32
    %c0_i32_0 = arith.constant 0 : i32
    %c0_i32_1 = arith.constant 0 : i32
    return %arg0, %c0_i32, %c0_i32_0 : i32, i32, i32
  }
}

module attributes {stable_mosaic.version = 11 : i64} {
  func.func @_linear_kernel_fullk(%arg0: i32, %arg1: i32, %arg2: memref<16x64xbf16, #tpu.memory_space<vmem>>, %arg3: memref<64x64xbf16, #tpu.memory_space<vmem>>, %arg4: memref<1x64xf32, #tpu.memory_space<vmem>>, %arg5: memref<16x64xf32, #tpu.memory_space<vmem>>) attributes {dimension_semantics = [#tpu.dimension_semantics<parallel>, #tpu.dimension_semantics<parallel>], iteration_bounds = array<i64: 1, 1>, scalar_prefetch = 0 : i64, scratch_operands = 0 : i64, tpu.core_type = #tpu.core_type<tc>, window_params = [{transform_indices = @transform_0, window_bounds = array<i64: 16, 64>}, {transform_indices = @transform_1, window_bounds = array<i64: 64, 64>}, {transform_indices = @transform_2, window_bounds = array<i64: 1, 64>}, {transform_indices = @transform_3, window_bounds = array<i64: 16, 64>}]} {
    %c0 = arith.constant 0 : index
    %c0_0 = arith.constant 0 : index
    %0 = vector.load %arg2[%c0, %c0_0] : memref<16x64xbf16, #tpu.memory_space<vmem>>, vector<16x64xbf16>
    %c0_1 = arith.constant 0 : index
    %c0_2 = arith.constant 0 : index
    %1 = vector.load %arg3[%c0_1, %c0_2] : memref<64x64xbf16, #tpu.memory_space<vmem>>, vector<64x64xbf16>
    %cst = arith.constant dense<0.000000e+00> : vector<16x64xf32>
    %2 = tpu.matmul %0, %1, %cst {dimension_numbers = #tpu.dot_dimension_numbers<[1], [0], [0], [1], [0, 0, 1, 1], [], []>} : vector<16x64xbf16>, vector<64x64xbf16>, vector<16x64xf32> -> vector<16x64xf32>
    %c0_3 = arith.constant 0 : index
    %c0_4 = arith.constant 0 : index
    %3 = vector.load %arg4[%c0_3, %c0_4] : memref<1x64xf32, #tpu.memory_space<vmem>>, vector<1x64xf32>
    %4 = vector.broadcast %3 : vector<1x64xf32> to vector<16x64xf32>
    %5 = arith.addf %2, %4 : vector<16x64xf32>
    %c0_5 = arith.constant 0 : index
    %c0_6 = arith.constant 0 : index
    %6 = vector.load %arg5[%c0_5, %c0_6] : memref<16x64xf32, #tpu.memory_space<vmem>>, vector<16x64xf32>
    tpu.vector_store %arg5[%c0_5, %c0_6], %5 {strides = array<i32>} : memref<16x64xf32, #tpu.memory_space<vmem>>, vector<16x64xf32>,
    return
  }
  func.func @transform_0(%arg0: i32, %arg1: i32) -> (i32, i32) {
    %c0_i32 = arith.constant 0 : i32
    %c0_i32_0 = arith.constant 0 : i32
    return %arg0, %c0_i32 : i32, i32
  }
  func.func @transform_1(%arg0: i32, %arg1: i32) -> (i32, i32) {
    %c0_i32 = arith.constant 0 : i32
    %c0_i32_0 = arith.constant 0 : i32
    return %c0_i32, %arg1 : i32, i32
  }
  func.func @transform_2(%arg0: i32, %arg1: i32) -> (i32, i32) {
    %c0_i32 = arith.constant 0 : i32
    %c0_i32_0 = arith.constant 0 : i32
    return %c0_i32, %arg1 : i32, i32
  }
  func.func @transform_3(%arg0: i32, %arg1: i32) -> (i32, i32) {
    %c0_i32 = arith.constant 0 : i32
    return %arg0, %arg1 : i32, i32
  }
}

module attributes {stable_mosaic.version = 11 : i64} {
  func.func @_fused_mlp_kernel(%arg0: i32, %arg1: memref<16x64xbf16, #tpu.memory_space<vmem>>, %arg2: memref<64x256xbf16, #tpu.memory_space<vmem>>, %arg3: memref<1x256xf32, #tpu.memory_space<vmem>>, %arg4: memref<256x64xbf16, #tpu.memory_space<vmem>>, %arg5: memref<1x64xf32, #tpu.memory_space<vmem>>, %arg6: memref<16x64xf32, #tpu.memory_space<vmem>>) attributes {dimension_semantics = [#tpu.dimension_semantics<parallel>], iteration_bounds = array<i64: 1>, scalar_prefetch = 0 : i64, scratch_operands = 0 : i64, tpu.core_type = #tpu.core_type<tc>, window_params = [{transform_indices = @transform_0, window_bounds = array<i64: 16, 64>}, {pipeline_mode = #tpu.pipeline_mode<synchronous>, transform_indices = @transform_1, window_bounds = array<i64: 64, 256>}, {pipeline_mode = #tpu.pipeline_mode<synchronous>, transform_indices = @transform_2, window_bounds = array<i64: 1, 256>}, {pipeline_mode = #tpu.pipeline_mode<synchronous>, transform_indices = @transform_3, window_bounds = array<i64: 256, 64>}, {pipeline_mode = #tpu.pipeline_mode<synchronous>, transform_indices = @transform_4, window_bounds = array<i64: 1, 64>}, {transform_indices = @transform_5, window_bounds = array<i64: 16, 64>}]} {
    %c0 = arith.constant 0 : index
    %c0_0 = arith.constant 0 : index
    %0 = vector.load %arg1[%c0, %c0_0] : memref<16x64xbf16, #tpu.memory_space<vmem>>, vector<16x64xbf16>
    %c0_1 = arith.constant 0 : index
    %c0_2 = arith.constant 0 : index
    %1 = vector.load %arg2[%c0_1, %c0_2] : memref<64x256xbf16, #tpu.memory_space<vmem>>, vector<64x256xbf16>
    %cst = arith.constant dense<0.000000e+00> : vector<16x256xf32>
    %2 = tpu.matmul %0, %1, %cst {dimension_numbers = #tpu.dot_dimension_numbers<[1], [0], [0], [1], [0, 0, 1, 1], [], []>} : vector<16x64xbf16>, vector<64x256xbf16>, vector<16x256xf32> -> vector<16x256xf32>
    %c0_3 = arith.constant 0 : index
    %c0_4 = arith.constant 0 : index
    %3 = vector.load %arg3[%c0_3, %c0_4] : memref<1x256xf32, #tpu.memory_space<vmem>>, vector<1x256xf32>
    %4 = vector.broadcast %3 : vector<1x256xf32> to vector<16x256xf32>
    %5 = arith.addf %2, %4 : vector<16x256xf32>
    %cst_5 = arith.constant 5.000000e-01 : f32
    %6 = vector.broadcast %cst_5 : f32 to vector<16x256xf32>
    %7 = arith.mulf %6, %5 : vector<16x256xf32>
    %cst_6 = arith.constant 4.471500e-02 : f32
    %8 = vector.broadcast %cst_6 : f32 to vector<16x256xf32>
    %9 = arith.mulf %8, %5 : vector<16x256xf32>
    %10 = arith.mulf %9, %5 : vector<16x256xf32>
    %11 = arith.mulf %10, %5 : vector<16x256xf32>
    %12 = arith.addf %5, %11 : vector<16x256xf32>
    %cst_7 = arith.constant 0.797884583 : f32
    %13 = vector.broadcast %cst_7 : f32 to vector<16x256xf32>
    %14 = arith.mulf %13, %12 : vector<16x256xf32>
    %15 = math.tanh %14 : vector<16x256xf32>
    %cst_8 = arith.constant 1.000000e+00 : f32
    %16 = vector.broadcast %cst_8 : f32 to vector<16x256xf32>
    %17 = arith.addf %16, %15 : vector<16x256xf32>
    %18 = arith.mulf %7, %17 : vector<16x256xf32>
    %19 = arith.truncf %18 : vector<16x256xf32> to vector<16x256xbf16>
    %c0_9 = arith.constant 0 : index
    %c0_10 = arith.constant 0 : index
    %20 = vector.load %arg4[%c0_9, %c0_10] : memref<256x64xbf16, #tpu.memory_space<vmem>>, vector<256x64xbf16>
    %cst_11 = arith.constant dense<0.000000e+00> : vector<16x64xf32>
    %21 = tpu.matmul %19, %20, %cst_11 {dimension_numbers = #tpu.dot_dimension_numbers<[1], [0], [0], [1], [0, 0, 1, 1], [], []>} : vector<16x256xbf16>, vector<256x64xbf16>, vector<16x64xf32> -> vector<16x64xf32>
    %c0_12 = arith.constant 0 : index
    %c0_13 = arith.constant 0 : index
    %22 = vector.load %arg5[%c0_12, %c0_13] : memref<1x64xf32, #tpu.memory_space<vmem>>, vector<1x64xf32>
    %23 = vector.broadcast %22 : vector<1x64xf32> to vector<16x64xf32>
    %24 = arith.addf %21, %23 : vector<16x64xf32>
    %c0_14 = arith.constant 0 : index
    %c0_15 = arith.constant 0 : index
    %25 = vector.load %arg6[%c0_14, %c0_15] : memref<16x64xf32, #tpu.memory_space<vmem>>, vector<16x64xf32>
    tpu.vector_store %arg6[%c0_14, %c0_15], %24 {strides = array<i32>} : memref<16x64xf32, #tpu.memory_space<vmem>>, vector<16x64xf32>,
    return
  }
  func.func @transform_0(%arg0: i32) -> (i32, i32) {
    %c0_i32 = arith.constant 0 : i32
    %c0_i32_0 = arith.constant 0 : i32
    return %arg0, %c0_i32 : i32, i32
  }
  func.func @transform_1(%arg0: i32) -> (i32, i32) {
    %c0_i32 = arith.constant 0 : i32
    %c0_i32_0 = arith.constant 0 : i32
    %c0_i32_1 = arith.constant 0 : i32
    return %c0_i32, %c0_i32_0 : i32, i32
  }
  func.func @transform_2(%arg0: i32) -> (i32, i32) {
    %c0_i32 = arith.constant 0 : i32
    %c0_i32_0 = arith.constant 0 : i32
    %c0_i32_1 = arith.constant 0 : i32
    return %c0_i32, %c0_i32_0 : i32, i32
  }
  func.func @transform_3(%arg0: i32) -> (i32, i32) {
    %c0_i32 = arith.constant 0 : i32
    %c0_i32_0 = arith.constant 0 : i32
    %c0_i32_1 = arith.constant 0 : i32
    return %c0_i32, %c0_i32_0 : i32, i32
  }
  func.func @transform_4(%arg0: i32) -> (i32, i32) {
    %c0_i32 = arith.constant 0 : i32
    %c0_i32_0 = arith.constant 0 : i32
    %c0_i32_1 = arith.constant 0 : i32
    return %c0_i32, %c0_i32_0 : i32, i32
  }
  func.func @transform_5(%arg0: i32) -> (i32, i32) {
    %c0_i32 = arith.constant 0 : i32
    %c0_i32_0 = arith.constant 0 : i32
    return %arg0, %c0_i32 : i32, i32
  }
}

module attributes {stable_mosaic.version = 11 : i64} {
  func.func @_linear_kernel_fullk(%arg0: i32, %arg1: i32, %arg2: memref<2x256xbf16, #tpu.memory_space<vmem>>, %arg3: memref<256x128xbf16, #tpu.memory_space<vmem>>, %arg4: memref<1x128xf32, #tpu.memory_space<vmem>>, %arg5: memref<2x128xf32, #tpu.memory_space<vmem>>) attributes {dimension_semantics = [#tpu.dimension_semantics<parallel>, #tpu.dimension_semantics<parallel>], iteration_bounds = array<i64: 1, 1>, scalar_prefetch = 0 : i64, scratch_operands = 0 : i64, tpu.core_type = #tpu.core_type<tc>, window_params = [{transform_indices = @transform_0, window_bounds = array<i64: 2, 256>}, {transform_indices = @transform_1, window_bounds = array<i64: 256, 128>}, {transform_indices = @transform_2, window_bounds = array<i64: 1, 128>}, {transform_indices = @transform_3, window_bounds = array<i64: 2, 128>}]} {
    %c0 = arith.constant 0 : index
    %c0_0 = arith.constant 0 : index
    %0 = vector.load %arg2[%c0, %c0_0] : memref<2x256xbf16, #tpu.memory_space<vmem>>, vector<2x256xbf16>
    %c0_1 = arith.constant 0 : index
    %c0_2 = arith.constant 0 : index
    %1 = vector.load %arg3[%c0_1, %c0_2] : memref<256x128xbf16, #tpu.memory_space<vmem>>, vector<256x128xbf16>
    %cst = arith.constant dense<0.000000e+00> : vector<2x128xf32>
    %2 = tpu.matmul %0, %1, %cst {dimension_numbers = #tpu.dot_dimension_numbers<[1], [0], [0], [1], [0, 0, 1, 1], [], []>} : vector<2x256xbf16>, vector<256x128xbf16>, vector<2x128xf32> -> vector<2x128xf32>
    %c0_3 = arith.constant 0 : index
    %c0_4 = arith.constant 0 : index
    %3 = vector.load %arg4[%c0_3, %c0_4] : memref<1x128xf32, #tpu.memory_space<vmem>>, vector<1x128xf32>
    %4 = vector.broadcast %3 : vector<1x128xf32> to vector<2x128xf32>
    %5 = arith.addf %2, %4 : vector<2x128xf32>
    %c0_5 = arith.constant 0 : index
    %c0_6 = arith.constant 0 : index
    %6 = vector.load %arg5[%c0_5, %c0_6] : memref<2x128xf32, #tpu.memory_space<vmem>>, vector<2x128xf32>
    tpu.vector_store %arg5[%c0_5, %c0_6], %5 {strides = array<i32>} : memref<2x128xf32, #tpu.memory_space<vmem>>, vector<2x128xf32>,
    return
  }
  func.func @transform_0(%arg0: i32, %arg1: i32) -> (i32, i32) {
    %c0_i32 = arith.constant 0 : i32
    %c0_i32_0 = arith.constant 0 : i32
    return %arg0, %c0_i32 : i32, i32
  }
  func.func @transform_1(%arg0: i32, %arg1: i32) -> (i32, i32) {
    %c0_i32 = arith.constant 0 : i32
    %c0_i32_0 = arith.constant 0 : i32
    return %c0_i32, %arg1 : i32, i32
  }
  func.func @transform_2(%arg0: i32, %arg1: i32) -> (i32, i32) {
    %c0_i32 = arith.constant 0 : i32
    %c0_i32_0 = arith.constant 0 : i32
    return %c0_i32, %arg1 : i32, i32
  }
  func.func @transform_3(%arg0: i32, %arg1: i32) -> (i32, i32) {
    %c0_i32 = arith.constant 0 : i32
    return %arg0, %arg1 : i32, i32
  }
}

module attributes {stable_mosaic.version = 11 : i64} {
  func.func @_fused_mlp_kernel(%arg0: i32, %arg1: memref<2x64xbf16, #tpu.memory_space<vmem>>, %arg2: memref<64x256xbf16, #tpu.memory_space<vmem>>, %arg3: memref<1x256xf32, #tpu.memory_space<vmem>>, %arg4: memref<256x256xbf16, #tpu.memory_space<vmem>>, %arg5: memref<1x256xf32, #tpu.memory_space<vmem>>, %arg6: memref<2x256xbf16, #tpu.memory_space<vmem>>) attributes {dimension_semantics = [#tpu.dimension_semantics<parallel>], iteration_bounds = array<i64: 1>, scalar_prefetch = 0 : i64, scratch_operands = 0 : i64, tpu.core_type = #tpu.core_type<tc>, window_params = [{transform_indices = @transform_0, window_bounds = array<i64: 2, 64>}, {pipeline_mode = #tpu.pipeline_mode<synchronous>, transform_indices = @transform_1, window_bounds = array<i64: 64, 256>}, {pipeline_mode = #tpu.pipeline_mode<synchronous>, transform_indices = @transform_2, window_bounds = array<i64: 1, 256>}, {pipeline_mode = #tpu.pipeline_mode<synchronous>, transform_indices = @transform_3, window_bounds = array<i64: 256, 256>}, {pipeline_mode = #tpu.pipeline_mode<synchronous>, transform_indices = @transform_4, window_bounds = array<i64: 1, 256>}, {transform_indices = @transform_5, window_bounds = array<i64: 2, 256>}]} {
    %c0 = arith.constant 0 : index
    %c0_0 = arith.constant 0 : index
    %0 = vector.load %arg1[%c0, %c0_0] : memref<2x64xbf16, #tpu.memory_space<vmem>>, vector<2x64xbf16>
    %c0_1 = arith.constant 0 : index
    %c0_2 = arith.constant 0 : index
    %1 = vector.load %arg2[%c0_1, %c0_2] : memref<64x256xbf16, #tpu.memory_space<vmem>>, vector<64x256xbf16>
    %cst = arith.constant dense<0.000000e+00> : vector<2x256xf32>
    %2 = tpu.matmul %0, %1, %cst {dimension_numbers = #tpu.dot_dimension_numbers<[1], [0], [0], [1], [0, 0, 1, 1], [], []>} : vector<2x64xbf16>, vector<64x256xbf16>, vector<2x256xf32> -> vector<2x256xf32>
    %c0_3 = arith.constant 0 : index
    %c0_4 = arith.constant 0 : index
    %3 = vector.load %arg3[%c0_3, %c0_4] : memref<1x256xf32, #tpu.memory_space<vmem>>, vector<1x256xf32>
    %4 = vector.broadcast %3 : vector<1x256xf32> to vector<2x256xf32>
    %5 = arith.addf %2, %4 : vector<2x256xf32>
    %cst_5 = arith.constant 0.000000e+00 : f32
    %6 = vector.broadcast %cst_5 : f32 to vector<2x256xf32>
    %7 = arith.maximumf %5, %6 : vector<2x256xf32>
    %8 = arith.truncf %7 : vector<2x256xf32> to vector<2x256xbf16>
    %c0_6 = arith.constant 0 : index
    %c0_7 = arith.constant 0 : index
    %9 = vector.load %arg4[%c0_6, %c0_7] : memref<256x256xbf16, #tpu.memory_space<vmem>>, vector<256x256xbf16>
    %cst_8 = arith.constant dense<0.000000e+00> : vector<2x256xf32>
    %10 = tpu.matmul %8, %9, %cst_8 {dimension_numbers = #tpu.dot_dimension_numbers<[1], [0], [0], [1], [0, 0, 1, 1], [], []>} : vector<2x256xbf16>, vector<256x256xbf16>, vector<2x256xf32> -> vector<2x256xf32>
    %c0_9 = arith.constant 0 : index
    %c0_10 = arith.constant 0 : index
    %11 = vector.load %arg5[%c0_9, %c0_10] : memref<1x256xf32, #tpu.memory_space<vmem>>, vector<1x256xf32>
    %12 = vector.broadcast %11 : vector<1x256xf32> to vector<2x256xf32>
    %13 = arith.addf %10, %12 : vector<2x256xf32>
    %cst_11 = arith.constant 0.000000e+00 : f32
    %14 = vector.broadcast %cst_11 : f32 to vector<2x256xf32>
    %15 = arith.maximumf %13, %14 : vector<2x256xf32>
    %16 = arith.truncf %15 : vector<2x256xf32> to vector<2x256xbf16>
    %c0_12 = arith.constant 0 : index
    %c0_13 = arith.constant 0 : index
    %17 = vector.load %arg6[%c0_12, %c0_13] : memref<2x256xbf16, #tpu.memory_space<vmem>>, vector<2x256xbf16>
    tpu.vector_store %arg6[%c0_12, %c0_13], %16 {strides = array<i32>} : memref<2x256xbf16, #tpu.memory_space<vmem>>, vector<2x256xbf16>,
    return
  }
  func.func @transform_0(%arg0: i32) -> (i32, i32) {
    %c0_i32 = arith.constant 0 : i32
    %c0_i32_0 = arith.constant 0 : i32
    return %arg0, %c0_i32 : i32, i32
  }
  func.func @transform_1(%arg0: i32) -> (i32, i32) {
    %c0_i32 = arith.constant 0 : i32
    %c0_i32_0 = arith.constant 0 : i32
    %c0_i32_1 = arith.constant 0 : i32
    return %c0_i32, %c0_i32_0 : i32, i32
  }
  func.func @transform_2(%arg0: i32) -> (i32, i32) {
    %c0_i32 = arith.constant 0 : i32
    %c0_i32_0 = arith.constant 0 : i32
    %c0_i32_1 = arith.constant 0 : i32
    return %c0_i32, %c0_i32_0 : i32, i32
  }
  func.func @transform_3(%arg0: i32) -> (i32, i32) {
    %c0_i32 = arith.constant 0 : i32
    %c0_i32_0 = arith.constant 0 : i32
    %c0_i32_1 = arith.constant 0 : i32
    return %c0_i32, %c0_i32_0 : i32, i32
  }
  func.func @transform_4(%arg0: i32) -> (i32, i32) {
    %c0_i32 = arith.constant 0 : i32
    %c0_i32_0 = arith.constant 0 : i32
    %c0_i32_1 = arith.constant 0 : i32
    return %c0_i32, %c0_i32_0 : i32, i32
  }
  func.func @transform_5(%arg0: i32) -> (i32, i32) {
    %c0_i32 = arith.constant 0 : i32
    %c0_i32_0 = arith.constant 0 : i32
    return %arg0, %c0_i32 : i32, i32
  }
}

module attributes {stable_mosaic.version = 11 : i64} {
  func.func @_chamfer_kernel(%arg0: i32, %arg1: memref<8x16x3xf32, #tpu.memory_space<vmem>>, %arg2: memref<8x16x3xf32, #tpu.memory_space<vmem>>, %arg3: memref<8x16xf32, #tpu.memory_space<vmem>>, %arg4: memref<8x16xf32, #tpu.memory_space<vmem>>) attributes {dimension_semantics = [#tpu.dimension_semantics<parallel>], iteration_bounds = array<i64: 2>, scalar_prefetch = 0 : i64, scratch_operands = 0 : i64, tpu.core_type = #tpu.core_type<tc>, window_params = [{transform_indices = @transform_0, window_bounds = array<i64: 8, 16, 3>}, {transform_indices = @transform_1, window_bounds = array<i64: 8, 16, 3>}, {transform_indices = @transform_2, window_bounds = array<i64: 8, 16>}, {transform_indices = @transform_3, window_bounds = array<i64: 8, 16>}]} {
    %c0 = arith.constant 0 : index
    %c0_0 = arith.constant 0 : index
    %c0_1 = arith.constant 0 : index
    %0 = vector.load %arg1[%c0, %c0_0, %c0_1] : memref<8x16x3xf32, #tpu.memory_space<vmem>>, vector<8x16x3xf32>
    %c0_2 = arith.constant 0 : index
    %c0_3 = arith.constant 0 : index
    %c0_4 = arith.constant 0 : index
    %1 = vector.load %arg2[%c0_2, %c0_3, %c0_4] : memref<8x16x3xf32, #tpu.memory_space<vmem>>, vector<8x16x3xf32>
    %2 = vector.extract_strided_slice %0 {offsets = [0, 0, 0], sizes = [8, 16, 1], strides = [1, 1, 1]} : vector<8x16x3xf32> to vector<8x16x1xf32>
    %3 = vector.shape_cast %2 : vector<8x16x1xf32> to vector<8x16xf32>
    %4 = vector.shape_cast %3 : vector<8x16xf32> to vector<8x16x1xf32>
    %5 = vector.extract_strided_slice %1 {offsets = [0, 0, 0], sizes = [8, 16, 1], strides = [1, 1, 1]} : vector<8x16x3xf32> to vector<8x16x1xf32>
    %6 = vector.shape_cast %5 : vector<8x16x1xf32> to vector<8x16xf32>
    %7 = vector.shape_cast %6 : vector<8x16xf32> to vector<8x1x16xf32>
    %8 = vector.broadcast %4 : vector<8x16x1xf32> to vector<8x16x16xf32>
    %9 = vector.broadcast %7 : vector<8x1x16xf32> to vector<8x16x16xf32>
    %10 = arith.subf %8, %9 : vector<8x16x16xf32>
    %11 = arith.mulf %10, %10 : vector<8x16x16xf32>
    %12 = vector.extract_strided_slice %0 {offsets = [0, 0, 1], sizes = [8, 16, 1], strides = [1, 1, 1]} : vector<8x16x3xf32> to vector<8x16x1xf32>
    %13 = vector.shape_cast %12 : vector<8x16x1xf32> to vector<8x16xf32>
    %14 = vector.shape_cast %13 : vector<8x16xf32> to vector<8x16x1xf32>
    %15 = vector.extract_strided_slice %1 {offsets = [0, 0, 1], sizes = [8, 16, 1], strides = [1, 1, 1]} : vector<8x16x3xf32> to vector<8x16x1xf32>
    %16 = vector.shape_cast %15 : vector<8x16x1xf32> to vector<8x16xf32>
    %17 = vector.shape_cast %16 : vector<8x16xf32> to vector<8x1x16xf32>
    %18 = vector.broadcast %14 : vector<8x16x1xf32> to vector<8x16x16xf32>
    %19 = vector.broadcast %17 : vector<8x1x16xf32> to vector<8x16x16xf32>
    %20 = arith.subf %18, %19 : vector<8x16x16xf32>
    %21 = arith.mulf %20, %20 : vector<8x16x16xf32>
    %22 = arith.addf %11, %21 : vector<8x16x16xf32>
    %23 = vector.extract_strided_slice %0 {offsets = [0, 0, 2], sizes = [8, 16, 1], strides = [1, 1, 1]} : vector<8x16x3xf32> to vector<8x16x1xf32>
    %24 = vector.shape_cast %23 : vector<8x16x1xf32> to vector<8x16xf32>
    %25 = vector.shape_cast %24 : vector<8x16xf32> to vector<8x16x1xf32>
    %26 = vector.extract_strided_slice %1 {offsets = [0, 0, 2], sizes = [8, 16, 1], strides = [1, 1, 1]} : vector<8x16x3xf32> to vector<8x16x1xf32>
    %27 = vector.shape_cast %26 : vector<8x16x1xf32> to vector<8x16xf32>
    %28 = vector.shape_cast %27 : vector<8x16xf32> to vector<8x1x16xf32>
    %29 = vector.broadcast %25 : vector<8x16x1xf32> to vector<8x16x16xf32>
    %30 = vector.broadcast %28 : vector<8x1x16xf32> to vector<8x16x16xf32>
    %31 = arith.subf %29, %30 : vector<8x16x16xf32>
    %32 = arith.mulf %31, %31 : vector<8x16x16xf32>
    %33 = arith.addf %22, %32 : vector<8x16x16xf32>
    %cst = arith.constant dense<0x7F800000> : vector<8x16xf32>
    %34 = vector.multi_reduction <minimumf>, %33, %cst [2] : vector<8x16x16xf32> to vector<8x16xf32>
    %c0_5 = arith.constant 0 : index
    %c0_6 = arith.constant 0 : index
    %35 = vector.load %arg3[%c0_5, %c0_6] : memref<8x16xf32, #tpu.memory_space<vmem>>, vector<8x16xf32>
    tpu.vector_store %arg3[%c0_5, %c0_6], %34 {strides = array<i32>} : memref<8x16xf32, #tpu.memory_space<vmem>>, vector<8x16xf32>,
    %cst_7 = arith.constant dense<0x7F800000> : vector<8x16xf32>
    %36 = vector.multi_reduction <minimumf>, %33, %cst_7 [1] : vector<8x16x16xf32> to vector<8x16xf32>
    %c0_8 = arith.constant 0 : index
    %c0_9 = arith.constant 0 : index
    %37 = vector.load %arg4[%c0_8, %c0_9] : memref<8x16xf32, #tpu.memory_space<vmem>>, vector<8x16xf32>
    tpu.vector_store %arg4[%c0_8, %c0_9], %36 {strides = array<i32>} : memref<8x16xf32, #tpu.memory_space<vmem>>, vector<8x16xf32>,
    return
  }
  func.func @transform_0(%arg0: i32) -> (i32, i32, i32) {
    %c0_i32 = arith.constant 0 : i32
    %c0_i32_0 = arith.constant 0 : i32
    %c0_i32_1 = arith.constant 0 : i32
    return %arg0, %c0_i32, %c0_i32_0 : i32, i32, i32
  }
  func.func @transform_1(%arg0: i32) -> (i32, i32, i32) {
    %c0_i32 = arith.constant 0 : i32
    %c0_i32_0 = arith.constant 0 : i32
    %c0_i32_1 = arith.constant 0 : i32
    return %arg0, %c0_i32, %c0_i32_0 : i32, i32, i32
  }
  func.func @transform_2(%arg0: i32) -> (i32, i32) {
    %c0_i32 = arith.constant 0 : i32
    %c0_i32_0 = arith.constant 0 : i32
    return %arg0, %c0_i32 : i32, i32
  }
  func.func @transform_3(%arg0: i32) -> (i32, i32) {
    %c0_i32 = arith.constant 0 : i32
    %c0_i32_0 = arith.constant 0 : i32
    return %arg0, %c0_i32 : i32, i32
  }
}

module attributes {stable_mosaic.version = 11 : i64} {
  func.func @_linear_kernel_fullk(%arg0: i32, %arg1: i32, %arg2: memref<16x64xbf16, #tpu.memory_space<vmem>>, %arg3: memref<64x48xbf16, #tpu.memory_space<vmem>>, %arg4: memref<1x48xf32, #tpu.memory_space<vmem>>, %arg5: memref<16x48xf32, #tpu.memory_space<vmem>>) attributes {dimension_semantics = [#tpu.dimension_semantics<parallel>, #tpu.dimension_semantics<parallel>], iteration_bounds = array<i64: 1, 1>, scalar_prefetch = 0 : i64, scratch_operands = 0 : i64, tpu.core_type = #tpu.core_type<tc>, window_params = [{transform_indices = @transform_0, window_bounds = array<i64: 16, 64>}, {transform_indices = @transform_1, window_bounds = array<i64: 64, 48>}, {transform_indices = @transform_2, window_bounds = array<i64: 1, 48>}, {transform_indices = @transform_3, window_bounds = array<i64: 16, 48>}]} {
    %c0 = arith.constant 0 : index
    %c0_0 = arith.constant 0 : index
    %0 = vector.load %arg2[%c0, %c0_0] : memref<16x64xbf16, #tpu.memory_space<vmem>>, vector<16x64xbf16>
    %c0_1 = arith.constant 0 : index
    %c0_2 = arith.constant 0 : index
    %1 = vector.load %arg3[%c0_1, %c0_2] : memref<64x48xbf16, #tpu.memory_space<vmem>>, vector<64x48xbf16>
    %cst = arith.constant dense<0.000000e+00> : vector<16x48xf32>
    %2 = tpu.matmul %0, %1, %cst {dimension_numbers = #tpu.dot_dimension_numbers<[1], [0], [0], [1], [0, 0, 1, 1], [], []>} : vector<16x64xbf16>, vector<64x48xbf16>, vector<16x48xf32> -> vector<16x48xf32>
    %c0_3 = arith.constant 0 : index
    %c0_4 = arith.constant 0 : index
    %3 = vector.load %arg4[%c0_3, %c0_4] : memref<1x48xf32, #tpu.memory_space<vmem>>, vector<1x48xf32>
    %4 = vector.broadcast %3 : vector<1x48xf32> to vector<16x48xf32>
    %5 = arith.addf %2, %4 : vector<16x48xf32>
    %c0_5 = arith.constant 0 : index
    %c0_6 = arith.constant 0 : index
    %6 = vector.load %arg5[%c0_5, %c0_6] : memref<16x48xf32, #tpu.memory_space<vmem>>, vector<16x48xf32>
    tpu.vector_store %arg5[%c0_5, %c0_6], %5 {strides = array<i32>} : memref<16x48xf32, #tpu.memory_space<vmem>>, vector<16x48xf32>,
    return
  }
  func.func @transform_0(%arg0: i32, %arg1: i32) -> (i32, i32) {
    %c0_i32 = arith.constant 0 : i32
    %c0_i32_0 = arith.constant 0 : i32
    return %arg0, %c0_i32 : i32, i32
  }
  func.func @transform_1(%arg0: i32, %arg1: i32) -> (i32, i32) {
    %c0_i32 = arith.constant 0 : i32
    %c0_i32_0 = arith.constant 0 : i32
    return %c0_i32, %arg1 : i32, i32
  }
  func.func @transform_2(%arg0: i32, %arg1: i32) -> (i32, i32) {
    %c0_i32 = arith.constant 0 : i32
    %c0_i32_0 = arith.constant 0 : i32
    return %c0_i32, %arg1 : i32, i32
  }
  func.func @transform_3(%arg0: i32, %arg1: i32) -> (i32, i32) {
    %c0_i32 = arith.constant 0 : i32
    return %arg0, %arg1 : i32, i32
  }
}

</mosaic_0001>

<bundles_post_ra>
// kernel: custom-call.10
= control target key start
LH: loop header
LB: loop body
LE: loop exit
PB: predicated region body
PF: predicated region fallthrough
CT: control target
= control target key end

     0   :  { %s6_s0 = inlined_call_operand.vmem [shape: f32[2,128], index: 0, kind: output, shape index: {}]  }

// kernel: neg.1
= control target key start
LH: loop header
LB: loop body
LE: loop exit
PB: predicated region body
PF: predicated region fallthrough
CT: control target
= control target key end

     0   :  { %s40_s0 = inlined_call_operand.vmem [shape: f32[2,8,128], index: 0, kind: input, shape index: {}]   ;;  %s41_s1 = inlined_call_operand.vmem [shape: f32[2,8,128], index: 1, kind: output, shape index: {}]  }
   0x1   :  { %v2_v0 = vld [vmem:[%s40_s0] sm:$0xff]  ;;  %v16_v1 = vld [vmem:[%s40_s0 + $0x8] sm:$0xff] }
   0x2   :  { %v5_v2 = vxor.u32 2147483648, %v2_v0  ;;  %v12_v3 = vxor.u32 2147483648, %v16_v1 }
   0x4   :  { %7 = vst [vmem:[%s41_s1] sm:$0xff] %v5_v2 }
   0x5   :  { %17 = vst [vmem:[%s41_s1 + $0x8] sm:$0xff] %v12_v3 }

// kernel: _lambda_.22
= control target key start
LH: loop header
LB: loop body
LE: loop exit
PB: predicated region body
PF: predicated region fallthrough
CT: control target
= control target key end

     0   :  { %s893_s18 = smov 0   ;;  %s1113_s0 = inlined_call_operand.vmem [shape: bf16[256,3], index: 0, kind: input, shape index: {}]   ;;  %s1114_s1 = inlined_call_operand.vmem [shape: bf16[3,128], index: 1, kind: input, shape index: {}]   ;;  %s1115_s2 = inlined_call_operand.vmem [shape: f32[1,128], index: 2, kind: input, shape index: {}]   ;;  %s1116_s3 = inlined_call_operand.vmem [shape: bf16[128,256], index: 3, kind: input, shape index: {}]   ;;  %s1117_s4 = inlined_call_operand.vmem [shape: f32[1,256], index: 4, kind: input, shape index: {}]   ;;  %s1118_s5 = inlined_call_operand.vmem [shape: bf16[256,256], index: 5, kind: output, shape index: {}]  }
   0x1 LB: > { %s687_s19 = sadd.s32 4294967295, %s860_s18   ;;  %p691_p0 = scmp.ge.s32.totalorder %s860_s18, 1  ;;  %s860_s18 = sphi %s893_s18, %s15_s18  }
   0x2   : > { %p188_p1 = scmp.lt.s32.totalorder %s860_s18, 3 }
   0x4   : > { %p189_p2 = pnand %p691_p0, %p188_p1 }
   0x5   : > { %s692_s22 = sshll.u32 (!%p189_p2), %s687_s19, 4 }
   0x6   : > { %192 = sbr.rel (%p189_p2) target bundleno = 448 (0x1c0), region = 40  ;;  %p218_p3 = scmp.lt.s32.totalorder (!%p189_p2), %s692_s22, 31 }
   0xb   : > { %v247_v0 = vld [vmem:[%s1114_s1] sm:$0x3]  ;;  %vm317_vm0 = vcmask 1040384   ;;  %vm318_vm1 = vcmask 1041408   ;;  %v862_v1 = vmov 65535   ;;  %s1120_s22 = smov (!%p218_p3, %s692_s22), 31 }
   0xc   : > { %v319_v2 = vsel %vm317_vm0, 4294967295, %v862_v1  ;;  %s693_s23 = sshll.u32 %s1120_s22, 2  ;;  %vm292_vm2 = vcmask 23552   ;;  %v795_v10 = vld [vmem:[%s1116_s3 + $0x70] sm:$0xf]  ;;  %s803_s28 = sshll.u32 %s1120_s22, 3 }
   0xd   : > { %v320_v3 = vsel %vm318_vm1, %v319_v2, 0  ;;  %s910_s26 = scalar_lea.vmem %s1113_s0, %s693_s23  ;;  %v827_v11 = vld [vmem:[%s1116_s3 + $0x74] sm:$0xf0]  ;;  %v826_v12 = vld [vmem:[%s1116_s3 + $0x74] sm:$0xf]  ;;  %s1062_s6 = scalar_lea.vmem %s1118_s5, %s803_s28 }
   0xe   : > { %v322_v4 = vand.u32 %v320_v3, %v247_v0  ;;  %v804_v5 = vld [vmem:[%s910_s26] sm:$0xff]  ;;  %v805_v6 = vld [vmem:[%s910_s26 + $0x8] sm:$0xff]  ;;  %v806_v7 = vld [vmem:[%s910_s26 + $0x10] sm:$0xff]  ;;  %v796_v13 = vor.u32 %v827_v11, %v795_v10 }
   0xf   : > { %v807_v8 = vld [vmem:[%s910_s26 + $0x18] sm:$0xff]  ;;  %v808_v9 = vld [vmem:[%s910_s26 + $0x20] sm:$0xff]  ;;  %v809_v16 = vld [vmem:[%s910_s26 + $0x28] sm:$0xff] }
  0x10   : > { %331 = vmatpush.bf16.msra.mxu0 %v322_v4  ;;  %v797_v14 = vld [vmem:[%s1116_s3 + $0x78] sm:$0xf0]  ;;  %499 = vmatpush.bf16.msra.mxu1 %v796_v13  ;;  %v787_v17 = vld [vmem:[%s1116_s3 + $0x60] sm:$0xf]  ;;  %v825_v18 = vld [vmem:[%s1116_s3 + $0x64] sm:$0xf0] }
  0x11   : > { %v934_v15 = vor.u32 %v826_v12, %v797_v14  ;;  %828 = vmatpush.bf16.msra.mxu3 %v796_v13  ;;  %v824_v19 = vld [vmem:[%s1116_s3 + $0x64] sm:$0xf]  ;;  %v788_v20 = vor.u32 %v825_v18, %v787_v17  ;;  %v789_v21 = vld [vmem:[%s1116_s3 + $0x68] sm:$0xf0]  ;;  %v779_v23 = vld [vmem:[%s1116_s3 + $0x50] sm:$0xf] }
  0x12   : > { %v792_v22 = vor.u32 %v824_v19, %v789_v21  ;;  %v823_v24 = vld [vmem:[%s1116_s3 + $0x54] sm:$0xf0]  ;;  %v822_v25 = vld [vmem:[%s1116_s3 + $0x54] sm:$0xf]  ;;  %v781_v27 = vld [vmem:[%s1116_s3 + $0x58] sm:$0xf0] }
  0x13   : > { %729 = vmatmul.msk.bf16.vlgmr.msra.gmra.mxu0 %vm292_vm2, %v804_v5  ;;  %548 = vmatpush.bf16.msra.mxu2 %v934_v15  ;;  %v780_v26 = vor.u32 %v823_v24, %v779_v23  ;;  %v784_v28 = vor.u32 %v822_v25, %v781_v27  ;;  %v771_v29 = vld [vmem:[%s1116_s3 + $0x40] sm:$0xf]  ;;  %v821_v30 = vld [vmem:[%s1116_s3 + $0x44] sm:$0xf0]  ;;  %v820_v31 = vld [vmem:[%s1116_s3 + $0x44] sm:$0xf] }
  0x14   : > { %500 = vmatpush.bf16.msra.mxu1 %v788_v20  ;;  %v773_v32 = vld [vmem:[%s1116_s3 + $0x48] sm:$0xf0]  ;;  %v772_v33 = vor.u32 %v821_v30, %v771_v29  ;;  %v763_v35 = vld [vmem:[%s1116_s3 + $0x30] sm:$0xf]  ;;  %v819_v36 = vld [vmem:[%s1116_s3 + $0x34] sm:$0xf0] }
  0x15   : > { %829 = vmatpush.bf16.msra.mxu3 %v788_v20  ;;  %v776_v34 = vor.u32 %v820_v31, %v773_v32  ;;  %v818_v37 = vld [vmem:[%s1116_s3 + $0x34] sm:$0xf]  ;;  %v764_v38 = vor.u32 %v819_v36, %v763_v35  ;;  %v765_v39 = vld [vmem:[%s1116_s3 + $0x38] sm:$0xf0]  ;;  %v755_v42 = vld [vmem:[%s1116_s3 + $0x20] sm:$0xf] }
  0x16   : > { %v810_v40 = vld [vmem:[%s910_s26 + $0x30] sm:$0xff]  ;;  %v768_v41 = vor.u32 %v818_v37, %v765_v39  ;;  %v817_v43 = vld [vmem:[%s1116_s3 + $0x24] sm:$0xf0]  ;;  %v816_v44 = vld [vmem:[%s1116_s3 + $0x24] sm:$0xf] }
  0x17   : > { %549 = vmatpush.bf16.msra.mxu2 %v792_v22  ;;  %v756_v45 = vor.u32 %v817_v43, %v755_v42  ;;  %v757_v46 = vld [vmem:[%s1116_s3 + $0x28] sm:$0xf0]  ;;  %v747_v48 = vld [vmem:[%s1116_s3 + $0x10] sm:$0xf]  ;;  %v815_v49 = vld [vmem:[%s1116_s3 + $0x14] sm:$0xf0] }
  0x18   : > { %501 = vmatpush.bf16.msra.mxu1 %v780_v26  ;;  %v760_v47 = vor.u32 %v816_v44, %v757_v46  ;;  %v814_v50 = vld [vmem:[%s1116_s3 + $0x14] sm:$0xf]  ;;  %v748_v51 = vor.u32 %v815_v49, %v747_v48  ;;  %v749_v52 = vld [vmem:[%s1116_s3 + $0x18] sm:$0xf0]  ;;  %v739_v54 = vld [vmem:[%s1116_s3] sm:$0xf] }
  0x19   : > { %830 = vmatpush.bf16.msra.mxu3 %v780_v26  ;;  %v752_v53 = vor.u32 %v814_v50, %v749_v52  ;;  %v813_v55 = vld [vmem:[%s1116_s3 + $0x4] sm:$0xf0]  ;;  %v812_v56 = vld [vmem:[%s1116_s3 + $0x4] sm:$0xf]  ;;  %v741_v58 = vld [vmem:[%s1116_s3 + $0x8] sm:$0xf0] }
  0x1a   : > { %v740_v57 = vor.u32 %v813_v55, %v739_v54  ;;  %v744_v59 = vor.u32 %v812_v56, %v741_v58  ;;  %v811_v60 = vld [vmem:[%s910_s26 + $0x38] sm:$0xff]  ;;  %v1031_v62 = vld [vmem:[%s1115_s2] ss:$0 sm:$0xff] }
  0x1b   : > { %550 = vmatpush.bf16.msra.mxu2 %v784_v28  ;;  %v413_v54 = vld [vmem:[%s1117_s4] sm:$0x3] }
  0x1c   : > { %502 = vmatpush.bf16.msra.mxu1 %v772_v33  ;;  %v1052_v56 = vperm.slane %v413_v54, 0 }
  0x1d   : > { %831 = vmatpush.bf16.msra.mxu3 %v772_v33 }
  0x1f   : > { %551 = vmatpush.bf16.msra.mxu2 %v776_v34 }
  0x20   : > { %503 = vmatpush.bf16.msra.mxu1 %v764_v38 }
  0x21   : > { %832 = vmatpush.bf16.msra.mxu3 %v764_v38 }
  0x23   : > { %730 = vmatmul.msk.bf16.gmra.mxu0 %vm292_vm2, %v805_v6  ;;  %552 = vmatpush.bf16.msra.mxu2 %v768_v41 }
  0x24   : > { %504 = vmatpush.bf16.msra.mxu1 %v756_v45 }
  0x25   : > { %833 = vmatpush.bf16.msra.mxu3 %v756_v45 }
  0x27   : > { %553 = vmatpush.bf16.msra.mxu2 %v760_v47 }
  0x28   : > { %505 = vmatpush.bf16.msra.mxu1 %v748_v51 }
  0x29   : > { %834 = vmatpush.bf16.msra.mxu3 %v748_v51 }
  0x2b   : > { %554 = vmatpush.bf16.msra.mxu2 %v752_v53 }
  0x2c   : > { %506 = vmatpush.bf16.msra.mxu1 %v740_v57 }
  0x2d   : > { %835 = vmatpush.bf16.msra.mxu3 %v740_v57  ;;  %v1054_v57 = vperm.slane %v413_v54, 1 }
  0x2f   : > { %555 = vmatpush.bf16.msra.mxu2 %v744_v59 }
  0x31   : > { %836 = vmatpush.bf16.msrb.mxu3 %v934_v15 }
  0x33   : > { %731 = vmatmul.msk.bf16.gmra.mxu0 %vm292_vm2, %v806_v7 }
  0x35   : > { %837 = vmatpush.bf16.msrb.mxu3 %v792_v22 }
  0x39   : > { %838 = vmatpush.bf16.msrb.mxu3 %v784_v28 }
  0x3d   : > { %839 = vmatpush.bf16.msrb.mxu3 %v776_v34 }
  0x41   : > { %840 = vmatpush.bf16.msrb.mxu3 %v768_v41 }
  0x43   : > { %732 = vmatmul.msk.bf16.gmra.mxu0 %vm292_vm2, %v807_v8 }
  0x45   : > { %841 = vmatpush.bf16.msrb.mxu3 %v760_v47 }
  0x49   : > { %842 = vmatpush.bf16.msrb.mxu3 %v752_v53 }
  0x4d   : > { %843 = vmatpush.bf16.msrb.mxu3 %v744_v59 }
  0x53   : > { %733 = vmatmul.msk.bf16.gmra.mxu0 %vm292_vm2, %v808_v9 }
  0x63   : > { %734 = vmatmul.msk.bf16.gmra.mxu0 %vm292_vm2, %v809_v16 }
  0x73   : > { %735 = vmatmul.msk.bf16.gmra.mxu0 %vm292_vm2, %v810_v40 }
  0x83   : > { %736 = vmatmul.msk.bf16.gmra.mxu0 %vm292_vm2, %v811_v60 }
  0x90   : > { %v333_v61 = vpop.f32.mrf.mxu0 }
  0x91   : > { %v334_v63 = vadd.f32 %v1031_v62, %v333_v61 }
  0x93   : > { %v373_v2 = vmax.f32 %v334_v63, 0.0 }
  0x98   : > { %v335_v0 = vpop.f32.mrf.mxu0 }
  0x99   : > { %v336_v1 = vadd.f32 %v1031_v62, %v335_v0 }
  0x9b   : > { %v374_v3 = vmax.f32 %v336_v1, 0.0 }
  0x9d   : > { %v389_v4 = vpack.c.bf16 %v374_v3, %v373_v2 }
  0x9f   : > { %507 = vmatmul.bf16.vlgmr.msra.gmra.mxu1 %v389_v4  ;;  %556 = vmatmul.bf16.vlgmr.msra.gmra.mxu2 %v389_v4 }
  0xa0   : > { %v338_v5 = vpop.f32.mrf.mxu0 }
  0xa1   : > { %v339_v6 = vadd.f32 %v1031_v62, %v338_v5 }
  0xa3   : > { %v375_v9 = vmax.f32 %v339_v6, 0.0 }
  0xa8   : > { %v340_v7 = vpop.f32.mrf.mxu0 }
  0xa9   : > { %v341_v8 = vadd.f32 %v1031_v62, %v340_v7 }
  0xab   : > { %v376_v10 = vmax.f32 %v341_v8, 0.0 }
  0xad   : > { %v390_v11 = vpack.c.bf16 %v376_v10, %v375_v9 }
  0xaf   : > { %512 = vmatmul.bf16.gmra.mxu1 %v390_v11  ;;  %561 = vmatmul.bf16.gmra.mxu2 %v390_v11 }
  0xb0   : > { %v343_v12 = vpop.f32.mrf.mxu0 }
  0xb1   : > { %v344_v13 = vadd.f32 %v1031_v62, %v343_v12 }
  0xb3   : > { %v377_v16 = vmax.f32 %v344_v13, 0.0 }
  0xb8   : > { %v345_v14 = vpop.f32.mrf.mxu0 }
  0xb9   : > { %v346_v15 = vadd.f32 %v1031_v62, %v345_v14 }
  0xbb   : > { %v378_v17 = vmax.f32 %v346_v15, 0.0 }
  0xbd   : > { %v391_v18 = vpack.c.bf16 %v378_v17, %v377_v16 }
  0xbf   : > { %517 = vmatmul.bf16.gmra.mxu1 %v391_v18  ;;  %566 = vmatmul.bf16.gmra.mxu2 %v391_v18 }
  0xc0   : > { %v348_v19 = vpop.f32.mrf.mxu0 }
  0xc1   : > { %v349_v20 = vadd.f32 %v1031_v62, %v348_v19 }
  0xc3   : > { %v379_v23 = vmax.f32 %v349_v20, 0.0 }
  0xc8   : > { %v350_v21 = vpop.f32.mrf.mxu0 }
  0xc9   : > { %v351_v22 = vadd.f32 %v1031_v62, %v350_v21 }
  0xcb   : > { %v380_v24 = vmax.f32 %v351_v22, 0.0 }
  0xcd   : > { %v392_v25 = vpack.c.bf16 %v380_v24, %v379_v23 }
  0xcf   : > { %522 = vmatmul.bf16.gmra.mxu1 %v392_v25  ;;  %571 = vmatmul.bf16.gmra.mxu2 %v392_v25 }
  0xd0   : > { %v353_v26 = vpop.f32.mrf.mxu0 }
  0xd1   : > { %v354_v27 = vadd.f32 %v1031_v62, %v353_v26 }
  0xd3   : > { %v381_v30 = vmax.f32 %v354_v27, 0.0 }
  0xd8   : > { %v355_v28 = vpop.f32.mrf.mxu0 }
  0xd9   : > { %v356_v29 = vadd.f32 %v1031_v62, %v355_v28 }
  0xdb   : > { %v382_v31 = vmax.f32 %v356_v29, 0.0 }
  0xdd   : > { %v393_v32 = vpack.c.bf16 %v382_v31, %v381_v30 }
  0xdf   : > { %527 = vmatmul.bf16.gmra.mxu1 %v393_v32  ;;  %576 = vmatmul.bf16.gmra.mxu2 %v393_v32 }
  0xe0   : > { %v358_v33 = vpop.f32.mrf.mxu0 }
  0xe1   : > { %v359_v34 = vadd.f32 %v1031_v62, %v358_v33 }
  0xe3   : > { %v383_v37 = vmax.f32 %v359_v34, 0.0 }
  0xe8   : > { %v360_v35 = vpop.f32.mrf.mxu0 }
  0xe9   : > { %v361_v36 = vadd.f32 %v1031_v62, %v360_v35 }
  0xeb   : > { %v384_v38 = vmax.f32 %v361_v36, 0.0 }
  0xed   : > { %v394_v39 = vpack.c.bf16 %v384_v38, %v383_v37 }
  0xef   : > { %532 = vmatmul.bf16.gmra.mxu1 %v394_v39  ;;  %581 = vmatmul.bf16.gmra.mxu2 %v394_v39 }
  0xf0   : > { %v363_v40 = vpop.f32.mrf.mxu0 }
  0xf1   : > { %v364_v41 = vadd.f32 %v1031_v62, %v363_v40 }
  0xf3   : > { %v385_v44 = vmax.f32 %v364_v41, 0.0 }
  0xf8   : > { %v365_v42 = vpop.f32.mrf.mxu0 }
  0xf9   : > { %v366_v43 = vadd.f32 %v1031_v62, %v365_v42 }
  0xfb   : > { %v386_v45 = vmax.f32 %v366_v43, 0.0 }
  0xfd   : > { %v395_v46 = vpack.c.bf16 %v386_v45, %v385_v44 }
  0xff   : > { %537 = vmatmul.bf16.vlgmr.msra.gmra.mxu3 %v395_v46 }
 0x100   : > { %v368_v47 = vpop.f32.mrf.mxu0 }
 0x101   : > { %v369_v48 = vadd.f32 %v1031_v62, %v368_v47 }
 0x103   : > { %v387_v51 = vmax.f32 %v369_v48, 0.0 }
 0x108   : > { %v370_v49 = vpop.f32.mrf.mxu0 }
 0x109   : > { %v371_v50 = vadd.f32 %v1031_v62, %v370_v49 }
 0x10b   : > { %v388_v52 = vmax.f32 %v371_v50, 0.0 }
 0x10d   : > { %v396_v53 = vpack.c.bf16 %v388_v52, %v387_v51 }
 0x10f   : > { %542 = vmatmul.bf16.gmra.mxu3 %v396_v53 }
 0x11c   : > { %v508_v55 = vpop.f32.mrf.mxu1 }
 0x11d   : > { %v509_v59 = vadd.f32 %v508_v55, %v1052_v56 }
 0x11f   : > { %586 = vmatmul.bf16.vlgmr.msrb.gmra.mxu3 %v395_v46 }
 0x122   : > { %v557_v58 = vpop.f32.mrf.mxu2 }
 0x123   : > { %v558_v60 = vadd.f32 %v557_v58, %v1054_v57 }
 0x124   : > { %v510_v61 = vpop.f32.mrf.mxu1 }
 0x125   : > { %v597_v62 = vpack.c.bf16 %v558_v60, %v509_v59  ;;  %v511_v0 = vadd.f32 %v510_v61, %v1052_v56 }
 0x127   : > { %613 = vst [vmem:[%s1062_s6] sm:$0xff] %v597_v62 }
 0x12a   : > { %v559_v63 = vpop.f32.mrf.mxu2 }
 0x12b   : > { %v560_v1 = vadd.f32 %v559_v63, %v1054_v57 }
 0x12c   : > { %v513_v2 = vpop.f32.mrf.mxu1 }
 0x12d   : > { %v598_v3 = vpack.c.bf16 %v560_v1, %v511_v0  ;;  %v514_v5 = vadd.f32 %v513_v2, %v1052_v56 }
 0x12f   : > { %614 = vst [vmem:[%s1062_s6 + $0x8] sm:$0xff] %v598_v3  ;;  %591 = vmatmul.bf16.gmra.mxu3 %v396_v53 }
 0x132   : > { %v562_v4 = vpop.f32.mrf.mxu2 }
 0x133   : > { %v563_v6 = vadd.f32 %v562_v4, %v1054_v57 }
 0x134   : > { %v515_v7 = vpop.f32.mrf.mxu1 }
 0x135   : > { %v599_v8 = vpack.c.bf16 %v563_v6, %v514_v5  ;;  %v516_v10 = vadd.f32 %v515_v7, %v1052_v56 }
 0x137   : > { %615 = vst [vmem:[%s1062_s6 + $0x10] sm:$0xff] %v599_v8 }
 0x13a   : > { %v564_v9 = vpop.f32.mrf.mxu2 }
 0x13b   : > { %v565_v11 = vadd.f32 %v564_v9, %v1054_v57 }
 0x13c   : > { %v518_v12 = vpop.f32.mrf.mxu1 }
 0x13d   : > { %v600_v13 = vpack.c.bf16 %v565_v11, %v516_v10  ;;  %v519_v15 = vadd.f32 %v518_v12, %v1052_v56 }
 0x13f   : > { %616 = vst [vmem:[%s1062_s6 + $0x18] sm:$0xff] %v600_v13 }
 0x142   : > { %v567_v14 = vpop.f32.mrf.mxu2 }
 0x143   : > { %v568_v16 = vadd.f32 %v567_v14, %v1054_v57 }
 0x144   : > { %v520_v17 = vpop.f32.mrf.mxu1 }
 0x145   : > { %v601_v18 = vpack.c.bf16 %v568_v16, %v519_v15  ;;  %v521_v20 = vadd.f32 %v520_v17, %v1052_v56 }
 0x147   : > { %617 = vst [vmem:[%s1062_s6 + $0x20] sm:$0xff] %v601_v18 }
 0x14a   : > { %v569_v19 = vpop.f32.mrf.mxu2 }
 0x14b   : > { %v570_v21 = vadd.f32 %v569_v19, %v1054_v57 }
 0x14c   : > { %v523_v22 = vpop.f32.mrf.mxu1 }
 0x14d   : > { %v602_v23 = vpack.c.bf16 %v570_v21, %v521_v20  ;;  %v524_v25 = vadd.f32 %v523_v22, %v1052_v56 }
 0x14f   : > { %618 = vst [vmem:[%s1062_s6 + $0x28] sm:$0xff] %v602_v23 }
 0x152   : > { %v572_v24 = vpop.f32.mrf.mxu2 }
 0x153   : > { %v573_v26 = vadd.f32 %v572_v24, %v1054_v57 }
 0x154   : > { %v525_v27 = vpop.f32.mrf.mxu1 }
 0x155   : > { %v603_v28 = vpack.c.bf16 %v573_v26, %v524_v25  ;;  %v526_v30 = vadd.f32 %v525_v27, %v1052_v56 }
 0x157   : > { %619 = vst [vmem:[%s1062_s6 + $0x30] sm:$0xff] %v603_v28 }
 0x15a   : > { %v574_v29 = vpop.f32.mrf.mxu2 }
 0x15b   : > { %v575_v31 = vadd.f32 %v574_v29, %v1054_v57 }
 0x15c   : > { %v528_v32 = vpop.f32.mrf.mxu1 }
 0x15d   : > { %v604_v33 = vpack.c.bf16 %v575_v31, %v526_v30  ;;  %v529_v35 = vadd.f32 %v528_v32, %v1052_v56 }
 0x15f   : > { %620 = vst [vmem:[%s1062_s6 + $0x38] sm:$0xff] %v604_v33 }
 0x162   : > { %v577_v34 = vpop.f32.mrf.mxu2 }
 0x163   : > { %v578_v36 = vadd.f32 %v577_v34, %v1054_v57 }
 0x164   : > { %v530_v37 = vpop.f32.mrf.mxu1 }
 0x165   : > { %v605_v38 = vpack.c.bf16 %v578_v36, %v529_v35  ;;  %v531_v40 = vadd.f32 %v530_v37, %v1052_v56 }
 0x167   : > { %621 = vst [vmem:[%s1062_s6 + $0x40] sm:$0xff] %v605_v38 }
 0x16a   : > { %v579_v39 = vpop.f32.mrf.mxu2 }
 0x16b   : > { %v580_v41 = vadd.f32 %v579_v39, %v1054_v57 }
 0x16c   : > { %v533_v43 = vpop.f32.mrf.mxu1 }
 0x16d   : > { %v606_v42 = vpack.c.bf16 %v580_v41, %v531_v40  ;;  %v534_v45 = vadd.f32 %v533_v43, %v1052_v56 }
 0x16f   : > { %622 = vst [vmem:[%s1062_s6 + $0x48] sm:$0xff] %v606_v42 }
 0x172   : > { %v582_v44 = vpop.f32.mrf.mxu2 }
 0x173   : > { %v583_v46 = vadd.f32 %v582_v44, %v1054_v57 }
 0x174   : > { %v535_v48 = vpop.f32.mrf.mxu1 }
 0x175   : > { %v607_v47 = vpack.c.bf16 %v583_v46, %v534_v45  ;;  %v536_v50 = vadd.f32 %v535_v48, %v1052_v56 }
 0x177   : > { %623 = vst [vmem:[%s1062_s6 + $0x50] sm:$0xff] %v607_v47 }
 0x17a   : > { %v584_v49 = vpop.f32.mrf.mxu2 }
 0x17b   : > { %v585_v51 = vadd.f32 %v584_v49, %v1054_v57 }
 0x17d   : > { %v608_v52 = vpack.c.bf16 %v585_v51, %v536_v50 }
 0x17f   : > { %624 = vst [vmem:[%s1062_s6 + $0x58] sm:$0xff] %v608_v52 }
 0x182   : > { %v538_v53 = vpop.f32.mrf.mxu3 }
 0x183   : > { %v539_v60 = vadd.f32 %v538_v53, %v1052_v56 }
 0x18a   : > { %v540_v54 = vpop.f32.mrf.mxu3 }
 0x18b   : > { %v541_v0 = vadd.f32 %v540_v54, %v1052_v56 }
 0x192   : > { %v543_v55 = vpop.f32.mrf.mxu3 }
 0x193   : > { %v544_v4 = vadd.f32 %v543_v55, %v1052_v56 }
 0x19a   : > { %v545_v58 = vpop.f32.mrf.mxu3 }
 0x19b   : > { %v546_v8 = vadd.f32 %v545_v58, %v1052_v56 }
 0x1a2   : > { %v587_v59 = vpop.f32.mrf.mxu3 }
 0x1a3   : > { %v588_v61 = vadd.f32 %v587_v59, %v1054_v57 }
 0x1a5   : > { %v609_v62 = vpack.c.bf16 %v588_v61, %v539_v60 }
 0x1a7   : > { %625 = vst [vmem:[%s1062_s6 + $0x60] sm:$0xff] %v609_v62 }
 0x1aa   : > { %v589_v63 = vpop.f32.mrf.mxu3 }
 0x1ab   : > { %v590_v1 = vadd.f32 %v589_v63, %v1054_v57 }
 0x1ad   : > { %v610_v2 = vpack.c.bf16 %v590_v1, %v541_v0 }
 0x1af   : > { %626 = vst [vmem:[%s1062_s6 + $0x68] sm:$0xff] %v610_v2 }
 0x1b2   : > { %v592_v3 = vpop.f32.mrf.mxu3 }
 0x1b3   : > { %v593_v5 = vadd.f32 %v592_v3, %v1054_v57 }
 0x1b5   : > { %v611_v6 = vpack.c.bf16 %v593_v5, %v544_v4 }
 0x1b7   : > { %627 = vst [vmem:[%s1062_s6 + $0x70] sm:$0xff] %v611_v6 }
 0x1ba   : > { %v594_v7 = vpop.f32.mrf.mxu3 }
 0x1bb   : > { %v595_v9 = vadd.f32 %v594_v7, %v1054_v57 }
 0x1bd   : > { %v612_v10 = vpack.c.bf16 %v595_v9, %v546_v8 }
 0x1bf   : > { %628 = vst [vmem:[%s1062_s6 + $0x78] sm:$0xff] %v612_v10 }
 0x1c0 PF: > { %s15_s18 = sadd.s32 1, %s860_s18  }
 0x1c1   : > { %p12_p4 = scmp.ge.s32.totalorder %s15_s18, 4  }
 0x1c3   :  { %14 = sbr.rel (!%p12_p4) target bundleno = 1 (0x1), region = 70 }

// kernel: _lambda_.24
= control target key start
LH: loop header
LB: loop body
LE: loop exit
PB: predicated region body
PF: predicated region fallthrough
CT: control target
= control target key end

     0   :  { %vm76_vm0 = vcmask 523264   ;;  %vm110_vm1 = vcmask 1043456   ;;  %vm111_vm2 = vcmask 523268   ;;  %s246_s1 = inlined_call_operand.vmem [shape: bf16[64,192], index: 1, kind: input, shape index: {}]   ;;  %s247_s0 = inlined_call_operand.vmem [shape: bf16[16,64], index: 0, kind: input, shape index: {}]   ;;  %s248_s2 = inlined_call_operand.vmem [shape: f32[1,192], index: 2, kind: input, shape index: {}]   ;;  %s249_s3 = inlined_call_operand.vmem [shape: bf16[16,192], index: 3, kind: output, shape index: {}]  }
   0x1   :  { %v149_v0 = vld [vmem:[%s246_s1 + $0x30] sm:$0xf]  ;;  %v165_v1 = vld [vmem:[%s246_s1 + $0x34] sm:$0xf0]  ;;  %v164_v2 = vld [vmem:[%s246_s1 + $0x34] sm:$0xf] }
   0x2   :  { %v150_v3 = vor.u32 %v165_v1, %v149_v0  ;;  %v151_v4 = vld [vmem:[%s246_s1 + $0x38] sm:$0xf0]  ;;  %v141_v5 = vld [vmem:[%s246_s1 + $0x20] sm:$0xf]  ;;  %v163_v6 = vld [vmem:[%s246_s1 + $0x24] sm:$0xf0] }
   0x3   :  { %v154_v7 = vor.u32 %v164_v2, %v151_v4  ;;  %v162_v8 = vld [vmem:[%s246_s1 + $0x24] sm:$0xf]  ;;  %v143_v9 = vld [vmem:[%s246_s1 + $0x28] sm:$0xf0]  ;;  %v142_v10 = vor.u32 %v163_v6, %v141_v5  ;;  %v133_v12 = vld [vmem:[%s246_s1 + $0x10] sm:$0xf] }
   0x4   :  { %84 = vmatpush.bf16.msra.mxu0 %v150_v3  ;;  %v146_v11 = vor.u32 %v162_v8, %v143_v9  ;;  %v161_v13 = vld [vmem:[%s246_s1 + $0x14] sm:$0xf0]  ;;  %v160_v14 = vld [vmem:[%s246_s1 + $0x14] sm:$0xf]  ;;  %v135_v15 = vld [vmem:[%s246_s1 + $0x18] sm:$0xf0] }
   0x5   :  { %98 = vmatpush.bf16.msra.mxu1 %v154_v7  ;;  %v134_v16 = vor.u32 %v161_v13, %v133_v12  ;;  %v138_v17 = vor.u32 %v160_v14, %v135_v15  ;;  %v125_v18 = vld [vmem:[%s246_s1] sm:$0xf]  ;;  %v159_v19 = vld [vmem:[%s246_s1 + $0x4] sm:$0xf0]  ;;  %v158_v20 = vld [vmem:[%s246_s1 + $0x4] sm:$0xf] }
   0x6   :  { %v127_v21 = vld [vmem:[%s246_s1 + $0x8] sm:$0xf0]  ;;  %v126_v22 = vor.u32 %v159_v19, %v125_v18  ;;  %v157_v24 = vld [vmem:[%s247_s0] sm:$0xff]  ;;  %vm112_vm3 = vmor %vm111_vm2, %vm110_vm1 }
   0x7   :  { %v130_v23 = vor.u32 %v158_v20, %v127_v21  ;;  %v25_v25 = vld [vmem:[%s248_s2] sm:$0x3] }
   0x8   :  { %85 = vmatpush.bf16.msra.mxu0 %v142_v10  ;;  %v27_v26 = vperm.slane %v25_v25, 0  ;;  %v28_v27 = vperm.slane %v25_v25, 1 }
   0x9   :  { %99 = vmatpush.bf16.msra.mxu1 %v146_v11 }
   0xc   :  { %86 = vmatpush.bf16.msra.mxu0 %v134_v16 }
   0xd   :  { %100 = vmatpush.bf16.msra.mxu1 %v138_v17 }
  0x10   :  { %87 = vmatpush.bf16.msra.mxu0 %v126_v22 }
  0x11   :  { %101 = vmatpush.bf16.msra.mxu1 %v130_v23 }
  0x13   :  { %155 = vmatmul.msk.bf16.vlgmr.msra.gmra.mxu0 %vm76_vm0, %v157_v24 }
  0x14   :  { %156 = vmatmul.msk.bf16.vlgmr.msra.gmra.mxu1 %vm76_vm0, %v157_v24 }
  0x90   :  { %v89_v28 = vpop.f32.mrf.mxu0 }
  0x91   :  { %v90_v29 = vadd.f32 %v89_v28, %v27_v26  ;;  %v103_v30 = vpop.f32.mrf.mxu1 }
  0x92   :  { %v104_v31 = vadd.f32 %v103_v30, %v28_v27 }
  0x94   :  { %v108_v32 = vpack.c.bf16 %v104_v31, %v90_v29 }
  0x96   :  { %113 = vst.msk [vmem:[%s249_s3] sm:$0xff] %vm112_vm3, %v108_v32 }
  0x98   :  { %v91_v33 = vpop.f32.mrf.mxu0 }
  0x99   :  { %v92_v34 = vadd.f32 %v91_v33, %v27_v26  ;;  %v105_v35 = vpop.f32.mrf.mxu1 }
  0x9a   :  { %v106_v36 = vadd.f32 %v105_v35, %v28_v27 }
  0x9c   :  { %v109_v37 = vpack.c.bf16 %v106_v36, %v92_v34 }
  0x9e   :  { %114 = vst.msk [vmem:[%s249_s3 + $0x8] sm:$0xff] %vm112_vm3, %v109_v37 }

// kernel: _lambda_.25
= control target key start
LH: loop header
LB: loop body
LE: loop exit
PB: predicated region body
PF: predicated region fallthrough
CT: control target
= control target key end

     0   :  { %s538_s9 = smov 0   ;;  %s596_s0 = inlined_call_operand.vmem [shape: bf16[2,8,192], index: 0, kind: input, shape index: {}]   ;;  %s597_s1 = inlined_call_operand.vmem [shape: f32[8,8], index: 1, kind: input, shape index: {}]   ;;  %s598_s2 = inlined_call_operand.vmem [shape: bf16[2,8,64], index: 2, kind: output, shape index: {}]  }
   0x1 LB: > { %s458_s10 = sadd.s32 4294967295, %s514_s9   ;;  %p462_p0 = scmp.ge.s32.totalorder %s514_s9, 1  ;;  %s514_s9 = sphi %s538_s9, %s12_s9  }
   0x2   : > { %p112_p1 = scmp.lt.s32.totalorder %s514_s9, 3 }
   0x4   : > { %p113_p2 = pnand %p462_p0, %p112_p1 }
   0x5   : > { %p133_p3 = scmp.lt.s32.totalorder (!%p113_p2), %s458_s10, 1  ;;  %s516_s15 = smov (!%p113_p2), 64  }
   0x6   : > { %116 = sbr.rel (%p113_p2) target bundleno = 907 (0x38b), region = 28  ;;  %s517_s16 = smov (!%p113_p2), 48  }
   0x7   : > { %s518_s17 = smov (!%p113_p2), 32   ;;  %s519_s18 = smov (!%p113_p2), 112  }
   0x8   : > { %s520_s19 = smov (!%p113_p2), 16   ;;  %s521_s20 = smov (!%p113_p2), 80  }
   0x9   : > { %s522_s21 = smov (!%p113_p2), 96  }
   0xb   : > { %s600_s10 = smov (!%p133_p3, %s458_s10), 1  ;;  %vm150_vm0 = vcmask 130048   ;;  %vm188_vm1 = vcmask 1043456   ;;  %v144_v17 = vld [vmem:[%s597_s1] sm:$0xff]  ;;  %vm172_vm2 = vcmask 64512   ;;  %vm208_vm3 = vcmask 125952  }
   0xc   : > { %s476_s11 = sshll.u32 %s600_s10, 3  ;;  %s465_s24 = sshll.u32 %s600_s10, 2  ;;  %vm273_vm4 = vcmask 257152   ;;  %vm338_vm5 = vcmask 388352   ;;  %vm403_vm6 = vcmask 519552  }
   0xd   : > { %s137_s14 = scalar_lea.vmem %s596_s0, %s476_s11  ;;  %s141_s27 = scalar_lea.vmem %s598_s2, %s465_s24 }
   0xe   : > { %v143_v0 = vld [vmem:[%s137_s14] sm:$0xff] }
   0xf   : > { %v146_v1 = vunpack.c.l.b16 %v143_v0  ;;  %v183_v12 = vunpack.c.h.b16 %v143_v0 }
  0x11   : > { %v147_v2 = vpack.c.b16 %v146_v1, %v146_v1  ;;  %v184_v13 = vpack.c.b16 %v183_v12, %v183_v12 }
  0x13   : > { %148 = vrot.lane.b32.xlu0 %v147_v2, %s516_s15  ;;  %212 = vrot.lane.b32.xlu1 %v147_v2, %s517_s16  ;;  %v190_v15 = vsel %vm188_vm1, %v184_v13, 0 }
  0x14   : > { %277 = vrot.lane.b32.xlu2 %v147_v2, %s518_s17  ;;  %199 = vmatpush.bf16.msra.mxu1 %v190_v15 }
  0x1b   : > { %210 = vrot.lane.b32.xlu1 %v147_v2, %s519_s18 }
  0x1c   : > { %342 = vrot.lane.b32.xlu2 %v147_v2, %s520_s19 }
  0x23   : > { %275 = vrot.lane.b32.xlu1 %v147_v2, %s522_s21 }
  0x24   : > { %340 = vrot.lane.b32.xlu2 %v147_v2, %s521_s20 }
  0x2c   : > { %245 = vrot.lane.b32.xlu2 %v184_v13, %s519_s18 }
  0x6e   : > { %v278_v3 = vpop.permute.xlu2 %277 }
  0x6f   : > { %v283_v14 = vsel %vm150_vm0, %v278_v3, 0 }
  0x70   : > { %292 = vmatpush.bf16.xpose.msrb.mxu1 %v283_v14 }
  0x76   : > { %v343_v4 = vpop.permute.xlu2 %342 }
  0x77   : > { %v348_v7 = vsel %vm150_vm0, %v343_v4, 0 }
  0x7e   : > { %v341_v11 = vpop.permute.xlu2 %340 }
  0x85   : > { %v149_v5 = vpop.permute.xlu0 %148  ;;  %v213_v6 = vpop.permute.xlu1 %212 }
  0x86   : > { %v155_v8 = vsel %vm150_vm0, %v149_v5, 0  ;;  %v218_v9 = vsel %vm150_vm0, %v213_v6, 0  ;;  %v246_v33 = vpop.permute.xlu2 %245 }
  0x87   : > { %164 = vmatpush.bf16.xpose.msra.mxu0 %v155_v8  ;;  %227 = vmatpush.bf16.xpose.msra.mxu2 %v218_v9  ;;  %v251_v34 = vsel %vm188_vm1, %v246_v33, 0 }
  0x88   : > { %260 = vmatpush.bf16.msra.mxu3 %v251_v34 }
  0x8d   : > { %v211_v10 = vpop.permute.xlu1 %210 }
  0x8e   : > { %466 = vmatmul.msk.bf16.vlgmr.msra.gmra.mxu0 %vm150_vm0, %v143_v0  ;;  %468 = vmatmul.msk.bf16.vlgmr.msra.gmra.mxu2 %vm150_vm0, %v211_v10 }
  0x8f   : > { %357 = vmatpush.bf16.xpose.msrb.mxu0 %v348_v7 }
  0x95   : > { %v276_v32 = vpop.permute.xlu1 %275 }
  0x9e   : > { %472 = vmatmul.msk.bf16.vlgmr.msrb.gmra.mxu0 %vm150_vm0, %v341_v11 }
 0x10b   : > { %v166_v16 = vpop.f32.mrf.mxu0 }
 0x10c   : > { %v170_v18 = vmul.f32 0.25, %v166_v16 }
 0x10e   : > { %v171_v19 = vadd.f32 %v170_v18, %v144_v17 }
 0x110   : > { %v173_v20 = vsel %vm172_vm2, %v171_v19, -inf }
 0x111   : > { %174 = vmax.xlane.f32.xlu0 %v173_v20  ;;  %v229_v21 = vpop.f32.mrf.mxu2 }
 0x112   : > { %v233_v22 = vmul.f32 0.25, %v229_v21 }
 0x113   : > { %v168_v23 = vpop.f32.mrf.mxu0 }
 0x114   : > { %v234_v24 = vadd.f32 %v233_v22, %v144_v17 }
 0x116   : > { %v235_v25 = vsel %vm172_vm2, %v234_v24, -inf }
 0x117   : > { %236 = vmax.xlane.f32.xlu1 %v235_v25 }
 0x119   : > { %v231_v26 = vpop.f32.mrf.mxu2 }
 0x11b   : > { %v359_v27 = vpop.f32.mrf.mxu0 }
 0x11c   : > { %v363_v28 = vmul.f32 0.25, %v359_v27 }
 0x11e   : > { %v364_v29 = vadd.f32 %v363_v28, %v144_v17 }
 0x120   : > { %v365_v30 = vsel %vm172_vm2, %v364_v29, -inf }
 0x121   : > { %366 = vmax.xlane.f32.xlu0 %v365_v30 }
 0x123   : > { %v361_v31 = vpop.f32.mrf.mxu0 }
 0x130   : > { %375 = vrot.lane.b32.xlu1 %v184_v13, %s521_s20 }
 0x135   : > { %310 = vrot.lane.b32.xlu0 %v184_v13, %s522_s21 }
 0x184   : > { %v175_v35 = vpop.xlane.xlu0 %174 }
 0x185   : > { %v176_v36 = vsub.f32 %v171_v19, %v175_v35 }
 0x187   : > { %v177_v37 = vmul.f32 1.442695, %v176_v36 }
 0x189   : > { %492 = vpow2.f32 %v177_v37 }
 0x18a   : > { %v237_v38 = vpop.xlane.xlu1 %236 }
 0x18b   : > { %v238_v39 = vsub.f32 %v234_v24, %v237_v38 }
 0x18d   : > { %v239_v40 = vmul.f32 1.442695, %v238_v39 }
 0x18f   : > { %v493_v41 = vpop.eup %492  ;;  %494 = vpow2.f32 %v239_v40 }
 0x190   : > { %v182_v42 = vpack.c.bf16 %v493_v41, %v493_v41  ;;  %v179_v63 = vsel %vm172_vm2, %v493_v41, 0.0 }
 0x192   : > { %467 = vmatmul.msk.bf16.vlgmr.msra.gmra.mxu1 %vm172_vm2, %v182_v42 }
 0x194   : > { %v367_v45 = vpop.xlane.xlu0 %366 }
 0x195   : > { %v495_v43 = vpop.eup %494  ;;  %v368_v46 = vsub.f32 %v364_v29, %v367_v45 }
 0x196   : > { %v244_v44 = vpack.c.bf16 %v495_v43, %v495_v43  ;;  %v241_v61 = vsel %vm172_vm2, %v495_v43, 0.0 }
 0x197   : > { %v369_v47 = vmul.f32 1.442695, %v368_v46 }
 0x198   : > { %469 = vmatmul.msk.bf16.vlgmr.msra.gmra.mxu3 %vm172_vm2, %v244_v44 }
 0x199   : > { %496 = vpow2.f32 %v369_v47 }
 0x19f   : > { %v497_v49 = vpop.eup %496 }
 0x1a0   : > { %v374_v51 = vpack.c.bf16 %v497_v49, %v497_v49  ;;  %v371_v62 = vsel %vm172_vm2, %v497_v49, 0.0 }
 0x1a2   : > { %470 = vmatmul.msk.bf16.vlgmr.msrb.gmra.mxu1 %vm150_vm0, %v276_v32  ;;  %v376_v48 = vpop.permute.xlu1 %375 }
 0x1a3   : > { %v381_v50 = vsel %vm188_vm1, %v376_v48, 0 }
 0x1a4   : > { %390 = vmatpush.bf16.msrb.mxu2 %v381_v50 }
 0x1a7   : > { %473 = vmatmul.msk.bf16.vlgmr.msrb.gmra.mxu2 %vm172_vm2, %v374_v51  ;;  %v311_v0 = vpop.permute.xlu0 %310 }
 0x1a8   : > { %v316_v1 = vsel %vm188_vm1, %v311_v0, 0 }
 0x1a9   : > { %325 = vmatpush.bf16.msrb.mxu3 %v316_v1 }
 0x20f   : > { %v201_v52 = vpop.f32.mrf.mxu1 }
 0x217   : > { %v203_v53 = vpop.f32.mrf.mxu1 }
 0x21b   : > { %v262_v54 = vpop.f32.mrf.mxu3 }
 0x21f   : > { %v294_v55 = vpop.f32.mrf.mxu1 }
 0x220   : > { %v298_v56 = vmul.f32 0.25, %v294_v55 }
 0x222   : > { %v299_v57 = vadd.f32 %v298_v56, %v144_v17 }
 0x223   : > { %v264_v59 = vpop.f32.mrf.mxu3 }
 0x224   : > { %v300_v58 = vsel %vm172_vm2, %v299_v57, -inf }
 0x225   : > { %301 = vmax.xlane.f32.xlu2 %v300_v58 }
 0x227   : > { %v296_v60 = vpop.f32.mrf.mxu1 }
 0x22a   : > { %v392_v2 = vpop.f32.mrf.mxu2 }
 0x22d   : > { %242 = vadd.xlane.f32.xlu2 %v241_v61 }
 0x232   : > { %v394_v3 = vpop.f32.mrf.mxu2 }
 0x235   : > { %372 = vadd.xlane.f32.xlu2 %v371_v62 }
 0x23d   : > { %180 = vadd.xlane.f32.xlu2 %v179_v63 }
 0x298   : > { %v302_v4 = vpop.xlane.xlu2 %301 }
 0x299   : > { %v303_v5 = vsub.f32 %v299_v57, %v302_v4 }
 0x29b   : > { %v304_v6 = vmul.f32 1.442695, %v303_v5 }
 0x29d   : > { %498 = vpow2.f32 %v304_v6 }
 0x2a0   : > { %v243_v7 = vpop.xlane.xlu2 %242 }
 0x2a1   : > { %500 = vrcp.f32 %v243_v7 }
 0x2a3   : > { %v499_v8 = vpop.eup %498 }
 0x2a4   : > { %v306_v9 = vsel %vm172_vm2, %v499_v8, 0.0  ;;  %v309_v10 = vpack.c.bf16 %v499_v8, %v499_v8 }
 0x2a5   : > { %307 = vadd.xlane.f32.xlu0 %v306_v9 }
 0x2a6   : > { %471 = vmatmul.msk.bf16.vlgmr.msrb.gmra.mxu3 %vm172_vm2, %v309_v10 }
 0x2a7   : > { %v501_v11 = vpop.eup %500 }
 0x2a8   : > { %v373_v12 = vpop.xlane.xlu2 %372  ;;  %v267_v13 = vmul.f32 %v501_v11, %v262_v54 }
 0x2a9   : > { %502 = vrcp.f32 %v373_v12 }
 0x2aa   : > { %v268_v14 = vpack.c.bf16 %v267_v13, %v267_v13 }
 0x2ac   : > { %270 = vrot.lane.b32.xlu1 %v268_v14, %s520_s19 }
 0x2af   : > { %v503_v15 = vpop.eup %502 }
 0x2b0   : > { %v181_v16 = vpop.xlane.xlu2 %180  ;;  %v397_v17 = vmul.f32 %v503_v15, %v392_v2 }
 0x2b1   : > { %504 = vrcp.f32 %v181_v16 }
 0x2b2   : > { %v398_v18 = vpack.c.bf16 %v397_v17, %v397_v17 }
 0x2b4   : > { %400 = vrot.lane.b32.xlu1 %v398_v18, %s517_s16 }
 0x2b7   : > { %v505_v19 = vpop.eup %504 }
 0x2b8   : > { %v206_v20 = vmul.f32 %v505_v19, %v201_v52 }
 0x2ba   : > { %v207_v21 = vpack.c.bf16 %v206_v20, %v206_v20 }
 0x2bc   : > { %209 = vst.msk [vmem:[%s141_s27] sm:$0xf] %vm208_vm3, %v207_v21 }
 0x318   : > { %v308_v23 = vpop.xlane.xlu0 %307 }
 0x319   : > { %506 = vrcp.f32 %v308_v23 }
 0x31e   : > { %v271_v22 = vpop.permute.xlu1 %270 }
 0x31f   : > { %274 = vst.msk [vmem:[%s141_s27] sm:$0xf] %vm273_vm4, %v271_v22  ;;  %v507_v24 = vpop.eup %506 }
 0x326   : > { %v401_v30 = vpop.permute.xlu1 %400 }
 0x329   : > { %v327_v25 = vpop.f32.mrf.mxu3 }
 0x32a   : > { %v332_v26 = vmul.f32 %v507_v24, %v327_v25 }
 0x32c   : > { %v333_v27 = vpack.c.bf16 %v332_v26, %v332_v26 }
 0x32e   : > { %335 = vrot.lane.b32.xlu2 %v333_v27, %s518_s17 }
 0x331   : > { %v329_v28 = vpop.f32.mrf.mxu3 }
 0x388   : > { %v336_v29 = vpop.permute.xlu2 %335 }
 0x389   : > { %339 = vst.msk [vmem:[%s141_s27] sm:$0xf] %vm338_vm5, %v336_v29 }
 0x38a   : > { %404 = vst.msk [vmem:[%s141_s27] sm:$0xf] %vm403_vm6, %v401_v30 }
 0x38b PF: > { %s12_s9 = sadd.s32 1, %s514_s9  }
 0x38c   : > { %p9_p4 = scmp.ge.s32.totalorder %s12_s9, 4  }
 0x38e   :  { %11 = sbr.rel (!%p9_p4) target bundleno = 1 (0x1), region = 58 }

// kernel: _lambda_.23
= control target key start
LH: loop header
LB: loop body
LE: loop exit
PB: predicated region body
PF: predicated region fallthrough
CT: control target
= control target key end

     0   :  { %s3631_s18 = smov 0   ;;  %s4989_s0 = inlined_call_operand.vmem [shape: bf16[256,512], index: 0, kind: input, shape index: {}]   ;;  %s4990_s1 = inlined_call_operand.vmem [shape: bf16[512,512], index: 1, kind: input, shape index: {}]   ;;  %s4991_s2 = inlined_call_operand.vmem [shape: f32[1,512], index: 2, kind: input, shape index: {}]   ;;  %s4992_s3 = inlined_call_operand.vmem [shape: bf16[512,64], index: 3, kind: input, shape index: {}]   ;;  %s4993_s4 = inlined_call_operand.vmem [shape: f32[1,64], index: 4, kind: input, shape index: {}]   ;;  %s4994_s5 = inlined_call_operand.vmem [shape: f32[256,64], index: 5, kind: output, shape index: {}]  }
   0x1 LB: > { %s2610_s19 = sadd.s32 4294967295, %s3599_s18   ;;  %p2614_p0 = scmp.ge.s32.totalorder %s3599_s18, 1  ;;  %s3599_s18 = sphi %s3631_s18, %s15_s18  }
   0x2   : > { %p189_p1 = scmp.lt.s32.totalorder %s3599_s18, 3 }
   0x4   : > { %p190_p2 = pnand %p2614_p0, %p189_p1 }
   0x6   : > { %193 = sbr.rel (%p190_p2) target bundleno = 834 (0x342), region = 40 }
   0xb   : > { %v2862_v0 = vld [vmem:[%s4990_s1 + $0xe0] sm:$0xf]  ;;  %v3453_v1 = vld [vmem:[%s4990_s1 + $0xec] sm:$0xf0]  ;;  %s2615_s11 = sshll.u32 %s2610_s19, 4  ;;  %vm2537_vm0 = vcmask 523264  }
   0xc   : > { %v2990_v2 = vld [vmem:[%s4990_s1 + $0x1e0] sm:$0xf]  ;;  %v2863_v3 = vor.u32 %v3453_v1, %v2862_v0  ;;  %v3485_v4 = vld [vmem:[%s4990_s1 + $0x1ec] sm:$0xf0]  ;;  %p219_p3 = scmp.lt.s32.totalorder %s2615_s11, 31 }
   0xd   : > { %v3118_v5 = vld [vmem:[%s4990_s1 + $0x2e0] sm:$0xf]  ;;  %v3517_v6 = vld [vmem:[%s4990_s1 + $0x2ec] sm:$0xf0]  ;;  %v2991_v7 = vor.u32 %v3485_v4, %v2990_v2 }
   0xe   : > { %v3119_v8 = vor.u32 %v3517_v6, %v3118_v5  ;;  %v3246_v9 = vld [vmem:[%s4990_s1 + $0x3e0] sm:$0xf]  ;;  %v3549_v10 = vld [vmem:[%s4990_s1 + $0x3ec] sm:$0xf0]  ;;  %1201 = vmatpush.bf16.msra.mxu0 %v2863_v3  ;;  %s5000_s11 = smov (!%p219_p3, %s2615_s11), 31 }
   0xf   : > { %v2846_v11 = vld [vmem:[%s4990_s1 + $0xc0] sm:$0xf]  ;;  %v3247_v12 = vor.u32 %v3549_v10, %v3246_v9  ;;  %v3449_v13 = vld [vmem:[%s4990_s1 + $0xcc] sm:$0xf0]  ;;  %1250 = vmatpush.bf16.msra.mxu1 %v2991_v7  ;;  %s3390_s8 = sshll.u32 %s5000_s11, 4  ;;  %s2619_s12 = sshll.u32 %s5000_s11, 3 }
  0x10   : > { %v2974_v14 = vld [vmem:[%s4990_s1 + $0x1c0] sm:$0xf]  ;;  %v3481_v15 = vld [vmem:[%s4990_s1 + $0x1cc] sm:$0xf0]  ;;  %1299 = vmatpush.bf16.msra.mxu2 %v3119_v8  ;;  %v2847_v16 = vor.u32 %v3449_v13, %v2846_v11  ;;  %s3845_s16 = scalar_lea.vmem %s4989_s0, %s3390_s8  ;;  %s4937_s15 = scalar_lea.vmem %s4994_s5, %s2619_s12 }
  0x11   : > { %v2975_v17 = vor.u32 %v3481_v15, %v2974_v14  ;;  %v3102_v18 = vld [vmem:[%s4990_s1 + $0x2c0] sm:$0xf]  ;;  %v3513_v19 = vld [vmem:[%s4990_s1 + $0x2cc] sm:$0xf0]  ;;  %1348 = vmatpush.bf16.msra.mxu3 %v3247_v12 }
  0x12   : > { %v3230_v20 = vld [vmem:[%s4990_s1 + $0x3c0] sm:$0xf]  ;;  %v3103_v21 = vor.u32 %v3513_v19, %v3102_v18  ;;  %v3545_v22 = vld [vmem:[%s4990_s1 + $0x3cc] sm:$0xf0]  ;;  %1202 = vmatpush.bf16.msra.mxu0 %v2847_v16 }
  0x13   : > { %v2830_v23 = vld [vmem:[%s4990_s1 + $0xa0] sm:$0xf]  ;;  %v3445_v24 = vld [vmem:[%s4990_s1 + $0xac] sm:$0xf0]  ;;  %v3231_v25 = vor.u32 %v3545_v22, %v3230_v20  ;;  %1251 = vmatpush.bf16.msra.mxu1 %v2975_v17 }
  0x14   : > { %v2958_v26 = vld [vmem:[%s4990_s1 + $0x1a0] sm:$0xf]  ;;  %v3477_v27 = vld [vmem:[%s4990_s1 + $0x1ac] sm:$0xf0]  ;;  %v2831_v29 = vor.u32 %v3445_v24, %v2830_v23  ;;  %1300 = vmatpush.bf16.msra.mxu2 %v3103_v21 }
  0x15   : > { %v3086_v28 = vld [vmem:[%s4990_s1 + $0x2a0] sm:$0xf]  ;;  %v3509_v30 = vld [vmem:[%s4990_s1 + $0x2ac] sm:$0xf0]  ;;  %v2959_v33 = vor.u32 %v3477_v27, %v2958_v26  ;;  %1349 = vmatpush.bf16.msra.mxu3 %v3231_v25 }
  0x16   : > { %v3214_v31 = vld [vmem:[%s4990_s1 + $0x3a0] sm:$0xf]  ;;  %v3541_v32 = vld [vmem:[%s4990_s1 + $0x3ac] sm:$0xf0]  ;;  %v3087_v34 = vor.u32 %v3509_v30, %v3086_v28  ;;  %1203 = vmatpush.bf16.msra.mxu0 %v2831_v29  ;;  %v3515_v28 = vld [vmem:[%s4990_s1 + $0x2e4] sm:$0xf] }
  0x17   : > { %v2814_v35 = vld [vmem:[%s4990_s1 + $0x80] sm:$0xf]  ;;  %v3441_v36 = vld [vmem:[%s4990_s1 + $0x8c] sm:$0xf0]  ;;  %v3215_v38 = vor.u32 %v3541_v32, %v3214_v31  ;;  %1252 = vmatpush.bf16.msra.mxu1 %v2959_v33  ;;  %v3120_v29 = vld [vmem:[%s4990_s1 + $0x2f0] sm:$0xf0] }
  0x18   : > { %v2942_v37 = vld [vmem:[%s4990_s1 + $0x180] sm:$0xf]  ;;  %v3473_v39 = vld [vmem:[%s4990_s1 + $0x18c] sm:$0xf0]  ;;  %v2815_v44 = vor.u32 %v3441_v36, %v2814_v35  ;;  %1301 = vmatpush.bf16.msra.mxu2 %v3087_v34  ;;  %v3451_v31 = vld [vmem:[%s4990_s1 + $0xe4] sm:$0xf] }
  0x19   : > { %v3070_v40 = vld [vmem:[%s4990_s1 + $0x280] sm:$0xf]  ;;  %v3505_v41 = vld [vmem:[%s4990_s1 + $0x28c] sm:$0xf0]  ;;  %v2943_v45 = vor.u32 %v3473_v39, %v2942_v37  ;;  %1350 = vmatpush.bf16.msra.mxu3 %v3215_v38  ;;  %v2864_v32 = vld [vmem:[%s4990_s1 + $0xf0] sm:$0xf0] }
  0x1a   : > { %v3198_v42 = vld [vmem:[%s4990_s1 + $0x380] sm:$0xf]  ;;  %v3537_v43 = vld [vmem:[%s4990_s1 + $0x38c] sm:$0xf0]  ;;  %v3071_v46 = vor.u32 %v3505_v41, %v3070_v40  ;;  %1204 = vmatpush.bf16.msra.mxu0 %v2815_v44  ;;  %v3547_v33 = vld [vmem:[%s4990_s1 + $0x3e4] sm:$0xf] }
  0x1b   : > { %v2798_v47 = vld [vmem:[%s4990_s1 + $0x60] sm:$0xf]  ;;  %v3437_v48 = vld [vmem:[%s4990_s1 + $0x6c] sm:$0xf0]  ;;  %v3199_v50 = vor.u32 %v3537_v43, %v3198_v42  ;;  %1253 = vmatpush.bf16.msra.mxu1 %v2943_v45  ;;  %v3248_v34 = vld [vmem:[%s4990_s1 + $0x3f0] sm:$0xf0] }
  0x1c   : > { %v2926_v49 = vld [vmem:[%s4990_s1 + $0x160] sm:$0xf]  ;;  %v3469_v51 = vld [vmem:[%s4990_s1 + $0x16c] sm:$0xf0]  ;;  %v2799_v56 = vor.u32 %v3437_v48, %v2798_v47  ;;  %1302 = vmatpush.bf16.msra.mxu2 %v3071_v46  ;;  %v3391_v39 = vld [vmem:[%s3845_s16 + $0x4] sm:$0xf]  ;;  %v3123_v47 = vor.u32 %v3515_v28, %v3120_v29 }
  0x1d   : > { %v3054_v52 = vld [vmem:[%s4990_s1 + $0x260] sm:$0xf]  ;;  %v3501_v53 = vld [vmem:[%s4990_s1 + $0x26c] sm:$0xf0]  ;;  %v2927_v57 = vor.u32 %v3469_v51, %v2926_v49  ;;  %1351 = vmatpush.bf16.msra.mxu3 %v3199_v50  ;;  %v3483_v40 = vld [vmem:[%s4990_s1 + $0x1e4] sm:$0xf]  ;;  %v3251_v51 = vor.u32 %v3547_v33, %v3248_v34 }
  0x1e   : > { %v3182_v54 = vld [vmem:[%s4990_s1 + $0x360] sm:$0xf]  ;;  %v3533_v55 = vld [vmem:[%s4990_s1 + $0x36c] sm:$0xf0]  ;;  %v3055_v58 = vor.u32 %v3501_v53, %v3054_v52  ;;  %1205 = vmatpush.bf16.msra.mxu0 %v2799_v56  ;;  %v2992_v41 = vld [vmem:[%s4990_s1 + $0x1f0] sm:$0xf0] }
  0x1f   : > { %v2782_v59 = vld [vmem:[%s4990_s1 + $0x40] sm:$0xf]  ;;  %v3433_v60 = vld [vmem:[%s4990_s1 + $0x4c] sm:$0xf0]  ;;  %v3183_v62 = vor.u32 %v3533_v55, %v3182_v54  ;;  %1254 = vmatpush.bf16.msra.mxu1 %v2927_v57  ;;  %v3511_v42 = vld [vmem:[%s4990_s1 + $0x2c4] sm:$0xf] }
  0x20   : > { %v2910_v61 = vld [vmem:[%s4990_s1 + $0x140] sm:$0xf]  ;;  %v3465_v63 = vld [vmem:[%s4990_s1 + $0x14c] sm:$0xf0]  ;;  %v2783_v4 = vor.u32 %v3433_v60, %v2782_v59  ;;  %1303 = vmatpush.bf16.msra.mxu2 %v3055_v58  ;;  %v2624_v44 = vld [vmem:[%s3845_s16 + $0x10] sm:$0xf0]  ;;  %v2867_v58 = vor.u32 %v3451_v31, %v2864_v32  ;;  %v2995_v59 = vor.u32 %v3483_v40, %v2992_v41 }
  0x21   : > { %v3038_v0 = vld [vmem:[%s4990_s1 + $0x240] sm:$0xf]  ;;  %v3497_v1 = vld [vmem:[%s4990_s1 + $0x24c] sm:$0xf0]  ;;  %v2911_v6 = vor.u32 %v3465_v63, %v2910_v61  ;;  %1352 = vmatpush.bf16.msra.mxu3 %v3183_v62  ;;  %v2630_v45 = vld [vmem:[%s3845_s16 + $0x8] sm:$0xf]  ;;  %v3881_v53 = vor.u32 %v3391_v39, %v2624_v44 }
  0x22   : > { %v3166_v2 = vld [vmem:[%s4990_s1 + $0x340] sm:$0xf]  ;;  %v3529_v3 = vld [vmem:[%s4990_s1 + $0x34c] sm:$0xf0]  ;;  %v3039_v7 = vor.u32 %v3497_v1, %v3038_v0  ;;  %1206 = vmatpush.bf16.msra.mxu0 %v2783_v4  ;;  %v3394_v46 = vld [vmem:[%s3845_s16 + $0x14] sm:$0xf0] }
  0x23   : > { %v2766_v5 = vld [vmem:[%s4990_s1 + $0x20] sm:$0xf]  ;;  %v3429_v8 = vld [vmem:[%s4990_s1 + $0x2c] sm:$0xf0]  ;;  %v3167_v11 = vor.u32 %v3529_v3, %v3166_v2  ;;  %1255 = vmatpush.bf16.msra.mxu1 %v2911_v6  ;;  %v3392_v49 = vld [vmem:[%s3845_s16 + $0xc] sm:$0xf]  ;;  %v3883_v54 = vor.u32 %v3394_v46, %v2630_v45 }
  0x24   : > { %v2894_v9 = vld [vmem:[%s4990_s1 + $0x120] sm:$0xf]  ;;  %v3461_v10 = vld [vmem:[%s4990_s1 + $0x12c] sm:$0xf0]  ;;  %v2767_v16 = vor.u32 %v3429_v8, %v2766_v5  ;;  %1304 = vmatpush.bf16.msra.mxu2 %v3039_v7  ;;  %v2632_v50 = vld [vmem:[%s3845_s16 + $0x18] sm:$0xf0] }
  0x25   : > { %v3022_v12 = vld [vmem:[%s4990_s1 + $0x220] sm:$0xf]  ;;  %v3493_v13 = vld [vmem:[%s4990_s1 + $0x22c] sm:$0xf0]  ;;  %v2895_v20 = vor.u32 %v3461_v10, %v2894_v9  ;;  %1353 = vmatpush.bf16.msra.mxu3 %v3167_v11  ;;  %v3104_v52 = vld [vmem:[%s4990_s1 + $0x2d0] sm:$0xf0]  ;;  %v3891_v57 = vor.u32 %v3392_v49, %v2632_v50 }
  0x26   : > { %v3150_v14 = vld [vmem:[%s4990_s1 + $0x320] sm:$0xf]  ;;  %v3525_v15 = vld [vmem:[%s4990_s1 + $0x32c] sm:$0xf0]  ;;  %v3023_v21 = vor.u32 %v3493_v13, %v3022_v12  ;;  %1207 = vmatpush.bf16.msra.mxu0 %v2767_v16  ;;  %v3543_v55 = vld [vmem:[%s4990_s1 + $0x3c4] sm:$0xf]  ;;  %v3107_v60 = vor.u32 %v3511_v42, %v3104_v52 }
  0x27   : > { %v2750_v17 = vld [vmem:[%s4990_s1] sm:$0xf]  ;;  %v3425_v18 = vld [vmem:[%s4990_s1 + $0xc] sm:$0xf0]  ;;  %v3151_v24 = vor.u32 %v3525_v15, %v3150_v14  ;;  %1256 = vmatpush.bf16.msra.mxu1 %v2895_v20  ;;  %v3232_v56 = vld [vmem:[%s4990_s1 + $0x3d0] sm:$0xf0] }
  0x28   : > { %v2878_v19 = vld [vmem:[%s4990_s1 + $0x100] sm:$0xf]  ;;  %v3457_v22 = vld [vmem:[%s4990_s1 + $0x10c] sm:$0xf0]  ;;  %v2751_v30 = vor.u32 %v3425_v18, %v2750_v17  ;;  %1305 = vmatpush.bf16.msra.mxu2 %v3023_v21  ;;  %v3447_v61 = vld [vmem:[%s4990_s1 + $0xc4] sm:$0xf]  ;;  %v3235_v63 = vor.u32 %v3543_v55, %v3232_v56 }
  0x29   : > { %v3006_v23 = vld [vmem:[%s4990_s1 + $0x200] sm:$0xf]  ;;  %v3489_v25 = vld [vmem:[%s4990_s1 + $0x20c] sm:$0xf0]  ;;  %v2879_v35 = vor.u32 %v3457_v22, %v2878_v19  ;;  %1354 = vmatpush.bf16.msra.mxu3 %v3151_v24  ;;  %v2848_v62 = vld [vmem:[%s4990_s1 + $0xd0] sm:$0xf0] }
  0x2a   : > { %v3134_v26 = vld [vmem:[%s4990_s1 + $0x300] sm:$0xf]  ;;  %v3521_v27 = vld [vmem:[%s4990_s1 + $0x30c] sm:$0xf0]  ;;  %v3007_v36 = vor.u32 %v3489_v25, %v3006_v23  ;;  %1208 = vmatpush.bf16.msra.mxu0 %v2751_v30  ;;  %v3479_v0 = vld [vmem:[%s4990_s1 + $0x1c4] sm:$0xf]  ;;  %v2851_v2 = vor.u32 %v3447_v61, %v2848_v62 }
  0x2b   : > { %v2622_v37 = vld [vmem:[%s3845_s16] sm:$0xf]  ;;  %v3393_v38 = vld [vmem:[%s3845_s16 + $0xc] sm:$0xf0]  ;;  %v3135_v43 = vor.u32 %v3521_v27, %v3134_v26  ;;  %1257 = vmatpush.bf16.msra.mxu1 %v2879_v35  ;;  %v2976_v1 = vld [vmem:[%s4990_s1 + $0x1d0] sm:$0xf0] }
  0x2c   : > { %v3874_v48 = vor.u32 %v3393_v38, %v2622_v37  ;;  %1306 = vmatpush.bf16.msra.mxu2 %v3007_v36  ;;  %v3507_v3 = vld [vmem:[%s4990_s1 + $0x2a4] sm:$0xf]  ;;  %v3088_v4 = vld [vmem:[%s4990_s1 + $0x2b0] sm:$0xf0]  ;;  %v2979_v6 = vor.u32 %v3479_v0, %v2976_v1  ;;  %v2638_v16 = vld [vmem:[%s3845_s16 + $0x20] sm:$0xf] }
  0x2d   : > { %1355 = vmatpush.bf16.msra.mxu3 %v3135_v43  ;;  %v3443_v5 = vld [vmem:[%s4990_s1 + $0xa4] sm:$0xf]  ;;  %v3091_v7 = vor.u32 %v3507_v3, %v3088_v4  ;;  %v2832_v8 = vld [vmem:[%s4990_s1 + $0xb0] sm:$0xf0]  ;;  %v3397_v17 = vld [vmem:[%s3845_s16 + $0x2c] sm:$0xf0] }
  0x2e   : > { %1209 = vmatmul.bf16.vlgmr.msra.gmra.mxu0 %v3874_v48  ;;  %1258 = vmatmul.bf16.vlgmr.msra.gmra.mxu1 %v3881_v53  ;;  %v3539_v9 = vld [vmem:[%s4990_s1 + $0x3a4] sm:$0xf]  ;;  %v3216_v10 = vld [vmem:[%s4990_s1 + $0x3b0] sm:$0xf0]  ;;  %v2835_v14 = vor.u32 %v3443_v5, %v2832_v8  ;;  %v2646_v20 = vld [vmem:[%s3845_s16 + $0x28] sm:$0xf]  ;;  %v3941_v24 = vor.u32 %v3397_v17, %v2638_v16 }
  0x2f   : > { %1307 = vmatmul.bf16.vlgmr.msra.gmra.mxu2 %v3883_v54  ;;  %1397 = vmatpush.bf16.msrb.mxu0 %v2867_v58  ;;  %v3219_v11 = vor.u32 %v3539_v9, %v3216_v10  ;;  %v3475_v12 = vld [vmem:[%s4990_s1 + $0x1a4] sm:$0xf]  ;;  %v2960_v13 = vld [vmem:[%s4990_s1 + $0x1b0] sm:$0xf0]  ;;  %v3398_v21 = vld [vmem:[%s3845_s16 + $0x34] sm:$0xf0] }
  0x30   : > { %1495 = vmatpush.bf16.msrb.mxu2 %v3123_v47  ;;  %1356 = vmatmul.bf16.vlgmr.msra.gmra.mxu3 %v3891_v57  ;;  %v2963_v15 = vor.u32 %v3475_v12, %v2960_v13  ;;  %v3395_v18 = vld [vmem:[%s3845_s16 + $0x24] sm:$0xf]  ;;  %v2640_v19 = vld [vmem:[%s3845_s16 + $0x30] sm:$0xf0]  ;;  %v3396_v22 = vld [vmem:[%s3845_s16 + $0x2c] sm:$0xf]  ;;  %v3945_v26 = vor.u32 %v3398_v21, %v2646_v20 }
  0x31   : > { %1544 = vmatpush.bf16.msrb.mxu3 %v3251_v51  ;;  %1446 = vmatpush.bf16.msrb.mxu1 %v2995_v59  ;;  %v2648_v23 = vld [vmem:[%s3845_s16 + $0x38] sm:$0xf0]  ;;  %v3943_v25 = vor.u32 %v3395_v18, %v2640_v19  ;;  %v3503_v28 = vld [vmem:[%s4990_s1 + $0x284] sm:$0xf]  ;;  %v3072_v29 = vld [vmem:[%s4990_s1 + $0x290] sm:$0xf0] }
  0x32   : > { %v3947_v27 = vor.u32 %v3396_v22, %v2648_v23  ;;  %v3439_v30 = vld [vmem:[%s4990_s1 + $0x84] sm:$0xf]  ;;  %v3075_v31 = vor.u32 %v3503_v28, %v3072_v29  ;;  %v2816_v32 = vld [vmem:[%s4990_s1 + $0x90] sm:$0xf0]  ;;  %v2654_v40 = vld [vmem:[%s3845_s16 + $0x40] sm:$0xf] }
  0x33   : > { %1398 = vmatpush.bf16.msrb.mxu0 %v2851_v2  ;;  %v3535_v33 = vld [vmem:[%s4990_s1 + $0x384] sm:$0xf]  ;;  %v3200_v34 = vld [vmem:[%s4990_s1 + $0x390] sm:$0xf0]  ;;  %v2819_v35 = vor.u32 %v3439_v30, %v2816_v32  ;;  %v3401_v41 = vld [vmem:[%s3845_s16 + $0x4c] sm:$0xf0] }
  0x34   : > { %1496 = vmatpush.bf16.msrb.mxu2 %v3107_v60  ;;  %v3203_v36 = vor.u32 %v3535_v33, %v3200_v34  ;;  %v3471_v37 = vld [vmem:[%s4990_s1 + $0x184] sm:$0xf]  ;;  %v2944_v38 = vld [vmem:[%s4990_s1 + $0x190] sm:$0xf0]  ;;  %v2662_v44 = vld [vmem:[%s3845_s16 + $0x48] sm:$0xf]  ;;  %v3985_v49 = vor.u32 %v3401_v41, %v2654_v40 }
  0x35   : > { %1545 = vmatpush.bf16.msrb.mxu3 %v3235_v63  ;;  %1447 = vmatpush.bf16.msrb.mxu1 %v2979_v6  ;;  %v2947_v39 = vor.u32 %v3471_v37, %v2944_v38  ;;  %v3399_v42 = vld [vmem:[%s3845_s16 + $0x44] sm:$0xf]  ;;  %v2656_v43 = vld [vmem:[%s3845_s16 + $0x50] sm:$0xf0]  ;;  %v3402_v45 = vld [vmem:[%s3845_s16 + $0x54] sm:$0xf0] }
  0x36   : > { %v3400_v46 = vld [vmem:[%s3845_s16 + $0x4c] sm:$0xf]  ;;  %v2664_v47 = vld [vmem:[%s3845_s16 + $0x58] sm:$0xf0]  ;;  %v3987_v50 = vor.u32 %v3399_v42, %v2656_v43  ;;  %v3989_v51 = vor.u32 %v3402_v45, %v2662_v44  ;;  %v3499_v55 = vld [vmem:[%s4990_s1 + $0x264] sm:$0xf] }
  0x37   : > { %1399 = vmatpush.bf16.msrb.mxu0 %v2835_v14  ;;  %v3991_v52 = vor.u32 %v3400_v46, %v2664_v47  ;;  %v3056_v56 = vld [vmem:[%s4990_s1 + $0x270] sm:$0xf0]  ;;  %v3435_v58 = vld [vmem:[%s4990_s1 + $0x64] sm:$0xf]  ;;  %v2670_v4 = vld [vmem:[%s3845_s16 + $0x60] sm:$0xf] }
  0x38   : > { %1497 = vmatpush.bf16.msrb.mxu2 %v3091_v7  ;;  %v3059_v59 = vor.u32 %v3499_v55, %v3056_v56  ;;  %v2800_v60 = vld [vmem:[%s4990_s1 + $0x70] sm:$0xf0]  ;;  %v3531_v61 = vld [vmem:[%s4990_s1 + $0x364] sm:$0xf]  ;;  %v3405_v5 = vld [vmem:[%s3845_s16 + $0x6c] sm:$0xf0] }
  0x39   : > { %1546 = vmatpush.bf16.msrb.mxu3 %v3219_v11  ;;  %1448 = vmatpush.bf16.msrb.mxu1 %v2963_v15  ;;  %v3184_v62 = vld [vmem:[%s4990_s1 + $0x370] sm:$0xf0]  ;;  %v2803_v63 = vor.u32 %v3435_v58, %v2800_v60  ;;  %v3467_v1 = vld [vmem:[%s4990_s1 + $0x164] sm:$0xf]  ;;  %v2678_v8 = vld [vmem:[%s3845_s16 + $0x68] sm:$0xf]  ;;  %v4029_v12 = vor.u32 %v3405_v5, %v2670_v4 }
  0x3a   : > { %v3187_v0 = vor.u32 %v3531_v61, %v3184_v62  ;;  %v2928_v2 = vld [vmem:[%s4990_s1 + $0x170] sm:$0xf0]  ;;  %v3403_v6 = vld [vmem:[%s3845_s16 + $0x64] sm:$0xf]  ;;  %v3406_v9 = vld [vmem:[%s3845_s16 + $0x74] sm:$0xf0] }
  0x3b   : > { %1400 = vmatpush.bf16.msrb.mxu0 %v2819_v35  ;;  %v2931_v3 = vor.u32 %v3467_v1, %v2928_v2  ;;  %v2672_v7 = vld [vmem:[%s3845_s16 + $0x70] sm:$0xf0]  ;;  %v3404_v10 = vld [vmem:[%s3845_s16 + $0x6c] sm:$0xf]  ;;  %v2680_v11 = vld [vmem:[%s3845_s16 + $0x78] sm:$0xf0]  ;;  %v4033_v14 = vor.u32 %v3406_v9, %v2678_v8 }
  0x3c   : > { %1498 = vmatpush.bf16.msrb.mxu2 %v3075_v31  ;;  %v4031_v13 = vor.u32 %v3403_v6, %v2672_v7  ;;  %v4035_v15 = vor.u32 %v3404_v10, %v2680_v11  ;;  %v3495_v16 = vld [vmem:[%s4990_s1 + $0x244] sm:$0xf]  ;;  %v3040_v17 = vld [vmem:[%s4990_s1 + $0x250] sm:$0xf0]  ;;  %v2686_v32 = vld [vmem:[%s3845_s16 + $0x80] sm:$0xf] }
  0x3d   : > { %1547 = vmatpush.bf16.msrb.mxu3 %v3203_v36  ;;  %1449 = vmatpush.bf16.msrb.mxu1 %v2947_v39  ;;  %v3431_v18 = vld [vmem:[%s4990_s1 + $0x44] sm:$0xf]  ;;  %v3043_v19 = vor.u32 %v3495_v16, %v3040_v17  ;;  %v2784_v20 = vld [vmem:[%s4990_s1 + $0x50] sm:$0xf0]  ;;  %v3409_v33 = vld [vmem:[%s3845_s16 + $0x8c] sm:$0xf0] }
  0x3e   : > { %1214 = vmatmul.bf16.gmra.mxu0 %v3941_v24  ;;  %1263 = vmatmul.bf16.gmra.mxu1 %v3943_v25  ;;  %v3527_v21 = vld [vmem:[%s4990_s1 + $0x344] sm:$0xf]  ;;  %v3168_v22 = vld [vmem:[%s4990_s1 + $0x350] sm:$0xf0]  ;;  %v2787_v23 = vor.u32 %v3431_v18, %v2784_v20  ;;  %v2694_v36 = vld [vmem:[%s3845_s16 + $0x88] sm:$0xf]  ;;  %v4073_v40 = vor.u32 %v3409_v33, %v2686_v32 }
  0x3f   : > { %1312 = vmatmul.bf16.gmra.mxu2 %v3945_v26  ;;  %1401 = vmatpush.bf16.msrb.mxu0 %v2803_v63  ;;  %v3171_v28 = vor.u32 %v3527_v21, %v3168_v22  ;;  %v3463_v29 = vld [vmem:[%s4990_s1 + $0x144] sm:$0xf]  ;;  %v2912_v30 = vld [vmem:[%s4990_s1 + $0x150] sm:$0xf0]  ;;  %v3410_v37 = vld [vmem:[%s3845_s16 + $0x94] sm:$0xf0] }
  0x40   : > { %1361 = vmatmul.bf16.gmra.mxu3 %v3947_v27  ;;  %1499 = vmatpush.bf16.msrb.mxu2 %v3059_v59  ;;  %v2915_v31 = vor.u32 %v3463_v29, %v2912_v30  ;;  %v3407_v34 = vld [vmem:[%s3845_s16 + $0x84] sm:$0xf]  ;;  %v2688_v35 = vld [vmem:[%s3845_s16 + $0x90] sm:$0xf0]  ;;  %v3408_v38 = vld [vmem:[%s3845_s16 + $0x8c] sm:$0xf]  ;;  %v4077_v42 = vor.u32 %v3410_v37, %v2694_v36 }
  0x41   : > { %1548 = vmatpush.bf16.msrb.mxu3 %v3187_v0  ;;  %1450 = vmatpush.bf16.msrb.mxu1 %v2931_v3  ;;  %v2696_v39 = vld [vmem:[%s3845_s16 + $0x98] sm:$0xf0]  ;;  %v4075_v41 = vor.u32 %v3407_v34, %v2688_v35  ;;  %v3491_v44 = vld [vmem:[%s4990_s1 + $0x224] sm:$0xf]  ;;  %v3024_v45 = vld [vmem:[%s4990_s1 + $0x230] sm:$0xf0] }
  0x42   : > { %v4079_v43 = vor.u32 %v3408_v38, %v2696_v39  ;;  %v3427_v46 = vld [vmem:[%s4990_s1 + $0x24] sm:$0xf]  ;;  %v3027_v47 = vor.u32 %v3491_v44, %v3024_v45  ;;  %v2768_v55 = vld [vmem:[%s4990_s1 + $0x30] sm:$0xf0]  ;;  %v2702_v0 = vld [vmem:[%s3845_s16 + $0xa0] sm:$0xf] }
  0x43   : > { %1402 = vmatpush.bf16.msrb.mxu0 %v2787_v23  ;;  %v3523_v56 = vld [vmem:[%s4990_s1 + $0x324] sm:$0xf]  ;;  %v3152_v58 = vld [vmem:[%s4990_s1 + $0x330] sm:$0xf0]  ;;  %v2771_v59 = vor.u32 %v3427_v46, %v2768_v55  ;;  %v3413_v1 = vld [vmem:[%s3845_s16 + $0xac] sm:$0xf0] }
  0x44   : > { %1500 = vmatpush.bf16.msrb.mxu2 %v3043_v19  ;;  %v3155_v60 = vor.u32 %v3523_v56, %v3152_v58  ;;  %v3459_v61 = vld [vmem:[%s4990_s1 + $0x124] sm:$0xf]  ;;  %v2896_v62 = vld [vmem:[%s4990_s1 + $0x130] sm:$0xf0]  ;;  %v2710_v4 = vld [vmem:[%s3845_s16 + $0xa8] sm:$0xf]  ;;  %v4117_v8 = vor.u32 %v3413_v1, %v2702_v0 }
  0x45   : > { %1549 = vmatpush.bf16.msrb.mxu3 %v3171_v28  ;;  %1451 = vmatpush.bf16.msrb.mxu1 %v2915_v31  ;;  %v2899_v63 = vor.u32 %v3459_v61, %v2896_v62  ;;  %v3411_v2 = vld [vmem:[%s3845_s16 + $0xa4] sm:$0xf]  ;;  %v2704_v3 = vld [vmem:[%s3845_s16 + $0xb0] sm:$0xf0]  ;;  %v3414_v5 = vld [vmem:[%s3845_s16 + $0xb4] sm:$0xf0] }
  0x46   : > { %v3412_v6 = vld [vmem:[%s3845_s16 + $0xac] sm:$0xf]  ;;  %v2712_v7 = vld [vmem:[%s3845_s16 + $0xb8] sm:$0xf0]  ;;  %v4119_v9 = vor.u32 %v3411_v2, %v2704_v3  ;;  %v4121_v10 = vor.u32 %v3414_v5, %v2710_v4  ;;  %v3487_v16 = vld [vmem:[%s4990_s1 + $0x204] sm:$0xf] }
  0x47   : > { %1403 = vmatpush.bf16.msrb.mxu0 %v2771_v59  ;;  %v4123_v11 = vor.u32 %v3412_v6, %v2712_v7  ;;  %v3008_v17 = vld [vmem:[%s4990_s1 + $0x210] sm:$0xf0]  ;;  %v3423_v18 = vld [vmem:[%s4990_s1 + $0x4] sm:$0xf]  ;;  %v2718_v32 = vld [vmem:[%s3845_s16 + $0xc0] sm:$0xf] }
  0x48   : > { %1501 = vmatpush.bf16.msrb.mxu2 %v3027_v47  ;;  %v3011_v19 = vor.u32 %v3487_v16, %v3008_v17  ;;  %v2752_v20 = vld [vmem:[%s4990_s1 + $0x10] sm:$0xf0]  ;;  %v3519_v21 = vld [vmem:[%s4990_s1 + $0x304] sm:$0xf]  ;;  %v3417_v33 = vld [vmem:[%s3845_s16 + $0xcc] sm:$0xf0] }
  0x49   : > { %1550 = vmatpush.bf16.msrb.mxu3 %v3155_v60  ;;  %1452 = vmatpush.bf16.msrb.mxu1 %v2899_v63  ;;  %v3136_v22 = vld [vmem:[%s4990_s1 + $0x310] sm:$0xf0]  ;;  %v2755_v23 = vor.u32 %v3423_v18, %v2752_v20  ;;  %v3455_v29 = vld [vmem:[%s4990_s1 + $0x104] sm:$0xf]  ;;  %v2726_v36 = vld [vmem:[%s3845_s16 + $0xc8] sm:$0xf]  ;;  %v4161_v44 = vor.u32 %v3417_v33, %v2718_v32 }
  0x4a   : > { %v3139_v28 = vor.u32 %v3519_v21, %v3136_v22  ;;  %v2880_v30 = vld [vmem:[%s4990_s1 + $0x110] sm:$0xf0]  ;;  %v3415_v34 = vld [vmem:[%s3845_s16 + $0xc4] sm:$0xf]  ;;  %v3418_v37 = vld [vmem:[%s3845_s16 + $0xd4] sm:$0xf0] }
  0x4b   : > { %v2883_v31 = vor.u32 %v3455_v29, %v2880_v30  ;;  %1404 = vmatpush.bf16.msrb.mxu0 %v2755_v23  ;;  %v2720_v35 = vld [vmem:[%s3845_s16 + $0xd0] sm:$0xf0]  ;;  %v3416_v38 = vld [vmem:[%s3845_s16 + $0xcc] sm:$0xf]  ;;  %v2728_v39 = vld [vmem:[%s3845_s16 + $0xd8] sm:$0xf0]  ;;  %v4165_v46 = vor.u32 %v3418_v37, %v2726_v36 }
  0x4c   : > { %1502 = vmatpush.bf16.msrb.mxu2 %v3011_v19  ;;  %v4163_v45 = vor.u32 %v3415_v34, %v2720_v35  ;;  %v4167_v47 = vor.u32 %v3416_v38, %v2728_v39  ;;  %v3126_v55 = vld [vmem:[%s4990_s1 + $0x2e8] sm:$0xf]  ;;  %v3518_v56 = vld [vmem:[%s4990_s1 + $0x2f4] sm:$0xf0]  ;;  %v2734_v1 = vld [vmem:[%s3845_s16 + $0xe0] sm:$0xf] }
  0x4d   : > { %1551 = vmatpush.bf16.msrb.mxu3 %v3139_v28  ;;  %1453 = vmatpush.bf16.msrb.mxu1 %v2883_v31  ;;  %v2870_v58 = vld [vmem:[%s4990_s1 + $0xe8] sm:$0xf]  ;;  %v3127_v59 = vor.u32 %v3518_v56, %v3126_v55  ;;  %v3454_v60 = vld [vmem:[%s4990_s1 + $0xf4] sm:$0xf0]  ;;  %v3421_v2 = vld [vmem:[%s3845_s16 + $0xec] sm:$0xf0] }
  0x4e   : > { %1219 = vmatmul.bf16.gmra.mxu0 %v3985_v49  ;;  %1268 = vmatmul.bf16.gmra.mxu1 %v3987_v50  ;;  %v3254_v61 = vld [vmem:[%s4990_s1 + $0x3e8] sm:$0xf]  ;;  %v3550_v62 = vld [vmem:[%s4990_s1 + $0x3f4] sm:$0xf0]  ;;  %v2871_v63 = vor.u32 %v3454_v60, %v2870_v58  ;;  %v3419_v3 = vld [vmem:[%s3845_s16 + $0xe4] sm:$0xf]  ;;  %v4205_v20 = vor.u32 %v3421_v2, %v2734_v1 }
  0x4f   : > { %1317 = vmatmul.bf16.gmra.mxu2 %v3989_v51  ;;  %v3255_v0 = vor.u32 %v3550_v62, %v3254_v61  ;;  %v2998_v4 = vld [vmem:[%s4990_s1 + $0x1e8] sm:$0xf]  ;;  %v3486_v5 = vld [vmem:[%s4990_s1 + $0x1f4] sm:$0xf0]  ;;  %v2736_v6 = vld [vmem:[%s3845_s16 + $0xf0] sm:$0xf0] }
  0x50   : > { %1366 = vmatmul.bf16.gmra.mxu3 %v3991_v52  ;;  %1691 = vmatpush.bf16.msra.mxu2 %v3127_v59  ;;  %v2742_v7 = vld [vmem:[%s3845_s16 + $0xe8] sm:$0xf]  ;;  %v3422_v16 = vld [vmem:[%s3845_s16 + $0xf4] sm:$0xf0]  ;;  %v2999_v17 = vor.u32 %v3486_v5, %v2998_v4  ;;  %v3420_v18 = vld [vmem:[%s3845_s16 + $0xec] sm:$0xf]  ;;  %v4207_v21 = vor.u32 %v3419_v3, %v2736_v6 }
  0x51   : > { %1593 = vmatpush.bf16.msra.mxu0 %v2871_v63  ;;  %1740 = vmatpush.bf16.msra.mxu3 %v3255_v0  ;;  %v2744_v19 = vld [vmem:[%s3845_s16 + $0xf8] sm:$0xf0]  ;;  %v4209_v22 = vor.u32 %v3422_v16, %v2742_v7  ;;  %v3110_v28 = vld [vmem:[%s4990_s1 + $0x2c8] sm:$0xf]  ;;  %v3514_v29 = vld [vmem:[%s4990_s1 + $0x2d4] sm:$0xf0] }
  0x52   : > { %1642 = vmatpush.bf16.msra.mxu1 %v2999_v17  ;;  %v4211_v23 = vor.u32 %v3420_v18, %v2744_v19  ;;  %v2854_v30 = vld [vmem:[%s4990_s1 + $0xc8] sm:$0xf]  ;;  %v3111_v31 = vor.u32 %v3514_v29, %v3110_v28  ;;  %v3450_v32 = vld [vmem:[%s4990_s1 + $0xd4] sm:$0xf0]  ;;  %v4238_v37 = vld [vmem:[%s4991_s2] sm:$0xf] }
  0x53   : > { %v3238_v33 = vld [vmem:[%s4990_s1 + $0x3c8] sm:$0xf]  ;;  %v3546_v34 = vld [vmem:[%s4990_s1 + $0x3d4] sm:$0xf0]  ;;  %v2855_v35 = vor.u32 %v3450_v32, %v2854_v30  ;;  %v4247_v55 = vperm.slane %v4238_v37, 0 }
  0x54   : > { %v3239_v36 = vor.u32 %v3546_v34, %v3238_v33  ;;  %1692 = vmatpush.bf16.msra.mxu2 %v3111_v31  ;;  %v2982_v38 = vld [vmem:[%s4990_s1 + $0x1c8] sm:$0xf]  ;;  %v3482_v39 = vld [vmem:[%s4990_s1 + $0x1d4] sm:$0xf0] }
  0x55   : > { %1594 = vmatpush.bf16.msra.mxu0 %v2855_v35  ;;  %v2983_v56 = vor.u32 %v3482_v39, %v2982_v38  ;;  %v3094_v62 = vld [vmem:[%s4990_s1 + $0x2a8] sm:$0xf]  ;;  %v3510_v63 = vld [vmem:[%s4990_s1 + $0x2b4] sm:$0xf0] }
  0x56   : > { %1741 = vmatpush.bf16.msra.mxu3 %v3239_v36  ;;  %v2838_v0 = vld [vmem:[%s4990_s1 + $0xa8] sm:$0xf]  ;;  %v3095_v1 = vor.u32 %v3510_v63, %v3094_v62  ;;  %v3446_v2 = vld [vmem:[%s4990_s1 + $0xb4] sm:$0xf0] }
  0x57   : > { %1643 = vmatpush.bf16.msra.mxu1 %v2983_v56  ;;  %v3222_v3 = vld [vmem:[%s4990_s1 + $0x3a8] sm:$0xf]  ;;  %v3542_v4 = vld [vmem:[%s4990_s1 + $0x3b4] sm:$0xf0]  ;;  %v2839_v6 = vor.u32 %v3446_v2, %v2838_v0 }
  0x58   : > { %v3223_v7 = vor.u32 %v3542_v4, %v3222_v3  ;;  %1693 = vmatpush.bf16.msra.mxu2 %v3095_v1  ;;  %v2966_v31 = vld [vmem:[%s4990_s1 + $0x1a8] sm:$0xf]  ;;  %v3478_v32 = vld [vmem:[%s4990_s1 + $0x1b4] sm:$0xf0] }
  0x59   : > { %1595 = vmatpush.bf16.msra.mxu0 %v2839_v6  ;;  %v2967_v33 = vor.u32 %v3478_v32, %v2966_v31  ;;  %v3078_v62 = vld [vmem:[%s4990_s1 + $0x288] sm:$0xf]  ;;  %v3506_v63 = vld [vmem:[%s4990_s1 + $0x294] sm:$0xf0] }
  0x5a   : > { %1742 = vmatpush.bf16.msra.mxu3 %v3223_v7  ;;  %v2822_v0 = vld [vmem:[%s4990_s1 + $0x88] sm:$0xf]  ;;  %v3079_v2 = vor.u32 %v3506_v63, %v3078_v62  ;;  %v3442_v3 = vld [vmem:[%s4990_s1 + $0x94] sm:$0xf0] }
  0x5b   : > { %1644 = vmatpush.bf16.msra.mxu1 %v2967_v33  ;;  %v3206_v4 = vld [vmem:[%s4990_s1 + $0x388] sm:$0xf]  ;;  %v2823_v7 = vor.u32 %v3442_v3, %v2822_v0  ;;  %v3474_v33 = vld [vmem:[%s4990_s1 + $0x194] sm:$0xf0] }
  0x5c   : > { %1694 = vmatpush.bf16.msra.mxu2 %v3079_v2  ;;  %v2950_v32 = vld [vmem:[%s4990_s1 + $0x188] sm:$0xf]  ;;  %v3502_v0 = vld [vmem:[%s4990_s1 + $0x274] sm:$0xf0] }
  0x5d   : > { %1596 = vmatpush.bf16.msra.mxu0 %v2823_v7  ;;  %v3062_v63 = vld [vmem:[%s4990_s1 + $0x268] sm:$0xf] }
  0x5e   : > { %1224 = vmatmul.bf16.gmra.mxu0 %v4029_v12  ;;  %1273 = vmatmul.bf16.gmra.mxu1 %v4031_v13  ;;  %v2806_v2 = vld [vmem:[%s4990_s1 + $0x68] sm:$0xf]  ;;  %v3063_v3 = vor.u32 %v3502_v0, %v3062_v63 }
  0x5f   : > { %1322 = vmatmul.bf16.gmra.mxu2 %v4033_v14 }
  0x60   : > { %1371 = vmatmul.bf16.gmra.mxu3 %v4035_v15  ;;  %1695 = vmatpush.bf16.msra.mxu2 %v3063_v3  ;;  %v3498_v3 = vld [vmem:[%s4990_s1 + $0x254] sm:$0xf0] }
  0x6e   : > { %1229 = vmatmul.bf16.gmra.mxu0 %v4073_v40  ;;  %1278 = vmatmul.bf16.gmra.mxu1 %v4075_v41 }
  0x6f   : > { %1327 = vmatmul.bf16.gmra.mxu2 %v4077_v42 }
  0x70   : > { %1376 = vmatmul.bf16.gmra.mxu3 %v4079_v43 }
  0x7e   : > { %1234 = vmatmul.bf16.gmra.mxu0 %v4117_v8  ;;  %1283 = vmatmul.bf16.gmra.mxu1 %v4119_v9 }
  0x7f   : > { %1332 = vmatmul.bf16.gmra.mxu2 %v4121_v10 }
  0x80   : > { %1381 = vmatmul.bf16.gmra.mxu3 %v4123_v11 }
  0x8e   : > { %1239 = vmatmul.bf16.gmra.mxu0 %v4161_v44  ;;  %1288 = vmatmul.bf16.gmra.mxu1 %v4163_v45 }
  0x8f   : > { %1337 = vmatmul.bf16.gmra.mxu2 %v4165_v46 }
  0x90   : > { %1386 = vmatmul.bf16.gmra.mxu3 %v4167_v47 }
  0x9e   : > { %1244 = vmatmul.bf16.gmra.mxu0 %v4205_v20  ;;  %1293 = vmatmul.bf16.gmra.mxu1 %v4207_v21 }
  0x9f   : > { %1342 = vmatmul.bf16.gmra.mxu2 %v4209_v22 }
  0xa0   : > { %1391 = vmatmul.bf16.gmra.mxu3 %v4211_v23 }
  0xab   : > { %v1210_v58 = vpop.f32.mrf.mxu0  ;;  %v1259_v60 = vpop.f32.mrf.mxu1 }
  0xac   : > { %v1211_v59 = vadd.f32 %v1210_v58, %v4247_v55 }
  0xae   : > { %v1260_v61 = vadd.f32 %v1259_v60, %v1211_v59  ;;  %1405 = vmatmul.bf16.vlgmr.msrb.gmra.mxu0 %v3874_v48  ;;  %1454 = vmatmul.bf16.vlgmr.msrb.gmra.mxu1 %v3881_v53 }
  0xaf   : > { %1503 = vmatmul.bf16.vlgmr.msrb.gmra.mxu2 %v3883_v54 }
  0xb0   : > { %1552 = vmatmul.bf16.vlgmr.msrb.gmra.mxu3 %v3891_v57 }
  0xb2   : > { %v1308_v5 = vpop.f32.mrf.mxu2 }
  0xb3   : > { %v1309_v16 = vadd.f32 %v1308_v5, %v1260_v61  ;;  %v1357_v17 = vpop.f32.mrf.mxu3  ;;  %v1212_v18 = vpop.f32.mrf.mxu0  ;;  %v3538_v5 = vld [vmem:[%s4990_s1 + $0x394] sm:$0xf0] }
  0xb4   : > { %v1213_v19 = vadd.f32 %v1212_v18, %v4247_v55  ;;  %v1261_v28 = vpop.f32.mrf.mxu1 }
  0xb5   : > { %v1358_v29 = vadd.f32 %v1357_v17, %v1309_v16  ;;  %v3207_v16 = vor.u32 %v3538_v5, %v3206_v4  ;;  %v3438_v4 = vld [vmem:[%s4990_s1 + $0x74] sm:$0xf0]  ;;  %v3190_v5 = vld [vmem:[%s4990_s1 + $0x368] sm:$0xf] }
  0xb6   : > { %v1262_v30 = vadd.f32 %v1261_v28, %v1213_v19 }
  0xb7   : > { %v1985_v60 = vmax.f32 %v1358_v29, 0.0  ;;  %1743 = vmatpush.bf16.msra.mxu3 %v3207_v16 }
  0xba   : > { %v1310_v34 = vpop.f32.mrf.mxu2 }
  0xbb   : > { %v1311_v35 = vadd.f32 %v1310_v34, %v1262_v30  ;;  %v1359_v36 = vpop.f32.mrf.mxu3  ;;  %v1215_v38 = vpop.f32.mrf.mxu0  ;;  %v2951_v34 = vor.u32 %v3474_v33, %v2950_v32 }
  0xbc   : > { %v1216_v39 = vadd.f32 %v1215_v38, %v4247_v55  ;;  %v1264_v56 = vpop.f32.mrf.mxu1 }
  0xbd   : > { %v1360_v58 = vadd.f32 %v1359_v36, %v1311_v35  ;;  %1645 = vmatpush.bf16.msra.mxu1 %v2951_v34  ;;  %v2934_v34 = vld [vmem:[%s4990_s1 + $0x168] sm:$0xf] }
  0xbe   : > { %v1265_v59 = vadd.f32 %v1264_v56, %v1216_v39  ;;  %1410 = vmatmul.bf16.gmra.mxu0 %v3941_v24  ;;  %1459 = vmatmul.bf16.gmra.mxu1 %v3943_v25 }
  0xbf   : > { %v1989_v61 = vmax.f32 %v1360_v58, 0.0  ;;  %1508 = vmatmul.bf16.gmra.mxu2 %v3945_v26 }
  0xc0   : > { %1557 = vmatmul.bf16.gmra.mxu3 %v3947_v27 }
  0xc1   : > { %v4293_v1 = vpack.c.bf16 %v1989_v61, %v1985_v60 }
  0xc2   : > { %v1313_v6 = vpop.f32.mrf.mxu2 }
  0xc3   : > { %v1314_v17 = vadd.f32 %v1313_v6, %v1265_v59  ;;  %v1362_v18 = vpop.f32.mrf.mxu3  ;;  %v1217_v19 = vpop.f32.mrf.mxu0  ;;  %v3534_v6 = vld [vmem:[%s4990_s1 + $0x374] sm:$0xf0] }
  0xc4   : > { %v1218_v28 = vadd.f32 %v1217_v19, %v4247_v55  ;;  %v1266_v29 = vpop.f32.mrf.mxu1 }
  0xc5   : > { %v1363_v30 = vadd.f32 %v1362_v18, %v1314_v17  ;;  %v2807_v17 = vor.u32 %v3438_v4, %v2806_v2  ;;  %v3191_v18 = vor.u32 %v3534_v6, %v3190_v5  ;;  %v3046_v2 = vld [vmem:[%s4990_s1 + $0x248] sm:$0xf]  ;;  %v3434_v6 = vld [vmem:[%s4990_s1 + $0x54] sm:$0xf0] }
  0xc6   : > { %v1267_v31 = vadd.f32 %v1266_v29, %v1218_v28  ;;  %v2790_v4 = vld [vmem:[%s4990_s1 + $0x48] sm:$0xf]  ;;  %v3047_v5 = vor.u32 %v3498_v3, %v3046_v2 }
  0xc7   : > { %v1993_v61 = vmax.f32 %v1363_v30, 0.0  ;;  %1597 = vmatpush.bf16.msra.mxu0 %v2807_v17  ;;  %1744 = vmatpush.bf16.msra.mxu3 %v3191_v18  ;;  %v3530_v17 = vld [vmem:[%s4990_s1 + $0x354] sm:$0xf0] }
  0xc8   : > { %1696 = vmatpush.bf16.msra.mxu2 %v3047_v5  ;;  %v3030_v5 = vld [vmem:[%s4990_s1 + $0x228] sm:$0xf] }
  0xca   : > { %v1315_v35 = vpop.f32.mrf.mxu2 }
  0xcb   : > { %v1316_v36 = vadd.f32 %v1315_v35, %v1267_v31  ;;  %v1364_v38 = vpop.f32.mrf.mxu3  ;;  %v1220_v39 = vpop.f32.mrf.mxu0  ;;  %v3470_v35 = vld [vmem:[%s4990_s1 + $0x174] sm:$0xf0] }
  0xcc   : > { %v1221_v56 = vadd.f32 %v1220_v39, %v4247_v55  ;;  %v1269_v58 = vpop.f32.mrf.mxu1 }
  0xcd   : > { %v1365_v59 = vadd.f32 %v1364_v38, %v1316_v36  ;;  %v2935_v36 = vor.u32 %v3470_v35, %v2934_v34 }
  0xce   : > { %v1270_v60 = vadd.f32 %v1269_v58, %v1221_v56  ;;  %1415 = vmatmul.bf16.gmra.mxu0 %v3985_v49  ;;  %1464 = vmatmul.bf16.gmra.mxu1 %v3987_v50 }
  0xcf   : > { %v1997_v62 = vmax.f32 %v1365_v59, 0.0  ;;  %1513 = vmatmul.bf16.gmra.mxu2 %v3989_v51  ;;  %1646 = vmatpush.bf16.msra.mxu1 %v2935_v36 }
  0xd0   : > { %1562 = vmatmul.bf16.gmra.mxu3 %v3991_v52 }
  0xd1   : > { %v4334_v7 = vpack.c.bf16 %v1997_v62, %v1993_v61 }
  0xd2   : > { %v1318_v16 = vpop.f32.mrf.mxu2 }
  0xd3   : > { %v1319_v19 = vadd.f32 %v1318_v16, %v1270_v60  ;;  %v1367_v28 = vpop.f32.mrf.mxu3  ;;  %v1222_v29 = vpop.f32.mrf.mxu0  ;;  %v3174_v16 = vld [vmem:[%s4990_s1 + $0x348] sm:$0xf] }
  0xd4   : > { %v1223_v30 = vadd.f32 %v1222_v29, %v4247_v55  ;;  %v1271_v31 = vpop.f32.mrf.mxu1  ;;  %v3175_v29 = vor.u32 %v3530_v17, %v3174_v16  ;;  %v2774_v16 = vld [vmem:[%s4990_s1 + $0x28] sm:$0xf] }
  0xd5   : > { %v1368_v32 = vadd.f32 %v1367_v28, %v1319_v19  ;;  %v2791_v28 = vor.u32 %v3434_v6, %v2790_v4  ;;  %v3494_v6 = vld [vmem:[%s4990_s1 + $0x234] sm:$0xf0] }
  0xd6   : > { %v1272_v33 = vadd.f32 %v1271_v31, %v1223_v30  ;;  %1745 = vmatpush.bf16.msra.mxu3 %v3175_v29  ;;  %v3031_v17 = vor.u32 %v3494_v6, %v3030_v5  ;;  %v3526_v29 = vld [vmem:[%s4990_s1 + $0x334] sm:$0xf0] }
  0xd7   : > { %v2001_v63 = vmax.f32 %v1368_v32, 0.0  ;;  %1598 = vmatpush.bf16.msra.mxu0 %v2791_v28  ;;  %v3158_v28 = vld [vmem:[%s4990_s1 + $0x328] sm:$0xf] }
  0xd8   : > { %1697 = vmatpush.bf16.msra.mxu2 %v3031_v17 }
  0xda   : > { %v1320_v38 = vpop.f32.mrf.mxu2 }
  0xdb   : > { %v1321_v39 = vadd.f32 %v1320_v38, %v1272_v33  ;;  %v1369_v56 = vpop.f32.mrf.mxu3  ;;  %v1225_v58 = vpop.f32.mrf.mxu0  ;;  %v2918_v38 = vld [vmem:[%s4990_s1 + $0x148] sm:$0xf] }
  0xdc   : > { %v1226_v59 = vadd.f32 %v1225_v58, %v4247_v55  ;;  %v1274_v60 = vpop.f32.mrf.mxu1 }
  0xdd   : > { %v1370_v61 = vadd.f32 %v1369_v56, %v1321_v39  ;;  %v3466_v39 = vld [vmem:[%s4990_s1 + $0x154] sm:$0xf0] }
  0xde   : > { %v1275_v62 = vadd.f32 %v1274_v60, %v1226_v59  ;;  %1420 = vmatmul.bf16.gmra.mxu0 %v4029_v12  ;;  %1469 = vmatmul.bf16.gmra.mxu1 %v4031_v13  ;;  %v2919_v56 = vor.u32 %v3466_v39, %v2918_v38 }
  0xdf   : > { %v2005_v0 = vmax.f32 %v1370_v61, 0.0  ;;  %1518 = vmatmul.bf16.gmra.mxu2 %v4033_v14 }
  0xe0   : > { %1567 = vmatmul.bf16.gmra.mxu3 %v4035_v15  ;;  %1647 = vmatpush.bf16.msra.mxu1 %v2919_v56 }
  0xe1   : > { %v4366_v18 = vpack.c.bf16 %v2005_v0, %v2001_v63 }
  0xe2   : > { %v1323_v19 = vpop.f32.mrf.mxu2 }
  0xe3   : > { %v1324_v30 = vadd.f32 %v1323_v19, %v1275_v62  ;;  %v1372_v31 = vpop.f32.mrf.mxu3  ;;  %v1227_v32 = vpop.f32.mrf.mxu0  ;;  %v3430_v19 = vld [vmem:[%s4990_s1 + $0x34] sm:$0xf0] }
  0xe4   : > { %v1228_v33 = vadd.f32 %v1227_v32, %v4247_v55  ;;  %v1276_v34 = vpop.f32.mrf.mxu1  ;;  %v2775_v32 = vor.u32 %v3430_v19, %v2774_v16  ;;  %v3014_v19 = vld [vmem:[%s4990_s1 + $0x208] sm:$0xf] }
  0xe5   : > { %v1373_v35 = vadd.f32 %v1372_v31, %v1324_v30 }
  0xe6   : > { %v1277_v36 = vadd.f32 %v1276_v34, %v1228_v33  ;;  %v3159_v33 = vor.u32 %v3526_v29, %v3158_v28  ;;  %1599 = vmatpush.bf16.msra.mxu0 %v2775_v32  ;;  %v3490_v28 = vld [vmem:[%s4990_s1 + $0x214] sm:$0xf0]  ;;  %v2758_v29 = vld [vmem:[%s4990_s1 + $0x8] sm:$0xf] }
  0xe7   : > { %v2009_v3 = vmax.f32 %v1373_v35, 0.0  ;;  %v3426_v32 = vld [vmem:[%s4990_s1 + $0x14] sm:$0xf0] }
  0xe8   : > { %1746 = vmatpush.bf16.msra.mxu3 %v3159_v33  ;;  %v3142_v33 = vld [vmem:[%s4990_s1 + $0x308] sm:$0xf] }
  0xea   : > { %v1325_v58 = vpop.f32.mrf.mxu2 }
  0xeb   : > { %v1326_v59 = vadd.f32 %v1325_v58, %v1277_v36  ;;  %v1374_v60 = vpop.f32.mrf.mxu3  ;;  %v1230_v61 = vpop.f32.mrf.mxu0 }
  0xec   : > { %v1231_v62 = vadd.f32 %v1230_v61, %v4247_v55  ;;  %v1279_v63 = vpop.f32.mrf.mxu1 }
  0xed   : > { %v1375_v0 = vadd.f32 %v1374_v60, %v1326_v59  ;;  %v2902_v59 = vld [vmem:[%s4990_s1 + $0x128] sm:$0xf]  ;;  %v3462_v60 = vld [vmem:[%s4990_s1 + $0x134] sm:$0xf0] }
  0xee   : > { %v1280_v2 = vadd.f32 %v1279_v63, %v1231_v62  ;;  %1425 = vmatmul.bf16.gmra.mxu0 %v4073_v40  ;;  %1474 = vmatmul.bf16.gmra.mxu1 %v4075_v41  ;;  %v2903_v61 = vor.u32 %v3462_v60, %v2902_v59 }
  0xef   : > { %v2013_v4 = vmax.f32 %v1375_v0, 0.0  ;;  %1523 = vmatmul.bf16.gmra.mxu2 %v4077_v42 }
  0xf0   : > { %1572 = vmatmul.bf16.gmra.mxu3 %v4079_v43  ;;  %1648 = vmatpush.bf16.msra.mxu1 %v2903_v61 }
  0xf1   : > { %v4398_v30 = vpack.c.bf16 %v2013_v4, %v2009_v3 }
  0xf2   : > { %v1328_v31 = vpop.f32.mrf.mxu2 }
  0xf3   : > { %v1329_v34 = vadd.f32 %v1328_v31, %v1280_v2  ;;  %v1377_v35 = vpop.f32.mrf.mxu3  ;;  %v1232_v36 = vpop.f32.mrf.mxu0  ;;  %v3015_v31 = vor.u32 %v3490_v28, %v3014_v19 }
  0xf4   : > { %v1233_v38 = vadd.f32 %v1232_v36, %v4247_v55  ;;  %v1281_v39 = vpop.f32.mrf.mxu1 }
  0xf5   : > { %v1378_v56 = vadd.f32 %v1377_v35, %v1329_v34  ;;  %v3522_v34 = vld [vmem:[%s4990_s1 + $0x314] sm:$0xf0]  ;;  %1698 = vmatpush.bf16.msra.mxu2 %v3015_v31 }
  0xf6   : > { %v1282_v58 = vadd.f32 %v1281_v39, %v1233_v38  ;;  %v2759_v38 = vor.u32 %v3426_v32, %v2758_v29  ;;  %v3143_v39 = vor.u32 %v3522_v34, %v3142_v33  ;;  %v3516_v33 = vld [vmem:[%s4990_s1 + $0x2ec] sm:$0xf]  ;;  %v3128_v34 = vld [vmem:[%s4990_s1 + $0x2f8] sm:$0xf0] }
  0xf7   : > { %v2017_v16 = vmax.f32 %v1378_v56, 0.0 }
  0xf8   : > { %1600 = vmatpush.bf16.msra.mxu0 %v2759_v38  ;;  %1747 = vmatpush.bf16.msra.mxu3 %v3143_v39  ;;  %v3131_v38 = vor.u32 %v3516_v33, %v3128_v34  ;;  %v2872_v39 = vld [vmem:[%s4990_s1 + $0xf8] sm:$0xf0] }
  0xfa   : > { %v1330_v62 = vpop.f32.mrf.mxu2  ;;  %1887 = vmatpush.bf16.msrb.mxu2 %v3131_v38 }
  0xfb   : > { %v1331_v63 = vadd.f32 %v1330_v62, %v1282_v58  ;;  %v1379_v0 = vpop.f32.mrf.mxu3  ;;  %v1235_v2 = vpop.f32.mrf.mxu0 }
  0xfc   : > { %v1236_v3 = vadd.f32 %v1235_v2, %v4247_v55  ;;  %v1284_v4 = vpop.f32.mrf.mxu1  ;;  %v3458_v2 = vld [vmem:[%s4990_s1 + $0x114] sm:$0xf0] }
  0xfd   : > { %v1380_v5 = vadd.f32 %v1379_v0, %v1331_v63  ;;  %v2886_v0 = vld [vmem:[%s4990_s1 + $0x108] sm:$0xf] }
  0xfe   : > { %v1285_v6 = vadd.f32 %v1284_v4, %v1236_v3  ;;  %1430 = vmatmul.bf16.gmra.mxu0 %v4117_v8  ;;  %1479 = vmatmul.bf16.gmra.mxu1 %v4119_v9  ;;  %v2887_v3 = vor.u32 %v3458_v2, %v2886_v0 }
  0xff   : > { %v2021_v17 = vmax.f32 %v1380_v5, 0.0  ;;  %1528 = vmatmul.bf16.gmra.mxu2 %v4121_v10 }
 0x100   : > { %1577 = vmatmul.bf16.gmra.mxu3 %v4123_v11  ;;  %1649 = vmatpush.bf16.msra.mxu1 %v2887_v3 }
 0x101   : > { %v4430_v35 = vpack.c.bf16 %v2021_v17, %v2017_v16 }
 0x102   : > { %v1333_v36 = vpop.f32.mrf.mxu2 }
 0x103   : > { %v1334_v56 = vadd.f32 %v1333_v36, %v1285_v6  ;;  %v1382_v58 = vpop.f32.mrf.mxu3  ;;  %v1237_v59 = vpop.f32.mrf.mxu0  ;;  %v3452_v36 = vld [vmem:[%s4990_s1 + $0xec] sm:$0xf] }
 0x104   : > { %v1238_v60 = vadd.f32 %v1237_v59, %v4247_v55  ;;  %v1286_v61 = vpop.f32.mrf.mxu1 }
 0x105   : > { %v1383_v62 = vadd.f32 %v1382_v58, %v1334_v56  ;;  %v3548_v56 = vld [vmem:[%s4990_s1 + $0x3ec] sm:$0xf]  ;;  %v3256_v58 = vld [vmem:[%s4990_s1 + $0x3f8] sm:$0xf0] }
 0x106   : > { %v1287_v63 = vadd.f32 %v1286_v61, %v1238_v60  ;;  %v2875_v61 = vor.u32 %v3452_v36, %v2872_v39 }
 0x107   : > { %v2025_v31 = vmax.f32 %v1383_v62, 0.0  ;;  %v3259_v62 = vor.u32 %v3548_v56, %v3256_v58  ;;  %v3512_v58 = vld [vmem:[%s4990_s1 + $0x2cc] sm:$0xf] }
 0x108   : > { %1789 = vmatpush.bf16.msrb.mxu0 %v2875_v61  ;;  %v3448_v61 = vld [vmem:[%s4990_s1 + $0xcc] sm:$0xf] }
 0x109   : > { %1936 = vmatpush.bf16.msrb.mxu3 %v3259_v62 }
 0x10a   : > { %v1335_v4 = vpop.f32.mrf.mxu2 }
 0x10b   : > { %v1336_v5 = vadd.f32 %v1335_v4, %v1287_v63  ;;  %v1384_v6 = vpop.f32.mrf.mxu3  ;;  %v1240_v16 = vpop.f32.mrf.mxu0 }
 0x10c   : > { %v1241_v17 = vadd.f32 %v1240_v16, %v4247_v55  ;;  %v1289_v19 = vpop.f32.mrf.mxu1  ;;  %v3484_v16 = vld [vmem:[%s4990_s1 + $0x1ec] sm:$0xf] }
 0x10d   : > { %v1385_v28 = vadd.f32 %v1384_v6, %v1336_v5 }
 0x10e   : > { %v1290_v29 = vadd.f32 %v1289_v19, %v1241_v17  ;;  %1435 = vmatmul.bf16.gmra.mxu0 %v4161_v44  ;;  %1484 = vmatmul.bf16.gmra.mxu1 %v4163_v45  ;;  %v3000_v17 = vld [vmem:[%s4990_s1 + $0x1f8] sm:$0xf0] }
 0x10f   : > { %v2029_v32 = vmax.f32 %v1385_v28, 0.0  ;;  %1533 = vmatmul.bf16.gmra.mxu2 %v4165_v46  ;;  %v3003_v19 = vor.u32 %v3484_v16, %v3000_v17 }
 0x110   : > { %1582 = vmatmul.bf16.gmra.mxu3 %v4167_v47 }
 0x111   : > { %v4462_v59 = vpack.c.bf16 %v2029_v32, %v2025_v31  ;;  %1838 = vmatpush.bf16.msrb.mxu1 %v3003_v19 }
 0x112   : > { %v1338_v60 = vpop.f32.mrf.mxu2 }
 0x113   : > { %v1339_v63 = vadd.f32 %v1338_v60, %v1290_v29  ;;  %v1387_v0 = vpop.f32.mrf.mxu3  ;;  %v1242_v2 = vpop.f32.mrf.mxu0  ;;  %v3112_v60 = vld [vmem:[%s4990_s1 + $0x2d8] sm:$0xf0] }
 0x114   : > { %v1243_v3 = vadd.f32 %v1242_v2, %v4247_v55  ;;  %v1291_v4 = vpop.f32.mrf.mxu1  ;;  %v2856_v2 = vld [vmem:[%s4990_s1 + $0xd8] sm:$0xf0] }
 0x115   : > { %v1388_v5 = vadd.f32 %v1387_v0, %v1339_v63  ;;  %v3115_v0 = vor.u32 %v3512_v58, %v3112_v60  ;;  %v2859_v17 = vor.u32 %v3448_v61, %v2856_v2 }
 0x116   : > { %v1292_v6 = vadd.f32 %v1291_v4, %v1243_v3  ;;  %v3544_v3 = vld [vmem:[%s4990_s1 + $0x3cc] sm:$0xf]  ;;  %v3240_v4 = vld [vmem:[%s4990_s1 + $0x3d8] sm:$0xf0] }
 0x117   : > { %v2033_v39 = vmax.f32 %v1388_v5, 0.0  ;;  %v3243_v19 = vor.u32 %v3544_v3, %v3240_v4  ;;  %1888 = vmatpush.bf16.msrb.mxu2 %v3115_v0  ;;  %1790 = vmatpush.bf16.msrb.mxu0 %v2859_v17  ;;  %v3096_v4 = vld [vmem:[%s4990_s1 + $0x2b8] sm:$0xf0]  ;;  %v3540_v17 = vld [vmem:[%s4990_s1 + $0x3ac] sm:$0xf] }
 0x119   : > { %1937 = vmatpush.bf16.msrb.mxu3 %v3243_v19  ;;  %v3224_v19 = vld [vmem:[%s4990_s1 + $0x3b8] sm:$0xf0] }
 0x11a   : > { %v1340_v28 = vpop.f32.mrf.mxu2 }
 0x11b   : > { %v1341_v29 = vadd.f32 %v1340_v28, %v1292_v6  ;;  %v1389_v31 = vpop.f32.mrf.mxu3  ;;  %v1245_v32 = vpop.f32.mrf.mxu0 }
 0x11c   : > { %v1246_v33 = vadd.f32 %v1245_v32, %v4247_v55  ;;  %v1294_v34 = vpop.f32.mrf.mxu1 }
 0x11d   : > { %v1390_v36 = vadd.f32 %v1389_v31, %v1341_v29 }
 0x11e   : > { %v1295_v38 = vadd.f32 %v1294_v34, %v1246_v33  ;;  %1440 = vmatmul.bf16.gmra.mxu0 %v4205_v20  ;;  %1489 = vmatmul.bf16.gmra.mxu1 %v4207_v21  ;;  %v3480_v33 = vld [vmem:[%s4990_s1 + $0x1cc] sm:$0xf]  ;;  %v2984_v34 = vld [vmem:[%s4990_s1 + $0x1d8] sm:$0xf0] }
 0x11f   : > { %v2037_v56 = vmax.f32 %v1390_v36, 0.0  ;;  %1538 = vmatmul.bf16.gmra.mxu2 %v4209_v22  ;;  %v4504_v36 = vperm.slane %v4238_v37, 1  ;;  %v3508_v37 = vld [vmem:[%s4990_s1 + $0x2ac] sm:$0xf] }
 0x120   : > { %1587 = vmatmul.bf16.gmra.mxu3 %v4211_v23 }
 0x121   : > { %v4485_v62 = vpack.c.bf16 %v2037_v56, %v2033_v39 }
 0x122   : > { %v1343_v63 = vpop.f32.mrf.mxu2 }
 0x123   : > { %4995 = vst [vmem:[#allocation2_spill] sm:$0xff] %v4485_v62  ;;  %v1344_v5 = vadd.f32 %v1343_v63, %v1295_v38  ;;  %v1392_v6 = vpop.f32.mrf.mxu3  ;;  %v1247_v16 = vpop.f32.mrf.mxu0  ;;  %v2987_v38 = vor.u32 %v3480_v33, %v2984_v34 }
 0x124   : > { %v1248_v28 = vadd.f32 %v1247_v16, %v4247_v55  ;;  %v1296_v29 = vpop.f32.mrf.mxu1  ;;  %v2840_v16 = vld [vmem:[%s4990_s1 + $0xb8] sm:$0xf0] }
 0x125   : > { %v1393_v31 = vadd.f32 %v1392_v6, %v1344_v5  ;;  %1839 = vmatpush.bf16.msrb.mxu1 %v2987_v38  ;;  %v3444_v5 = vld [vmem:[%s4990_s1 + $0xac] sm:$0xf]  ;;  %v3099_v6 = vor.u32 %v3508_v37, %v3096_v4 }
 0x126   : > { %v1297_v32 = vadd.f32 %v1296_v29, %v1248_v28 }
 0x127   : > { %v2041_v2 = vmax.f32 %v1393_v31, 0.0  ;;  %v2843_v31 = vor.u32 %v3444_v5, %v2840_v16  ;;  %1889 = vmatpush.bf16.msrb.mxu2 %v3099_v6 }
 0x129   : > { %1791 = vmatpush.bf16.msrb.mxu0 %v2843_v31  ;;  %v3080_v31 = vld [vmem:[%s4990_s1 + $0x298] sm:$0xf0] }
 0x12a   : > { %v1345_v39 = vpop.f32.mrf.mxu2 }
 0x12b   : > { %v1346_v55 = vadd.f32 %v1345_v39, %v1297_v32  ;;  %v1394_v56 = vpop.f32.mrf.mxu3  ;;  %v1406_v58 = vpop.f32.mrf.mxu0  ;;  %v3227_v32 = vor.u32 %v3540_v17, %v3224_v19 }
 0x12c   : > { %v1407_v60 = vadd.f32 %v1406_v58, %v4504_v36  ;;  %v1455_v61 = vpop.f32.mrf.mxu1 }
 0x12d   : > { %v1395_v63 = vadd.f32 %v1394_v56, %v1346_v55  ;;  %1938 = vmatpush.bf16.msrb.mxu3 %v3227_v32  ;;  %v3440_v32 = vld [vmem:[%s4990_s1 + $0x8c] sm:$0xf] }
 0x12e   : > { %v1456_v0 = vadd.f32 %v1455_v61, %v1407_v60  ;;  %1601 = vmatmul.bf16.vlgmr.msra.gmra.mxu0 %v3874_v48  ;;  %1650 = vmatmul.bf16.vlgmr.msra.gmra.mxu1 %v3881_v53  ;;  %v3476_v60 = vld [vmem:[%s4990_s1 + $0x1ac] sm:$0xf]  ;;  %v2968_v61 = vld [vmem:[%s4990_s1 + $0x1b8] sm:$0xf0] }
 0x12f   : > { %v2045_v3 = vmax.f32 %v1395_v63, 0.0  ;;  %1699 = vmatmul.bf16.vlgmr.msra.gmra.mxu2 %v3883_v54  ;;  %v2971_v63 = vor.u32 %v3476_v60, %v2968_v61 }
 0x130   : > { %1748 = vmatmul.bf16.vlgmr.msra.gmra.mxu3 %v3891_v57 }
 0x131   : > { %v4529_v28 = vpack.c.bf16 %v2045_v3, %v2041_v2  ;;  %1840 = vmatpush.bf16.msrb.mxu1 %v2971_v63 }
 0x132   : > { %v1504_v29 = vpop.f32.mrf.mxu2 }
 0x133   : > { %4996 = vst [vmem:[#allocation3_spill] sm:$0xff] %v4529_v28  ;;  %v1505_v33 = vadd.f32 %v1504_v29, %v1456_v0  ;;  %v1553_v34 = vpop.f32.mrf.mxu3  ;;  %v1408_v38 = vpop.f32.mrf.mxu0  ;;  %v3504_v29 = vld [vmem:[%s4990_s1 + $0x28c] sm:$0xf] }
 0x134   : > { %v1409_v39 = vadd.f32 %v1408_v38, %v4504_v36  ;;  %v1457_v55 = vpop.f32.mrf.mxu1  ;;  %v2824_v38 = vld [vmem:[%s4990_s1 + $0x98] sm:$0xf0]  ;;  %v3456_v28 = vld [vmem:[%s4990_s1 + $0x10c] sm:$0xf] }
 0x135   : > { %v1554_v56 = vadd.f32 %v1553_v34, %v1505_v33  ;;  %v3083_v34 = vor.u32 %v3504_v29, %v3080_v31 }
 0x136   : > { %v1458_v58 = vadd.f32 %v1457_v55, %v1409_v39  ;;  %v3536_v39 = vld [vmem:[%s4990_s1 + $0x38c] sm:$0xf]  ;;  %v3208_v55 = vld [vmem:[%s4990_s1 + $0x398] sm:$0xf0] }
 0x137   : > { %v1986_v17 = vmax.f32 %v1554_v56, 0.0  ;;  %v3211_v60 = vor.u32 %v3536_v39, %v3208_v55  ;;  %1890 = vmatpush.bf16.msrb.mxu2 %v3083_v34 }
 0x139   : > { %1939 = vmatpush.bf16.msrb.mxu3 %v3211_v60  ;;  %v3064_v60 = vld [vmem:[%s4990_s1 + $0x278] sm:$0xf0] }
 0x13a   : > { %v1506_v0 = vpop.f32.mrf.mxu2 }
 0x13b   : > { %v1507_v2 = vadd.f32 %v1506_v0, %v1458_v58  ;;  %v1555_v3 = vpop.f32.mrf.mxu3  ;;  %v1411_v37 = vpop.f32.mrf.mxu0  ;;  %v2827_v58 = vor.u32 %v3440_v32, %v2824_v38 }
 0x13c   : > { %v1412_v4 = vadd.f32 %v1411_v37, %v4504_v36  ;;  %v1460_v5 = vpop.f32.mrf.mxu1 }
 0x13d   : > { %v1556_v6 = vadd.f32 %v1555_v3, %v1507_v2  ;;  %1792 = vmatpush.bf16.msrb.mxu0 %v2827_v58  ;;  %v3500_v58 = vld [vmem:[%s4990_s1 + $0x26c] sm:$0xf] }
 0x13e   : > { %v1461_v16 = vadd.f32 %v1460_v5, %v1412_v4  ;;  %1606 = vmatmul.bf16.gmra.mxu0 %v3941_v24  ;;  %1655 = vmatmul.bf16.gmra.mxu1 %v3943_v25  ;;  %v3472_v5 = vld [vmem:[%s4990_s1 + $0x18c] sm:$0xf] }
 0x13f   : > { %v1990_v19 = vmax.f32 %v1556_v6, 0.0  ;;  %1704 = vmatmul.bf16.gmra.mxu2 %v3945_v26  ;;  %v2952_v6 = vld [vmem:[%s4990_s1 + $0x198] sm:$0xf0] }
 0x140   : > { %1753 = vmatmul.bf16.gmra.mxu3 %v3947_v27 }
 0x141   : > { %v4552_v33 = vpack.c.bf16 %v1990_v19, %v1986_v17  ;;  %v2955_v17 = vor.u32 %v3472_v5, %v2952_v6 }
 0x142   : > { %v1509_v56 = vpop.f32.mrf.mxu2 }
 0x143   : > { %v1510_v61 = vadd.f32 %v1509_v56, %v1461_v16  ;;  %v1558_v63 = vpop.f32.mrf.mxu3  ;;  %v1413_v0 = vpop.f32.mrf.mxu0  ;;  %1841 = vmatpush.bf16.msrb.mxu1 %v2955_v17 }
 0x144   : > { %v1414_v2 = vadd.f32 %v1413_v0, %v4504_v36  ;;  %v1462_v3 = vpop.f32.mrf.mxu1  ;;  %v2808_v0 = vld [vmem:[%s4990_s1 + $0x78] sm:$0xf0] }
 0x145   : > { %v1559_v37 = vadd.f32 %v1558_v63, %v1510_v61  ;;  %v3436_v61 = vld [vmem:[%s4990_s1 + $0x6c] sm:$0xf]  ;;  %v3067_v63 = vor.u32 %v3500_v58, %v3064_v60 }
 0x146   : > { %v1463_v4 = vadd.f32 %v1462_v3, %v1414_v2  ;;  %v3532_v2 = vld [vmem:[%s4990_s1 + $0x36c] sm:$0xf]  ;;  %v3192_v3 = vld [vmem:[%s4990_s1 + $0x378] sm:$0xf0]  ;;  %v2811_v5 = vor.u32 %v3436_v61, %v2808_v0 }
 0x147   : > { %v1994_v55 = vmax.f32 %v1559_v37, 0.0  ;;  %v3195_v6 = vor.u32 %v3532_v2, %v3192_v3  ;;  %1891 = vmatpush.bf16.msrb.mxu2 %v3067_v63 }
 0x148   : > { %1793 = vmatpush.bf16.msrb.mxu0 %v2811_v5 }
 0x149   : > { %1940 = vmatpush.bf16.msrb.mxu3 %v3195_v6  ;;  %v3496_v6 = vld [vmem:[%s4990_s1 + $0x24c] sm:$0xf] }
 0x14a   : > { %v1511_v16 = vpop.f32.mrf.mxu2 }
 0x14b   : > { %v1512_v19 = vadd.f32 %v1511_v16, %v1463_v4  ;;  %v1560_v29 = vpop.f32.mrf.mxu3  ;;  %v1416_v31 = vpop.f32.mrf.mxu0 }
 0x14c   : > { %v1417_v32 = vadd.f32 %v1416_v31, %v4504_v36  ;;  %v1465_v34 = vpop.f32.mrf.mxu1 }
 0x14d   : > { %v1561_v38 = vadd.f32 %v1560_v29, %v1512_v19 }
 0x14e   : > { %v1466_v39 = vadd.f32 %v1465_v34, %v1417_v32  ;;  %1611 = vmatmul.bf16.gmra.mxu0 %v3985_v49  ;;  %1660 = vmatmul.bf16.gmra.mxu1 %v3987_v50 }
 0x14f   : > { %v1998_v56 = vmax.f32 %v1561_v38, 0.0  ;;  %1709 = vmatmul.bf16.gmra.mxu2 %v3989_v51  ;;  %v3468_v38 = vld [vmem:[%s4990_s1 + $0x16c] sm:$0xf] }
 0x150   : > { %1758 = vmatmul.bf16.gmra.mxu3 %v3991_v52 }
 0x151   : > { %v4593_v37 = vpack.c.bf16 %v1998_v56, %v1994_v55  ;;  %v2936_v55 = vld [vmem:[%s4990_s1 + $0x178] sm:$0xf0] }
 0x152   : > { %v1514_v4 = vpop.f32.mrf.mxu2  ;;  %v2939_v56 = vor.u32 %v3468_v38, %v2936_v55 }
 0x153   : > { %v1515_v17 = vadd.f32 %v1514_v4, %v1466_v39  ;;  %v1563_v16 = vpop.f32.mrf.mxu3  ;;  %v1418_v19 = vpop.f32.mrf.mxu0 }
 0x154   : > { %v1419_v29 = vadd.f32 %v1418_v19, %v4504_v36  ;;  %v1467_v31 = vpop.f32.mrf.mxu1  ;;  %1842 = vmatpush.bf16.msrb.mxu1 %v2939_v56 }
 0x155   : > { %v1564_v32 = vadd.f32 %v1563_v16, %v1515_v17  ;;  %v3048_v17 = vld [vmem:[%s4990_s1 + $0x258] sm:$0xf0]  ;;  %v3432_v16 = vld [vmem:[%s4990_s1 + $0x4c] sm:$0xf] }
 0x156   : > { %v1468_v34 = vadd.f32 %v1467_v31, %v1419_v29  ;;  %v3051_v19 = vor.u32 %v3496_v6, %v3048_v17  ;;  %v2792_v29 = vld [vmem:[%s4990_s1 + $0x58] sm:$0xf0]  ;;  %v3528_v31 = vld [vmem:[%s4990_s1 + $0x34c] sm:$0xf] }
 0x157   : > { %v2002_v4 = vmax.f32 %v1564_v32, 0.0  ;;  %v3176_v32 = vld [vmem:[%s4990_s1 + $0x358] sm:$0xf0]  ;;  %v2795_v55 = vor.u32 %v3432_v16, %v2792_v29  ;;  %v3464_v6 = vld [vmem:[%s4990_s1 + $0x14c] sm:$0xf] }
 0x158   : > { %v3179_v56 = vor.u32 %v3528_v31, %v3176_v32  ;;  %1892 = vmatpush.bf16.msrb.mxu2 %v3051_v19 }
 0x159   : > { %1794 = vmatpush.bf16.msrb.mxu0 %v2795_v55 }
 0x15a   : > { %v1516_v39 = vpop.f32.mrf.mxu2  ;;  %1941 = vmatpush.bf16.msrb.mxu3 %v3179_v56 }
 0x15b   : > { %v1517_v58 = vadd.f32 %v1516_v39, %v1468_v34  ;;  %v1565_v60 = vpop.f32.mrf.mxu3  ;;  %v1421_v61 = vpop.f32.mrf.mxu0 }
 0x15c   : > { %v1422_v63 = vadd.f32 %v1421_v61, %v4504_v36  ;;  %v1470_v0 = vpop.f32.mrf.mxu1 }
 0x15d   : > { %v1566_v2 = vadd.f32 %v1565_v60, %v1517_v58 }
 0x15e   : > { %v1471_v3 = vadd.f32 %v1470_v0, %v1422_v63  ;;  %1616 = vmatmul.bf16.gmra.mxu0 %v4029_v12  ;;  %1665 = vmatmul.bf16.gmra.mxu1 %v4031_v13 }
 0x15f   : > { %v2006_v5 = vmax.f32 %v1566_v2, 0.0  ;;  %1714 = vmatmul.bf16.gmra.mxu2 %v4033_v14 }
 0x160   : > { %1763 = vmatmul.bf16.gmra.mxu3 %v4035_v15 }
 0x161   : > { %v4625_v34 = vpack.c.bf16 %v2006_v5, %v2002_v4  ;;  %v2920_v4 = vld [vmem:[%s4990_s1 + $0x158] sm:$0xf0] }
 0x162   : > { %v1519_v38 = vpop.f32.mrf.mxu2  ;;  %v2923_v5 = vor.u32 %v3464_v6, %v2920_v4 }
 0x163   : > { %v1520_v39 = vadd.f32 %v1519_v38, %v1471_v3  ;;  %v1568_v58 = vpop.f32.mrf.mxu3  ;;  %v1423_v60 = vpop.f32.mrf.mxu0 }
 0x164   : > { %v1424_v61 = vadd.f32 %v1423_v60, %v4504_v36  ;;  %v1472_v63 = vpop.f32.mrf.mxu1  ;;  %1843 = vmatpush.bf16.msrb.mxu1 %v2923_v5  ;;  %v3428_v60 = vld [vmem:[%s4990_s1 + $0x2c] sm:$0xf] }
 0x165   : > { %v1569_v0 = vadd.f32 %v1568_v58, %v1520_v39  ;;  %v3492_v39 = vld [vmem:[%s4990_s1 + $0x22c] sm:$0xf]  ;;  %v3032_v58 = vld [vmem:[%s4990_s1 + $0x238] sm:$0xf0] }
 0x166   : > { %v1473_v2 = vadd.f32 %v1472_v63, %v1424_v61  ;;  %v3035_v61 = vor.u32 %v3492_v39, %v3032_v58  ;;  %v2776_v63 = vld [vmem:[%s4990_s1 + $0x38] sm:$0xf0]  ;;  %v3460_v58 = vld [vmem:[%s4990_s1 + $0x12c] sm:$0xf] }
 0x167   : > { %v2010_v55 = vmax.f32 %v1569_v0, 0.0  ;;  %v3524_v0 = vld [vmem:[%s4990_s1 + $0x32c] sm:$0xf]  ;;  %v2779_v5 = vor.u32 %v3428_v60, %v2776_v63 }
 0x168   : > { %1893 = vmatpush.bf16.msrb.mxu2 %v3035_v61 }
 0x169   : > { %1795 = vmatpush.bf16.msrb.mxu0 %v2779_v5 }
 0x16a   : > { %v1521_v3 = vpop.f32.mrf.mxu2 }
 0x16b   : > { %v1522_v17 = vadd.f32 %v1521_v3, %v1473_v2  ;;  %v1570_v16 = vpop.f32.mrf.mxu3  ;;  %v1426_v19 = vpop.f32.mrf.mxu0  ;;  %v3160_v2 = vld [vmem:[%s4990_s1 + $0x338] sm:$0xf0] }
 0x16c   : > { %v1427_v29 = vadd.f32 %v1426_v19, %v4504_v36  ;;  %v1475_v31 = vpop.f32.mrf.mxu1  ;;  %v3163_v3 = vor.u32 %v3524_v0, %v3160_v2 }
 0x16d   : > { %v1571_v32 = vadd.f32 %v1570_v16, %v1522_v17 }
 0x16e   : > { %v1476_v38 = vadd.f32 %v1475_v31, %v1427_v29  ;;  %1621 = vmatmul.bf16.gmra.mxu0 %v4073_v40  ;;  %1670 = vmatmul.bf16.gmra.mxu1 %v4075_v41 }
 0x16f   : > { %v2014_v56 = vmax.f32 %v1571_v32, 0.0  ;;  %1719 = vmatmul.bf16.gmra.mxu2 %v4077_v42  ;;  %1942 = vmatpush.bf16.msrb.mxu3 %v3163_v3 }
 0x170   : > { %1768 = vmatmul.bf16.gmra.mxu3 %v4079_v43 }
 0x171   : > { %v4657_v6 = vpack.c.bf16 %v2014_v56, %v2010_v55  ;;  %v2904_v55 = vld [vmem:[%s4990_s1 + $0x138] sm:$0xf0] }
 0x172   : > { %v1524_v4 = vpop.f32.mrf.mxu2  ;;  %v2907_v56 = vor.u32 %v3460_v58, %v2904_v55  ;;  %v3144_v58 = vld [vmem:[%s4990_s1 + $0x318] sm:$0xf0] }
 0x173   : > { %v1525_v17 = vadd.f32 %v1524_v4, %v1476_v38  ;;  %v1573_v16 = vpop.f32.mrf.mxu3  ;;  %v1428_v19 = vpop.f32.mrf.mxu0 }
 0x174   : > { %v1429_v29 = vadd.f32 %v1428_v19, %v4504_v36  ;;  %v1477_v31 = vpop.f32.mrf.mxu1  ;;  %1844 = vmatpush.bf16.msrb.mxu1 %v2907_v56  ;;  %v3016_v19 = vld [vmem:[%s4990_s1 + $0x218] sm:$0xf0] }
 0x175   : > { %v1574_v32 = vadd.f32 %v1573_v16, %v1525_v17  ;;  %v3488_v16 = vld [vmem:[%s4990_s1 + $0x20c] sm:$0xf] }
 0x176   : > { %v1478_v39 = vadd.f32 %v1477_v31, %v1429_v29  ;;  %v3424_v29 = vld [vmem:[%s4990_s1 + $0xc] sm:$0xf]  ;;  %v3019_v31 = vor.u32 %v3488_v16, %v3016_v19 }
 0x177   : > { %v2018_v3 = vmax.f32 %v1574_v32, 0.0  ;;  %v2760_v32 = vld [vmem:[%s4990_s1 + $0x18] sm:$0xf0] }
 0x178   : > { %1894 = vmatpush.bf16.msrb.mxu2 %v3019_v31 }
 0x17a   : > { %v1526_v38 = vpop.f32.mrf.mxu2 }
 0x17b   : > { %v1527_v60 = vadd.f32 %v1526_v38, %v1478_v39  ;;  %v1575_v61 = vpop.f32.mrf.mxu3  ;;  %v1431_v63 = vpop.f32.mrf.mxu0  ;;  %v3520_v39 = vld [vmem:[%s4990_s1 + $0x30c] sm:$0xf]  ;;  %v2763_v38 = vor.u32 %v3424_v29, %v2760_v32 }
 0x17c   : > { %v1432_v0 = vadd.f32 %v1431_v63, %v4504_v36  ;;  %v1480_v2 = vpop.f32.mrf.mxu1 }
 0x17d   : > { %v1576_v4 = vadd.f32 %v1575_v61, %v1527_v60  ;;  %v3147_v60 = vor.u32 %v3520_v39, %v3144_v58  ;;  %1796 = vmatpush.bf16.msrb.mxu0 %v2763_v38 }
 0x17e   : > { %v1481_v5 = vadd.f32 %v1480_v2, %v1432_v0  ;;  %1626 = vmatmul.bf16.gmra.mxu0 %v4117_v8  ;;  %1675 = vmatmul.bf16.gmra.mxu1 %v4119_v9 }
 0x17f   : > { %v2022_v17 = vmax.f32 %v1576_v4, 0.0  ;;  %1724 = vmatmul.bf16.gmra.mxu2 %v4121_v10  ;;  %1943 = vmatpush.bf16.msrb.mxu3 %v3147_v60 }
 0x180   : > { %1773 = vmatmul.bf16.gmra.mxu3 %v4123_v11 }
 0x181   : > { %v4689_v55 = vpack.c.bf16 %v2022_v17, %v2018_v3  ;;  %v2888_v3 = vld [vmem:[%s4990_s1 + $0x118] sm:$0xf0] }
 0x182   : > { %v1529_v56 = vpop.f32.mrf.mxu2  ;;  %v2891_v17 = vor.u32 %v3456_v28, %v2888_v3 }
 0x183   : > { %v1530_v61 = vadd.f32 %v1529_v56, %v1481_v5  ;;  %v1578_v63 = vpop.f32.mrf.mxu3  ;;  %v1433_v0 = vpop.f32.mrf.mxu0 }
 0x184   : > { %v1434_v2 = vadd.f32 %v1433_v0, %v4504_v36  ;;  %v1482_v4 = vpop.f32.mrf.mxu1  ;;  %1845 = vmatpush.bf16.msrb.mxu1 %v2891_v17 }
 0x185   : > { %v1579_v16 = vadd.f32 %v1578_v63, %v1530_v61 }
 0x186   : > { %v1483_v19 = vadd.f32 %v1482_v4, %v1434_v2 }
 0x187   : > { %v2026_v60 = vmax.f32 %v1579_v16, 0.0 }
 0x18a   : > { %v1531_v5 = vpop.f32.mrf.mxu2 }
 0x18b   : > { %v1532_v29 = vadd.f32 %v1531_v5, %v1483_v19  ;;  %v1580_v31 = vpop.f32.mrf.mxu3  ;;  %v1436_v32 = vpop.f32.mrf.mxu0 }
 0x18c   : > { %v1437_v39 = vadd.f32 %v1436_v32, %v4504_v36  ;;  %v1485_v58 = vpop.f32.mrf.mxu1 }
 0x18d   : > { %v1581_v56 = vadd.f32 %v1580_v31, %v1532_v29 }
 0x18e   : > { %v1486_v38 = vadd.f32 %v1485_v58, %v1437_v39  ;;  %1631 = vmatmul.bf16.gmra.mxu0 %v4161_v44  ;;  %1680 = vmatmul.bf16.gmra.mxu1 %v4163_v45 }
 0x18f   : > { %v2030_v61 = vmax.f32 %v1581_v56, 0.0  ;;  %1729 = vmatmul.bf16.gmra.mxu2 %v4165_v46 }
 0x190   : > { %1778 = vmatmul.bf16.gmra.mxu3 %v4167_v47 }
 0x191   : > { %v4703_v28 = vpack.c.bf16 %v2030_v61, %v2026_v60  ;;  %v3574_v61 = vld [vmem:[%s4992_s3 + $0xb8] sm:$0xff] }
 0x192   : > { %v1534_v63 = vpop.f32.mrf.mxu2  ;;  %2439 = vmatpush.bf16.msra.mxu2 %v3574_v61 }
 0x193   : > { %v1535_v0 = vadd.f32 %v1534_v63, %v1486_v38  ;;  %v1583_v2 = vpop.f32.mrf.mxu3  ;;  %v1438_v4 = vpop.f32.mrf.mxu0 }
 0x194   : > { %v1439_v19 = vadd.f32 %v1438_v4, %v4504_v36  ;;  %v1487_v3 = vpop.f32.mrf.mxu1 }
 0x195   : > { %v1584_v17 = vadd.f32 %v1583_v2, %v1535_v0 }
 0x196   : > { %v1488_v5 = vadd.f32 %v1487_v3, %v1439_v19 }
 0x197   : > { %v2034_v60 = vmax.f32 %v1584_v17, 0.0 }
 0x19a   : > { %v1536_v29 = vpop.f32.mrf.mxu2 }
 0x19b   : > { %v1537_v16 = vadd.f32 %v1536_v29, %v1488_v5  ;;  %v1585_v31 = vpop.f32.mrf.mxu3  ;;  %v1441_v32 = vpop.f32.mrf.mxu0 }
 0x19c   : > { %v1442_v39 = vadd.f32 %v1441_v32, %v4504_v36  ;;  %v1490_v58 = vpop.f32.mrf.mxu1  ;;  %v4729_v32 = vld [vmem:[%s4991_s2] sm:$0xf] }
 0x19d   : > { %v1586_v56 = vadd.f32 %v1585_v31, %v1537_v16  ;;  %v3558_v16 = vld [vmem:[%s4992_s3 + $0x38] sm:$0xff] }
 0x19e   : > { %v1491_v62 = vadd.f32 %v1490_v58, %v1442_v39  ;;  %1636 = vmatmul.bf16.gmra.mxu0 %v4205_v20  ;;  %1685 = vmatmul.bf16.gmra.mxu1 %v4207_v21  ;;  %v3582_v31 = vld [vmem:[%s4992_s3 + $0xf8] sm:$0xff] }
 0x19f   : > { %v2038_v38 = vmax.f32 %v1586_v56, 0.0  ;;  %1734 = vmatmul.bf16.gmra.mxu2 %v4209_v22  ;;  %2341 = vmatpush.bf16.msra.mxu0 %v3558_v16 }
 0x1a0   : > { %1783 = vmatmul.bf16.gmra.mxu3 %v4211_v23 }
 0x1a1   : > { %v4714_v63 = vpack.c.bf16 %v2038_v38, %v2034_v60  ;;  %2488 = vmatpush.bf16.msra.mxu3 %v3582_v31 }
 0x1a2   : > { %v1539_v0 = vpop.f32.mrf.mxu2 }
 0x1a3   : > { %v1540_v2 = vadd.f32 %v1539_v0, %v1491_v62  ;;  %v1588_v4 = vpop.f32.mrf.mxu3  ;;  %v1443_v19 = vpop.f32.mrf.mxu0  ;;  %v3566_v62 = vld [vmem:[%s4992_s3 + $0x78] sm:$0xff] }
 0x1a4   : > { %v1444_v3 = vadd.f32 %v1443_v19, %v4504_v36  ;;  %v1492_v17 = vpop.f32.mrf.mxu1  ;;  %v4732_v36 = vperm.slane %v4729_v32, 2  ;;  %2390 = vmatpush.bf16.msra.mxu1 %v3566_v62 }
 0x1a5   : > { %v1589_v5 = vadd.f32 %v1588_v4, %v1540_v2 }
 0x1a6   : > { %v1493_v29 = vadd.f32 %v1492_v17, %v1444_v3  ;;  %v3573_v3 = vld [vmem:[%s4992_s3 + $0xb0] sm:$0xff] }
 0x1a7   : > { %v2042_v4 = vmax.f32 %v1589_v5, 0.0  ;;  %2440 = vmatpush.bf16.msra.mxu2 %v3573_v3 }
 0x1aa   : > { %v1541_v39 = vpop.f32.mrf.mxu2 }
 0x1ab   : > { %v1542_v58 = vadd.f32 %v1541_v39, %v1493_v29  ;;  %v1590_v56 = vpop.f32.mrf.mxu3  ;;  %v1602_v60 = vpop.f32.mrf.mxu0 }
 0x1ac   : > { %v1603_v38 = vadd.f32 %v1602_v60, %v4732_v36  ;;  %v1651_v61 = vpop.f32.mrf.mxu1 }
 0x1ad   : > { %v1591_v0 = vadd.f32 %v1590_v56, %v1542_v58  ;;  %v3565_v58 = vld [vmem:[%s4992_s3 + $0x70] sm:$0xff] }
 0x1ae   : > { %v1652_v2 = vadd.f32 %v1651_v61, %v1603_v38  ;;  %1797 = vmatmul.bf16.vlgmr.msrb.gmra.mxu0 %v3874_v48  ;;  %1846 = vmatmul.bf16.vlgmr.msrb.gmra.mxu1 %v3881_v53 }
 0x1af   : > { %v2046_v19 = vmax.f32 %v1591_v0, 0.0  ;;  %1895 = vmatmul.bf16.vlgmr.msrb.gmra.mxu2 %v3883_v54  ;;  %v3557_v54 = vld [vmem:[%s4992_s3 + $0x30] sm:$0xff]  ;;  %2391 = vmatpush.bf16.msra.mxu1 %v3565_v58 }
 0x1b0   : > { %1944 = vmatmul.bf16.vlgmr.msrb.gmra.mxu3 %v3891_v57  ;;  %v3581_v57 = vld [vmem:[%s4992_s3 + $0xf0] sm:$0xff]  ;;  %2342 = vmatpush.bf16.msra.mxu0 %v3557_v54 }
 0x1b1   : > { %v4742_v17 = vpack.c.bf16 %v2046_v19, %v2042_v4  ;;  %2489 = vmatpush.bf16.msra.mxu3 %v3581_v57  ;;  %v3564_v57 = vld [vmem:[%s4992_s3 + $0x68] sm:$0xff] }
 0x1b2   : > { %v1700_v29 = vpop.f32.mrf.mxu2 }
 0x1b3   : > { %v1701_v16 = vadd.f32 %v1700_v29, %v1652_v2  ;;  %v1749_v31 = vpop.f32.mrf.mxu3  ;;  %v1604_v62 = vpop.f32.mrf.mxu0  ;;  %2392 = vmatpush.bf16.msra.mxu1 %v3564_v57 }
 0x1b4   : > { %v1605_v48 = vadd.f32 %v1604_v62, %v4732_v36  ;;  %v1653_v5 = vpop.f32.mrf.mxu1 }
 0x1b5   : > { %v1750_v39 = vadd.f32 %v1749_v31, %v1701_v16  ;;  %v3572_v16 = vld [vmem:[%s4992_s3 + $0xa8] sm:$0xff] }
 0x1b6   : > { %v1654_v53 = vadd.f32 %v1653_v5, %v1605_v48  ;;  %2441 = vmatpush.bf16.msra.mxu2 %v3572_v16 }
 0x1b7   : > { %v1987_v3 = vmax.f32 %v1750_v39, 0.0 }
 0x1ba   : > { %v1702_v56 = vpop.f32.mrf.mxu2 }
 0x1bb   : > { %v1703_v60 = vadd.f32 %v1702_v56, %v1654_v53  ;;  %v1751_v38 = vpop.f32.mrf.mxu3  ;;  %v1607_v61 = vpop.f32.mrf.mxu0 }
 0x1bc   : > { %v1608_v0 = vadd.f32 %v1607_v61, %v4732_v36  ;;  %v1656_v2 = vpop.f32.mrf.mxu1 }
 0x1bd   : > { %v1752_v4 = vadd.f32 %v1751_v38, %v1703_v60 }
 0x1be   : > { %v1657_v19 = vadd.f32 %v1656_v2, %v1608_v0  ;;  %1802 = vmatmul.bf16.gmra.mxu0 %v3941_v24  ;;  %1851 = vmatmul.bf16.gmra.mxu1 %v3943_v25 }
 0x1bf   : > { %v1991_v29 = vmax.f32 %v1752_v4, 0.0  ;;  %1900 = vmatmul.bf16.gmra.mxu2 %v3945_v26  ;;  %v3556_v26 = vld [vmem:[%s4992_s3 + $0x28] sm:$0xff] }
 0x1c0   : > { %1949 = vmatmul.bf16.gmra.mxu3 %v3947_v27  ;;  %v3580_v27 = vld [vmem:[%s4992_s3 + $0xe8] sm:$0xff]  ;;  %2343 = vmatpush.bf16.msra.mxu0 %v3556_v26 }
 0x1c1   : > { %v4762_v31 = vpack.c.bf16 %v1991_v29, %v1987_v3  ;;  %2490 = vmatpush.bf16.msra.mxu3 %v3580_v27  ;;  %v3571_v29 = vld [vmem:[%s4992_s3 + $0xa0] sm:$0xff] }
 0x1c2   : > { %v1705_v62 = vpop.f32.mrf.mxu2  ;;  %2442 = vmatpush.bf16.msra.mxu2 %v3571_v29 }
 0x1c3   : > { %v1706_v48 = vadd.f32 %v1705_v62, %v1657_v19  ;;  %v1754_v5 = vpop.f32.mrf.mxu3  ;;  %v1609_v53 = vpop.f32.mrf.mxu0 }
 0x1c4   : > { %v1610_v24 = vadd.f32 %v1609_v53, %v4732_v36  ;;  %v1658_v39 = vpop.f32.mrf.mxu1 }
 0x1c5   : > { %v1755_v54 = vadd.f32 %v1754_v5, %v1706_v48 }
 0x1c6   : > { %v1659_v25 = vadd.f32 %v1658_v39, %v1610_v24 }
 0x1c7   : > { %v1995_v19 = vmax.f32 %v1755_v54, 0.0  ;;  %v3563_v54 = vld [vmem:[%s4992_s3 + $0x60] sm:$0xff] }
 0x1c8   : > { %2393 = vmatpush.bf16.msra.mxu1 %v3563_v54 }
 0x1ca   : > { %v1707_v58 = vpop.f32.mrf.mxu2 }
 0x1cb   : > { %v1708_v56 = vadd.f32 %v1707_v58, %v1659_v25  ;;  %v1756_v60 = vpop.f32.mrf.mxu3  ;;  %v1612_v38 = vpop.f32.mrf.mxu0 }
 0x1cc   : > { %v1613_v61 = vadd.f32 %v1612_v38, %v4732_v36  ;;  %v1661_v0 = vpop.f32.mrf.mxu1 }
 0x1cd   : > { %v1757_v2 = vadd.f32 %v1756_v60, %v1708_v56 }
 0x1ce   : > { %v1662_v4 = vadd.f32 %v1661_v0, %v1613_v61  ;;  %1807 = vmatmul.bf16.gmra.mxu0 %v3985_v49  ;;  %1856 = vmatmul.bf16.gmra.mxu1 %v3987_v50 }
 0x1cf   : > { %v1999_v3 = vmax.f32 %v1757_v2, 0.0  ;;  %1905 = vmatmul.bf16.gmra.mxu2 %v3989_v51  ;;  %v3555_v51 = vld [vmem:[%s4992_s3 + $0x20] sm:$0xff]  ;;  %v3570_v2 = vld [vmem:[%s4992_s3 + $0x98] sm:$0xff] }
 0x1d0   : > { %1954 = vmatmul.bf16.gmra.mxu3 %v3991_v52  ;;  %v3579_v52 = vld [vmem:[%s4992_s3 + $0xe0] sm:$0xff]  ;;  %2344 = vmatpush.bf16.msra.mxu0 %v3555_v51 }
 0x1d1   : > { %v4782_v16 = vpack.c.bf16 %v1999_v3, %v1995_v19  ;;  %2491 = vmatpush.bf16.msra.mxu3 %v3579_v52  ;;  %2443 = vmatpush.bf16.msra.mxu2 %v3570_v2 }
 0x1d2   : > { %v1710_v62 = vpop.f32.mrf.mxu2 }
 0x1d3   : > { %v1711_v48 = vadd.f32 %v1710_v62, %v1662_v4  ;;  %v1759_v5 = vpop.f32.mrf.mxu3  ;;  %v1614_v53 = vpop.f32.mrf.mxu0 }
 0x1d4   : > { %v1615_v49 = vadd.f32 %v1614_v53, %v4732_v36  ;;  %v1663_v24 = vpop.f32.mrf.mxu1  ;;  %v3562_v53 = vld [vmem:[%s4992_s3 + $0x58] sm:$0xff] }
 0x1d5   : > { %v1760_v39 = vadd.f32 %v1759_v5, %v1711_v48  ;;  %2394 = vmatpush.bf16.msra.mxu1 %v3562_v53 }
 0x1d6   : > { %v1664_v50 = vadd.f32 %v1663_v24, %v1615_v49 }
 0x1d7   : > { %v2003_v61 = vmax.f32 %v1760_v39, 0.0 }
 0x1da   : > { %v1712_v25 = vpop.f32.mrf.mxu2 }
 0x1db   : > { %v1713_v26 = vadd.f32 %v1712_v25, %v1664_v50  ;;  %v1761_v27 = vpop.f32.mrf.mxu3  ;;  %v1617_v57 = vpop.f32.mrf.mxu0 }
 0x1dc   : > { %v1618_v58 = vadd.f32 %v1617_v57, %v4732_v36  ;;  %v1666_v56 = vpop.f32.mrf.mxu1  ;;  %v3569_v57 = vld [vmem:[%s4992_s3 + $0x90] sm:$0xff] }
 0x1dd   : > { %v1762_v60 = vadd.f32 %v1761_v27, %v1713_v26  ;;  %2444 = vmatpush.bf16.msra.mxu2 %v3569_v57 }
 0x1de   : > { %v1667_v38 = vadd.f32 %v1666_v56, %v1618_v58  ;;  %1812 = vmatmul.bf16.gmra.mxu0 %v4029_v12  ;;  %1861 = vmatmul.bf16.gmra.mxu1 %v4031_v13 }
 0x1df   : > { %v2007_v0 = vmax.f32 %v1762_v60, 0.0  ;;  %1910 = vmatmul.bf16.gmra.mxu2 %v4033_v14  ;;  %v3554_v14 = vld [vmem:[%s4992_s3 + $0x18] sm:$0xff] }
 0x1e0   : > { %1959 = vmatmul.bf16.gmra.mxu3 %v4035_v15  ;;  %v3578_v15 = vld [vmem:[%s4992_s3 + $0xd8] sm:$0xff]  ;;  %2345 = vmatpush.bf16.msra.mxu0 %v3554_v14 }
 0x1e1   : > { %v4802_v4 = vpack.c.bf16 %v2007_v0, %v2003_v61  ;;  %2492 = vmatpush.bf16.msra.mxu3 %v3578_v15 }
 0x1e2   : > { %v1715_v19 = vpop.f32.mrf.mxu2 }
 0x1e3   : > { %v1716_v3 = vadd.f32 %v1715_v19, %v1667_v38  ;;  %v1764_v29 = vpop.f32.mrf.mxu3  ;;  %v1619_v62 = vpop.f32.mrf.mxu0  ;;  %v3561_v19 = vld [vmem:[%s4992_s3 + $0x50] sm:$0xff] }
 0x1e4   : > { %v1620_v12 = vadd.f32 %v1619_v62, %v4732_v36  ;;  %v1668_v48 = vpop.f32.mrf.mxu1  ;;  %2395 = vmatpush.bf16.msra.mxu1 %v3561_v19 }
 0x1e5   : > { %v1765_v5 = vadd.f32 %v1764_v29, %v1716_v3 }
 0x1e6   : > { %v1669_v13 = vadd.f32 %v1668_v48, %v1620_v12 }
 0x1e7   : > { %v2011_v26 = vmax.f32 %v1765_v5, 0.0 }
 0x1ea   : > { %v1717_v49 = vpop.f32.mrf.mxu2 }
 0x1eb   : > { %v1718_v24 = vadd.f32 %v1717_v49, %v1669_v13  ;;  %v1766_v39 = vpop.f32.mrf.mxu3  ;;  %v1622_v50 = vpop.f32.mrf.mxu0  ;;  %v3568_v49 = vld [vmem:[%s4992_s3 + $0x88] sm:$0xff] }
 0x1ec   : > { %v1623_v51 = vadd.f32 %v1622_v50, %v4732_v36  ;;  %v1671_v52 = vpop.f32.mrf.mxu1  ;;  %2445 = vmatpush.bf16.msra.mxu2 %v3568_v49 }
 0x1ed   : > { %v1767_v54 = vadd.f32 %v1766_v39, %v1718_v24 }
 0x1ee   : > { %v1672_v25 = vadd.f32 %v1671_v52, %v1623_v51  ;;  %1817 = vmatmul.bf16.gmra.mxu0 %v4073_v40  ;;  %1866 = vmatmul.bf16.gmra.mxu1 %v4075_v41 }
 0x1ef   : > { %v2015_v27 = vmax.f32 %v1767_v54, 0.0  ;;  %1915 = vmatmul.bf16.gmra.mxu2 %v4077_v42  ;;  %v3553_v42 = vld [vmem:[%s4992_s3 + $0x10] sm:$0xff] }
 0x1f0   : > { %1964 = vmatmul.bf16.gmra.mxu3 %v4079_v43  ;;  %v3577_v43 = vld [vmem:[%s4992_s3 + $0xd0] sm:$0xff]  ;;  %2346 = vmatpush.bf16.msra.mxu0 %v3553_v42 }
 0x1f1   : > { %v4822_v58 = vpack.c.bf16 %v2015_v27, %v2011_v26  ;;  %2493 = vmatpush.bf16.msra.mxu3 %v3577_v43  ;;  %v3560_v26 = vld [vmem:[%s4992_s3 + $0x48] sm:$0xff] }
 0x1f2   : > { %v1720_v56 = vpop.f32.mrf.mxu2  ;;  %2396 = vmatpush.bf16.msra.mxu1 %v3560_v26 }
 0x1f3   : > { %v1721_v60 = vadd.f32 %v1720_v56, %v1672_v25  ;;  %v1769_v38 = vpop.f32.mrf.mxu3  ;;  %v1624_v61 = vpop.f32.mrf.mxu0 }
 0x1f4   : > { %v1625_v40 = vadd.f32 %v1624_v61, %v4732_v36  ;;  %v1673_v0 = vpop.f32.mrf.mxu1  ;;  %v3559_v61 = vld [vmem:[%s4992_s3 + $0x40] sm:$0xff] }
 0x1f5   : > { %v1770_v2 = vadd.f32 %v1769_v38, %v1721_v60  ;;  %v3551_v38 = vld [vmem:[%s4992_s3] sm:$0xff] }
 0x1f6   : > { %v1674_v41 = vadd.f32 %v1673_v0, %v1625_v40  ;;  %v3567_v40 = vld [vmem:[%s4992_s3 + $0x80] sm:$0xff]  ;;  %2397 = vmatpush.bf16.msra.mxu1 %v3559_v61 }
 0x1f7   : > { %v2019_v15 = vmax.f32 %v1770_v2, 0.0  ;;  %2446 = vmatpush.bf16.msra.mxu2 %v3567_v40 }
 0x1fa   : > { %v1722_v3 = vpop.f32.mrf.mxu2 }
 0x1fb   : > { %v1723_v29 = vadd.f32 %v1722_v3, %v1674_v41  ;;  %v1771_v62 = vpop.f32.mrf.mxu3  ;;  %v1627_v12 = vpop.f32.mrf.mxu0 }
 0x1fc   : > { %v1628_v48 = vadd.f32 %v1627_v12, %v4732_v36  ;;  %v1676_v5 = vpop.f32.mrf.mxu1 }
 0x1fd   : > { %v1772_v13 = vadd.f32 %v1771_v62, %v1723_v29 }
 0x1fe   : > { %v1677_v14 = vadd.f32 %v1676_v5, %v1628_v48  ;;  %1822 = vmatmul.bf16.gmra.mxu0 %v4117_v8  ;;  %1871 = vmatmul.bf16.gmra.mxu1 %v4119_v9 }
 0x1ff   : > { %v2023_v53 = vmax.f32 %v1772_v13, 0.0  ;;  %1920 = vmatmul.bf16.gmra.mxu2 %v4121_v10  ;;  %v3552_v10 = vld [vmem:[%s4992_s3 + $0x8] sm:$0xff] }
 0x200   : > { %1969 = vmatmul.bf16.gmra.mxu3 %v4123_v11  ;;  %v3576_v11 = vld [vmem:[%s4992_s3 + $0xc8] sm:$0xff]  ;;  %2347 = vmatpush.bf16.msra.mxu0 %v3552_v10 }
 0x201   : > { %v4842_v24 = vpack.c.bf16 %v2023_v53, %v2019_v15  ;;  %2494 = vmatpush.bf16.msra.mxu3 %v3576_v11  ;;  %v3575_v15 = vld [vmem:[%s4992_s3 + $0xc0] sm:$0xff] }
 0x202   : > { %v1725_v39 = vpop.f32.mrf.mxu2 }
 0x203   : > { %v1726_v50 = vadd.f32 %v1725_v39, %v1677_v14  ;;  %v1774_v51 = vpop.f32.mrf.mxu3  ;;  %v1629_v52 = vpop.f32.mrf.mxu0 }
 0x204   : > { %v1630_v8 = vadd.f32 %v1629_v52, %v4732_v36  ;;  %v1678_v54 = vpop.f32.mrf.mxu1  ;;  %2348 = vmatpush.bf16.msra.mxu0 %v3551_v38 }
 0x205   : > { %v1775_v25 = vadd.f32 %v1774_v51, %v1726_v50  ;;  %2495 = vmatpush.bf16.msra.mxu3 %v3575_v15 }
 0x206   : > { %v1679_v9 = vadd.f32 %v1678_v54, %v1630_v8 }
 0x207   : > { %v2027_v43 = vmax.f32 %v1775_v25, 0.0 }
 0x20a   : > { %v1727_v27 = vpop.f32.mrf.mxu2 }
 0x20b   : > { %v1728_v57 = vadd.f32 %v1727_v27, %v1679_v9  ;;  %v1776_v56 = vpop.f32.mrf.mxu3  ;;  %v1632_v60 = vpop.f32.mrf.mxu0 }
 0x20c   : > { %v1633_v0 = vadd.f32 %v1632_v60, %v4732_v36  ;;  %v1681_v2 = vpop.f32.mrf.mxu1 }
 0x20d   : > { %v1777_v41 = vadd.f32 %v1776_v56, %v1728_v57 }
 0x20e   : > { %v1682_v42 = vadd.f32 %v1681_v2, %v1633_v0  ;;  %1827 = vmatmul.bf16.gmra.mxu0 %v4161_v44  ;;  %1876 = vmatmul.bf16.gmra.mxu1 %v4163_v45 }
 0x20f   : > { %v2031_v19 = vmax.f32 %v1777_v41, 0.0  ;;  %1925 = vmatmul.bf16.gmra.mxu2 %v4165_v46 }
 0x210   : > { %1974 = vmatmul.bf16.gmra.mxu3 %v4167_v47 }
 0x211   : > { %v4868_v3 = vpack.c.bf16 %v2031_v19, %v2027_v43 }
 0x212   : > { %v1730_v29 = vpop.f32.mrf.mxu2 }
 0x213   : > { %v1731_v62 = vadd.f32 %v1730_v29, %v1682_v42  ;;  %v1779_v12 = vpop.f32.mrf.mxu3  ;;  %v1634_v48 = vpop.f32.mrf.mxu0 }
 0x214   : > { %v1635_v5 = vadd.f32 %v1634_v48, %v4732_v36  ;;  %v1683_v13 = vpop.f32.mrf.mxu1 }
 0x215   : > { %v1780_v14 = vadd.f32 %v1779_v12, %v1731_v62 }
 0x216   : > { %v1684_v44 = vadd.f32 %v1683_v13, %v1635_v5 }
 0x217   : > { %v2035_v52 = vmax.f32 %v1780_v14, 0.0 }
 0x21a   : > { %v1732_v45 = vpop.f32.mrf.mxu2 }
 0x21b   : > { %v1733_v46 = vadd.f32 %v1732_v45, %v1684_v44  ;;  %v1781_v53 = vpop.f32.mrf.mxu3  ;;  %v1637_v47 = vpop.f32.mrf.mxu0 }
 0x21c   : > { %v1638_v49 = vadd.f32 %v1637_v47, %v4732_v36  ;;  %v1686_v39 = vpop.f32.mrf.mxu1 }
 0x21d   : > { %v1782_v50 = vadd.f32 %v1781_v53, %v1733_v46 }
 0x21e   : > { %v1687_v51 = vadd.f32 %v1686_v39, %v1638_v49  ;;  %1832 = vmatmul.bf16.gmra.mxu0 %v4205_v20  ;;  %1881 = vmatmul.bf16.gmra.mxu1 %v4207_v21  ;;  %v4883_v21 = vperm.slane %v4729_v32, 3 }
 0x21f   : > { %v2039_v8 = vmax.f32 %v1782_v50, 0.0  ;;  %1930 = vmatmul.bf16.gmra.mxu2 %v4209_v22 }
 0x220   : > { %1979 = vmatmul.bf16.gmra.mxu3 %v4211_v23 }
 0x221   : > { %v4879_v54 = vpack.c.bf16 %v2039_v8, %v2035_v52 }
 0x222   : > { %v1735_v25 = vpop.f32.mrf.mxu2 }
 0x223   : > { %v1736_v9 = vadd.f32 %v1735_v25, %v1687_v51  ;;  %v1784_v10 = vpop.f32.mrf.mxu3  ;;  %v1639_v11 = vpop.f32.mrf.mxu0 }
 0x224   : > { %v1640_v26 = vadd.f32 %v1639_v11, %v4732_v36  ;;  %v1688_v27 = vpop.f32.mrf.mxu1 }
 0x225   : > { %v1785_v57 = vadd.f32 %v1784_v10, %v1736_v9 }
 0x226   : > { %v1689_v56 = vadd.f32 %v1688_v27, %v1640_v26 }
 0x227   : > { %v2043_v40 = vmax.f32 %v1785_v57, 0.0 }
 0x22a   : > { %v1737_v20 = vpop.f32.mrf.mxu2 }
 0x22b   : > { %v1738_v60 = vadd.f32 %v1737_v20, %v1689_v56  ;;  %v1786_v38 = vpop.f32.mrf.mxu3  ;;  %v1798_v22 = vpop.f32.mrf.mxu0 }
 0x22c   : > { %v1847_v61 = vpop.f32.mrf.mxu1  ;;  %v1799_v2 = vadd.f32 %v1798_v22, %v4883_v21 }
 0x22d   : > { %v1787_v23 = vadd.f32 %v1786_v38, %v1738_v60 }
 0x22e   : > { %2349 = vmatmul.bf16.vlgmr.msra.gmra.mxu0 %v4293_v1  ;;  %2398 = vmatmul.bf16.vlgmr.msra.gmra.mxu1 %v4552_v33  ;;  %v1848_v42 = vadd.f32 %v1847_v61, %v1799_v2 }
 0x22f   : > { %v2047_v0 = vmax.f32 %v1787_v23, 0.0  ;;  %2447 = vmatmul.bf16.vlgmr.msra.gmra.mxu2 %v4762_v31 }
 0x231   : > { %v4889_v36 = vpack.c.bf16 %v2047_v0, %v2043_v40 }
 0x232   : > { %v1896_v41 = vpop.f32.mrf.mxu2 }
 0x233   : > { %v1945_v43 = vpop.f32.mrf.mxu3  ;;  %v1800_v32 = vpop.f32.mrf.mxu0  ;;  %v1897_v62 = vadd.f32 %v1896_v41, %v1848_v42 }
 0x234   : > { %v1849_v19 = vpop.f32.mrf.mxu1  ;;  %v1801_v29 = vadd.f32 %v1800_v32, %v4883_v21 }
 0x235   : > { %v1946_v48 = vadd.f32 %v1945_v43, %v1897_v62 }
 0x236   : > { %v1850_v12 = vadd.f32 %v1849_v19, %v1801_v29 }
 0x237   : > { %v1988_v31 = vmax.f32 %v1946_v48, 0.0 }
 0x23a   : > { %v1898_v1 = vpop.f32.mrf.mxu2 }
 0x23b   : > { %v1899_v5 = vadd.f32 %v1898_v1, %v1850_v12  ;;  %v1947_v13 = vpop.f32.mrf.mxu3  ;;  %v1803_v14 = vpop.f32.mrf.mxu0 }
 0x23c   : > { %v1852_v44 = vpop.f32.mrf.mxu1  ;;  %v1804_v45 = vadd.f32 %v1803_v14, %v4883_v21 }
 0x23d   : > { %v1948_v33 = vadd.f32 %v1947_v13, %v1899_v5 }
 0x23e   : > { %2354 = vmatmul.bf16.gmra.mxu0 %v4334_v7  ;;  %2403 = vmatmul.bf16.gmra.mxu1 %v4593_v37  ;;  %v1853_v47 = vadd.f32 %v1852_v44, %v1804_v45 }
 0x23f   : > { %v1992_v15 = vmax.f32 %v1948_v33, 0.0  ;;  %2452 = vmatmul.bf16.gmra.mxu2 %v4782_v16 }
 0x241   : > { %v2052_v46 = vpack.c.bf16 %v1992_v15, %v1988_v31 }
 0x242   : > { %v1901_v53 = vpop.f32.mrf.mxu2 }
 0x243   : > { %v1950_v49 = vpop.f32.mrf.mxu3  ;;  %2496 = vmatmul.bf16.vlgmr.msra.gmra.mxu3 %v2052_v46  ;;  %v1805_v39 = vpop.f32.mrf.mxu0  ;;  %v1902_v52 = vadd.f32 %v1901_v53, %v1853_v47 }
 0x244   : > { %v1854_v50 = vpop.f32.mrf.mxu1  ;;  %v1806_v51 = vadd.f32 %v1805_v39, %v4883_v21 }
 0x245   : > { %v1951_v25 = vadd.f32 %v1950_v49, %v1902_v52 }
 0x246   : > { %v1855_v8 = vadd.f32 %v1854_v50, %v1806_v51 }
 0x247   : > { %v1996_v16 = vmax.f32 %v1951_v25, 0.0 }
 0x24a   : > { %v1903_v7 = vpop.f32.mrf.mxu2 }
 0x24b   : > { %v1904_v9 = vadd.f32 %v1903_v7, %v1855_v8  ;;  %v1952_v10 = vpop.f32.mrf.mxu3  ;;  %v1808_v11 = vpop.f32.mrf.mxu0 }
 0x24c   : > { %v1857_v26 = vpop.f32.mrf.mxu1  ;;  %v1809_v57 = vadd.f32 %v1808_v11, %v4883_v21 }
 0x24d   : > { %v1953_v37 = vadd.f32 %v1952_v10, %v1904_v9 }
 0x24e   : > { %2359 = vmatmul.bf16.gmra.mxu0 %v4366_v18  ;;  %2408 = vmatmul.bf16.gmra.mxu1 %v4625_v34  ;;  %v1858_v60 = vadd.f32 %v1857_v26, %v1809_v57 }
 0x24f   : > { %v2000_v27 = vmax.f32 %v1953_v37, 0.0  ;;  %2457 = vmatmul.bf16.gmra.mxu2 %v4802_v4 }
 0x251   : > { %v2056_v56 = vpack.c.bf16 %v2000_v27, %v1996_v16 }
 0x252   : > { %v1906_v20 = vpop.f32.mrf.mxu2 }
 0x253   : > { %v1955_v38 = vpop.f32.mrf.mxu3  ;;  %2501 = vmatmul.bf16.gmra.mxu3 %v2056_v56  ;;  %v1810_v22 = vpop.f32.mrf.mxu0  ;;  %v1907_v40 = vadd.f32 %v1906_v20, %v1858_v60 }
 0x254   : > { %v1859_v61 = vpop.f32.mrf.mxu1  ;;  %v1811_v23 = vadd.f32 %v1810_v22, %v4883_v21 }
 0x255   : > { %v1956_v2 = vadd.f32 %v1955_v38, %v1907_v40 }
 0x256   : > { %v1860_v0 = vadd.f32 %v1859_v61, %v1811_v23 }
 0x257   : > { %v2004_v4 = vmax.f32 %v1956_v2, 0.0 }
 0x25a   : > { %v1908_v18 = vpop.f32.mrf.mxu2 }
 0x25b   : > { %v1909_v41 = vadd.f32 %v1908_v18, %v1860_v0  ;;  %v1957_v42 = vpop.f32.mrf.mxu3  ;;  %v1813_v43 = vpop.f32.mrf.mxu0 }
 0x25c   : > { %v1862_v32 = vpop.f32.mrf.mxu1  ;;  %v1814_v29 = vadd.f32 %v1813_v43, %v4883_v21 }
 0x25d   : > { %v1958_v34 = vadd.f32 %v1957_v42, %v1909_v41 }
 0x25e   : > { %2364 = vmatmul.bf16.gmra.mxu0 %v4398_v30  ;;  %2413 = vmatmul.bf16.gmra.mxu1 %v4657_v6  ;;  %v1863_v1 = vadd.f32 %v1862_v32, %v1814_v29 }
 0x25f   : > { %v2008_v19 = vmax.f32 %v1958_v34, 0.0  ;;  %2462 = vmatmul.bf16.gmra.mxu2 %v4822_v58  ;;  %v4997_v34 = vld [vmem:[#allocation2_spill] sm:$0xff] }
 0x261   : > { %v2060_v62 = vpack.c.bf16 %v2008_v19, %v2004_v4 }
 0x262   : > { %v1911_v12 = vpop.f32.mrf.mxu2 }
 0x263   : > { %v1960_v48 = vpop.f32.mrf.mxu3  ;;  %2506 = vmatmul.bf16.gmra.mxu3 %v2060_v62  ;;  %v1815_v5 = vpop.f32.mrf.mxu0  ;;  %v1912_v44 = vadd.f32 %v1911_v12, %v1863_v1 }
 0x264   : > { %v1864_v13 = vpop.f32.mrf.mxu1  ;;  %v1816_v14 = vadd.f32 %v1815_v5, %v4883_v21 }
 0x265   : > { %v1961_v31 = vadd.f32 %v1960_v48, %v1912_v44 }
 0x266   : > { %v1865_v33 = vadd.f32 %v1864_v13, %v1816_v14 }
 0x267   : > { %v2012_v58 = vmax.f32 %v1961_v31, 0.0 }
 0x26a   : > { %v1913_v30 = vpop.f32.mrf.mxu2 }
 0x26b   : > { %v1914_v15 = vadd.f32 %v1913_v30, %v1865_v33  ;;  %v1962_v45 = vpop.f32.mrf.mxu3  ;;  %v1818_v46 = vpop.f32.mrf.mxu0 }
 0x26c   : > { %v1867_v53 = vpop.f32.mrf.mxu1  ;;  %v1819_v49 = vadd.f32 %v1818_v46, %v4883_v21 }
 0x26d   : > { %v1963_v6 = vadd.f32 %v1962_v45, %v1914_v15 }
 0x26e   : > { %2369 = vmatmul.bf16.gmra.mxu0 %v4430_v35  ;;  %2418 = vmatmul.bf16.gmra.mxu1 %v4689_v55  ;;  %v1868_v51 = vadd.f32 %v1867_v53, %v1819_v49  ;;  %v4998_v53 = vld [vmem:[#allocation3_spill] sm:$0xff] }
 0x26f   : > { %v2016_v47 = vmax.f32 %v1963_v6, 0.0  ;;  %2467 = vmatmul.bf16.gmra.mxu2 %v4842_v24 }
 0x271   : > { %v2064_v39 = vpack.c.bf16 %v2016_v47, %v2012_v58 }
 0x272   : > { %v1916_v50 = vpop.f32.mrf.mxu2 }
 0x273   : > { %v1965_v52 = vpop.f32.mrf.mxu3  ;;  %2511 = vmatmul.bf16.gmra.mxu3 %v2064_v39  ;;  %v1820_v8 = vpop.f32.mrf.mxu0  ;;  %v1917_v9 = vadd.f32 %v1916_v50, %v1868_v51 }
 0x274   : > { %v1869_v7 = vpop.f32.mrf.mxu1  ;;  %v1821_v25 = vadd.f32 %v1820_v8, %v4883_v21 }
 0x275   : > { %v1966_v11 = vadd.f32 %v1965_v52, %v1917_v9 }
 0x276   : > { %v1870_v10 = vadd.f32 %v1869_v7, %v1821_v25 }
 0x277   : > { %v2020_v24 = vmax.f32 %v1966_v11, 0.0 }
 0x27a   : > { %v1918_v35 = vpop.f32.mrf.mxu2 }
 0x27b   : > { %v1919_v26 = vadd.f32 %v1918_v35, %v1870_v10  ;;  %v1967_v37 = vpop.f32.mrf.mxu3  ;;  %v1823_v16 = vpop.f32.mrf.mxu0 }
 0x27c   : > { %v1872_v27 = vpop.f32.mrf.mxu1  ;;  %v1824_v56 = vadd.f32 %v1823_v16, %v4883_v21 }
 0x27d   : > { %v1968_v55 = vadd.f32 %v1967_v37, %v1919_v26 }
 0x27e   : > { %2374 = vmatmul.bf16.gmra.mxu0 %v4462_v59  ;;  %2423 = vmatmul.bf16.gmra.mxu1 %v4703_v28  ;;  %v1873_v38 = vadd.f32 %v1872_v27, %v1824_v56 }
 0x27f   : > { %v2024_v57 = vmax.f32 %v1968_v55, 0.0  ;;  %2472 = vmatmul.bf16.gmra.mxu2 %v4868_v3 }
 0x281   : > { %v2068_v20 = vpack.c.bf16 %v2024_v57, %v2020_v24 }
 0x282   : > { %v1921_v60 = vpop.f32.mrf.mxu2 }
 0x283   : > { %v1970_v22 = vpop.f32.mrf.mxu3  ;;  %2516 = vmatmul.bf16.gmra.mxu3 %v2068_v20  ;;  %v1825_v61 = vpop.f32.mrf.mxu0  ;;  %v1922_v0 = vadd.f32 %v1921_v60, %v1873_v38 }
 0x284   : > { %v1874_v23 = vpop.f32.mrf.mxu1  ;;  %v1826_v40 = vadd.f32 %v1825_v61, %v4883_v21 }
 0x285   : > { %v1971_v2 = vadd.f32 %v1970_v22, %v1922_v0 }
 0x286   : > { %v1875_v18 = vadd.f32 %v1874_v23, %v1826_v40 }
 0x287   : > { %v2028_v3 = vmax.f32 %v1971_v2, 0.0 }
 0x28a   : > { %v1923_v59 = vpop.f32.mrf.mxu2 }
 0x28b   : > { %v1924_v41 = vadd.f32 %v1923_v59, %v1875_v18  ;;  %v1972_v42 = vpop.f32.mrf.mxu3  ;;  %v1828_v43 = vpop.f32.mrf.mxu0 }
 0x28c   : > { %v1877_v32 = vpop.f32.mrf.mxu1  ;;  %v1829_v19 = vadd.f32 %v1828_v43, %v4883_v21 }
 0x28d   : > { %v1973_v28 = vadd.f32 %v1972_v42, %v1924_v41 }
 0x28e   : > { %2379 = vmatmul.bf16.gmra.mxu0 %v4997_v34  ;;  %2428 = vmatmul.bf16.gmra.mxu1 %v4714_v63  ;;  %v1878_v12 = vadd.f32 %v1877_v32, %v1829_v19 }
 0x28f   : > { %v2032_v4 = vmax.f32 %v1973_v28, 0.0  ;;  %2477 = vmatmul.bf16.gmra.mxu2 %v4879_v54 }
 0x291   : > { %v2072_v29 = vpack.c.bf16 %v2032_v4, %v2028_v3 }
 0x292   : > { %v1926_v62 = vpop.f32.mrf.mxu2 }
 0x293   : > { %v1975_v1 = vpop.f32.mrf.mxu3  ;;  %2521 = vmatmul.bf16.gmra.mxu3 %v2072_v29  ;;  %v1830_v48 = vpop.f32.mrf.mxu0  ;;  %v1927_v14 = vadd.f32 %v1926_v62, %v1878_v12 }
 0x294   : > { %v1879_v5 = vpop.f32.mrf.mxu1  ;;  %v1831_v13 = vadd.f32 %v1830_v48, %v4883_v21 }
 0x295   : > { %v1976_v30 = vadd.f32 %v1975_v1, %v1927_v14 }
 0x296   : > { %v1880_v44 = vadd.f32 %v1879_v5, %v1831_v13 }
 0x297   : > { %v2036_v54 = vmax.f32 %v1976_v30, 0.0 }
 0x29a   : > { %v1928_v33 = vpop.f32.mrf.mxu2 }
 0x29b   : > { %v1929_v31 = vadd.f32 %v1928_v33, %v1880_v44  ;;  %v1977_v15 = vpop.f32.mrf.mxu3  ;;  %v1833_v45 = vpop.f32.mrf.mxu0 }
 0x29c   : > { %v1882_v46 = vpop.f32.mrf.mxu1  ;;  %v1834_v58 = vadd.f32 %v1833_v45, %v4883_v21 }
 0x29d   : > { %v1978_v63 = vadd.f32 %v1977_v15, %v1929_v31 }
 0x29e   : > { %2384 = vmatmul.bf16.gmra.mxu0 %v4998_v53  ;;  %2433 = vmatmul.bf16.gmra.mxu1 %v4742_v17  ;;  %v1883_v39 = vadd.f32 %v1882_v46, %v1834_v58 }
 0x29f   : > { %v2040_v6 = vmax.f32 %v1978_v63, 0.0  ;;  %2482 = vmatmul.bf16.gmra.mxu2 %v4889_v36 }
 0x2a1   : > { %v2076_v47 = vpack.c.bf16 %v2040_v6, %v2036_v54 }
 0x2a2   : > { %v1931_v49 = vpop.f32.mrf.mxu2 }
 0x2a3   : > { %v1980_v50 = vpop.f32.mrf.mxu3  ;;  %2526 = vmatmul.bf16.gmra.mxu3 %v2076_v47  ;;  %v1835_v51 = vpop.f32.mrf.mxu0  ;;  %v1932_v7 = vadd.f32 %v1931_v49, %v1883_v39 }
 0x2a4   : > { %v1884_v52 = vpop.f32.mrf.mxu1  ;;  %v1836_v8 = vadd.f32 %v1835_v51, %v4883_v21  ;;  %v4930_v21 = vld [vmem:[%s4993_s4] ss:$0 sm:$0xff] }
 0x2a5   : > { %v1981_v10 = vadd.f32 %v1980_v50, %v1932_v7 }
 0x2a6   : > { %v1885_v25 = vadd.f32 %v1884_v52, %v1836_v8 }
 0x2a7   : > { %v2044_v36 = vmax.f32 %v1981_v10, 0.0 }
 0x2aa   : > { %v1933_v9 = vpop.f32.mrf.mxu2 }
 0x2ab   : > { %v1934_v35 = vadd.f32 %v1933_v9, %v1885_v25  ;;  %v2350_v11 = vpop.f32.mrf.mxu0  ;;  %v1982_v26 = vpop.f32.mrf.mxu3 }
 0x2ac   : > { %v2399_v37 = vpop.f32.mrf.mxu1  ;;  %v2351_v38 = vadd.f32 %v4930_v21, %v2350_v11 }
 0x2ad   : > { %v1983_v17 = vadd.f32 %v1982_v26, %v1934_v35 }
 0x2ae   : > { %v2400_v61 = vadd.f32 %v2399_v37, %v2351_v38 }
 0x2af   : > { %v2048_v16 = vmax.f32 %v1983_v17, 0.0 }
 0x2b1   : > { %v2080_v27 = vpack.c.bf16 %v2048_v16, %v2044_v36 }
 0x2b2   : > { %v2448_v55 = vpop.f32.mrf.mxu2 }
 0x2b3   : > { %2531 = vmatmul.bf16.gmra.mxu3 %v2080_v27  ;;  %v2352_v24 = vpop.f32.mrf.mxu0  ;;  %v2449_v0 = vadd.f32 %v2448_v55, %v2400_v61 }
 0x2b4   : > { %v2401_v57 = vpop.f32.mrf.mxu1  ;;  %v2353_v59 = vadd.f32 %v4930_v21, %v2352_v24 }
 0x2b6   : > { %v2402_v42 = vadd.f32 %v2401_v57, %v2353_v59 }
 0x2ba   : > { %v2450_v56 = vpop.f32.mrf.mxu2 }
 0x2bb   : > { %v2355_v20 = vpop.f32.mrf.mxu0  ;;  %v2451_v28 = vadd.f32 %v2450_v56, %v2402_v42 }
 0x2bc   : > { %v2404_v60 = vpop.f32.mrf.mxu1  ;;  %v2356_v3 = vadd.f32 %v4930_v21, %v2355_v20 }
 0x2be   : > { %v2405_v29 = vadd.f32 %v2404_v60, %v2356_v3 }
 0x2c2   : > { %v2453_v22 = vpop.f32.mrf.mxu2 }
 0x2c3   : > { %v2357_v23 = vpop.f32.mrf.mxu0  ;;  %v2454_v12 = vadd.f32 %v2453_v22, %v2405_v29 }
 0x2c4   : > { %v2406_v40 = vpop.f32.mrf.mxu1  ;;  %v2358_v5 = vadd.f32 %v4930_v21, %v2357_v23 }
 0x2c6   : > { %v2497_v18 = vpop.f32.mrf.mxu3  ;;  %v2407_v44 = vadd.f32 %v2406_v40, %v2358_v5 }
 0x2c7   : > { %v2498_v2 = vadd.f32 %v2497_v18, %v2449_v0 }
 0x2c9   : > { %2538 = vst.msk [vmem:[%s4937_s15] sm:$0xff] %vm2537_vm0, %v2498_v2 }
 0x2ca   : > { %v2455_v41 = vpop.f32.mrf.mxu2 }
 0x2cb   : > { %v2360_v43 = vpop.f32.mrf.mxu0  ;;  %v2456_v30 = vadd.f32 %v2455_v41, %v2407_v44 }
 0x2cc   : > { %v2409_v32 = vpop.f32.mrf.mxu1  ;;  %v2361_v15 = vadd.f32 %v4930_v21, %v2360_v43 }
 0x2ce   : > { %v2499_v34 = vpop.f32.mrf.mxu3  ;;  %v2410_v53 = vadd.f32 %v2409_v32, %v2361_v15 }
 0x2cf   : > { %v2500_v4 = vadd.f32 %v2499_v34, %v2451_v28 }
 0x2d1   : > { %2539 = vst.msk [vmem:[%s4937_s15 + $0x8] sm:$0xff] %vm2537_vm0, %v2500_v4 }
 0x2d2   : > { %v2458_v19 = vpop.f32.mrf.mxu2 }
 0x2d3   : > { %v2362_v62 = vpop.f32.mrf.mxu0  ;;  %v2459_v6 = vadd.f32 %v2458_v19, %v2410_v53 }
 0x2d4   : > { %v2411_v1 = vpop.f32.mrf.mxu1  ;;  %v2363_v47 = vadd.f32 %v4930_v21, %v2362_v62 }
 0x2d6   : > { %v2502_v48 = vpop.f32.mrf.mxu3  ;;  %v2412_v51 = vadd.f32 %v2411_v1, %v2363_v47 }
 0x2d7   : > { %v2503_v13 = vadd.f32 %v2502_v48, %v2454_v12 }
 0x2d9   : > { %2540 = vst.msk [vmem:[%s4937_s15 + $0x10] sm:$0xff] %vm2537_vm0, %v2503_v13 }
 0x2da   : > { %v2460_v14 = vpop.f32.mrf.mxu2 }
 0x2db   : > { %v2365_v33 = vpop.f32.mrf.mxu0  ;;  %v2461_v52 = vadd.f32 %v2460_v14, %v2412_v51 }
 0x2dc   : > { %v2414_v45 = vpop.f32.mrf.mxu1  ;;  %v2366_v25 = vadd.f32 %v4930_v21, %v2365_v33 }
 0x2de   : > { %v2504_v31 = vpop.f32.mrf.mxu3  ;;  %v2415_v10 = vadd.f32 %v2414_v45, %v2366_v25 }
 0x2df   : > { %v2505_v46 = vadd.f32 %v2504_v31, %v2456_v30 }
 0x2e1   : > { %2541 = vst.msk [vmem:[%s4937_s15 + $0x18] sm:$0xff] %vm2537_vm0, %v2505_v46 }
 0x2e2   : > { %v2463_v63 = vpop.f32.mrf.mxu2 }
 0x2e3   : > { %v2367_v54 = vpop.f32.mrf.mxu0  ;;  %v2464_v26 = vadd.f32 %v2463_v63, %v2415_v10 }
 0x2e4   : > { %v2416_v39 = vpop.f32.mrf.mxu1  ;;  %v2368_v17 = vadd.f32 %v4930_v21, %v2367_v54 }
 0x2e6   : > { %v2507_v58 = vpop.f32.mrf.mxu3  ;;  %v2417_v27 = vadd.f32 %v2416_v39, %v2368_v17 }
 0x2e7   : > { %v2508_v49 = vadd.f32 %v2507_v58, %v2459_v6 }
 0x2e9   : > { %2542 = vst.msk [vmem:[%s4937_s15 + $0x20] sm:$0xff] %vm2537_vm0, %v2508_v49 }
 0x2ea   : > { %v2465_v50 = vpop.f32.mrf.mxu2 }
 0x2eb   : > { %v2370_v8 = vpop.f32.mrf.mxu0  ;;  %v2466_v55 = vadd.f32 %v2465_v50, %v2417_v27 }
 0x2ec   : > { %v2419_v35 = vpop.f32.mrf.mxu1  ;;  %v2371_v20 = vadd.f32 %v4930_v21, %v2370_v8 }
 0x2ee   : > { %v2509_v7 = vpop.f32.mrf.mxu3  ;;  %v2420_v22 = vadd.f32 %v2419_v35, %v2371_v20 }
 0x2ef   : > { %v2510_v9 = vadd.f32 %v2509_v7, %v2461_v52 }
 0x2f1   : > { %2543 = vst.msk [vmem:[%s4937_s15 + $0x28] sm:$0xff] %vm2537_vm0, %v2510_v9 }
 0x2f2   : > { %v2468_v11 = vpop.f32.mrf.mxu2 }
 0x2f3   : > { %v2372_v16 = vpop.f32.mrf.mxu0  ;;  %v2469_v61 = vadd.f32 %v2468_v11, %v2420_v22 }
 0x2f4   : > { %v2421_v24 = vpop.f32.mrf.mxu1  ;;  %v2373_v40 = vadd.f32 %v4930_v21, %v2372_v16 }
 0x2f6   : > { %v2512_v37 = vpop.f32.mrf.mxu3  ;;  %v2422_v2 = vadd.f32 %v2421_v24, %v2373_v40 }
 0x2f7   : > { %v2513_v36 = vadd.f32 %v2512_v37, %v2464_v26 }
 0x2f9   : > { %2544 = vst.msk [vmem:[%s4937_s15 + $0x30] sm:$0xff] %vm2537_vm0, %v2513_v36 }
 0x2fa   : > { %v2470_v57 = vpop.f32.mrf.mxu2 }
 0x2fb   : > { %v2375_v38 = vpop.f32.mrf.mxu0  ;;  %v2471_v42 = vadd.f32 %v2470_v57, %v2422_v2 }
 0x2fc   : > { %v2424_v0 = vpop.f32.mrf.mxu1  ;;  %v2376_v32 = vadd.f32 %v4930_v21, %v2375_v38 }
 0x2fe   : > { %v2514_v56 = vpop.f32.mrf.mxu3  ;;  %v2425_v4 = vadd.f32 %v2424_v0, %v2376_v32 }
 0x2ff   : > { %v2515_v60 = vadd.f32 %v2514_v56, %v2466_v55 }
 0x301   : > { %2545 = vst.msk [vmem:[%s4937_s15 + $0x38] sm:$0xff] %vm2537_vm0, %v2515_v60 }
 0x302   : > { %v2473_v59 = vpop.f32.mrf.mxu2 }
 0x303   : > { %v2377_v41 = vpop.f32.mrf.mxu0  ;;  %v2474_v19 = vadd.f32 %v2473_v59, %v2425_v4 }
 0x304   : > { %v2426_v34 = vpop.f32.mrf.mxu1  ;;  %v2378_v12 = vadd.f32 %v4930_v21, %v2377_v41 }
 0x306   : > { %v2517_v23 = vpop.f32.mrf.mxu3  ;;  %v2427_v48 = vadd.f32 %v2426_v34, %v2378_v12 }
 0x307   : > { %v2518_v18 = vadd.f32 %v2517_v23, %v2469_v61 }
 0x309   : > { %2546 = vst.msk [vmem:[%s4937_s15 + $0x40] sm:$0xff] %vm2537_vm0, %v2518_v18 }
 0x30a   : > { %v2475_v3 = vpop.f32.mrf.mxu2 }
 0x30b   : > { %v2380_v29 = vpop.f32.mrf.mxu0  ;;  %v2476_v14 = vadd.f32 %v2475_v3, %v2427_v48 }
 0x30c   : > { %v2429_v5 = vpop.f32.mrf.mxu1  ;;  %v2381_v33 = vadd.f32 %v4930_v21, %v2380_v29 }
 0x30e   : > { %v2519_v43 = vpop.f32.mrf.mxu3  ;;  %v2430_v15 = vadd.f32 %v2429_v5, %v2381_v33 }
 0x30f   : > { %v2520_v28 = vadd.f32 %v2519_v43, %v2471_v42 }
 0x311   : > { %2547 = vst.msk [vmem:[%s4937_s15 + $0x48] sm:$0xff] %vm2537_vm0, %v2520_v28 }
 0x312   : > { %v2478_v13 = vpop.f32.mrf.mxu2 }
 0x313   : > { %v2382_v31 = vpop.f32.mrf.mxu0  ;;  %v2479_v45 = vadd.f32 %v2478_v13, %v2430_v15 }
 0x314   : > { %v2431_v46 = vpop.f32.mrf.mxu1  ;;  %v2383_v54 = vadd.f32 %v4930_v21, %v2382_v31 }
 0x316   : > { %v2522_v62 = vpop.f32.mrf.mxu3  ;;  %v2432_v47 = vadd.f32 %v2431_v46, %v2383_v54 }
 0x317   : > { %v2523_v1 = vadd.f32 %v2522_v62, %v2474_v19 }
 0x319   : > { %2548 = vst.msk [vmem:[%s4937_s15 + $0x50] sm:$0xff] %vm2537_vm0, %v2523_v1 }
 0x31a   : > { %v2480_v63 = vpop.f32.mrf.mxu2 }
 0x31b   : > { %v2385_v58 = vpop.f32.mrf.mxu0  ;;  %v2481_v49 = vadd.f32 %v2480_v63, %v2432_v47 }
 0x31c   : > { %v2386_v50 = vadd.f32 %v4930_v21, %v2385_v58  ;;  %v2434_v52 = vpop.f32.mrf.mxu1 }
 0x31e   : > { %v2524_v44 = vpop.f32.mrf.mxu3  ;;  %v2435_v7 = vadd.f32 %v2434_v52, %v2386_v50 }
 0x31f   : > { %v2525_v30 = vadd.f32 %v2524_v44, %v2476_v14 }
 0x321   : > { %2549 = vst.msk [vmem:[%s4937_s15 + $0x58] sm:$0xff] %vm2537_vm0, %v2525_v30 }
 0x322   : > { %v2483_v8 = vpop.f32.mrf.mxu2 }
 0x323   : > { %v2387_v25 = vpop.f32.mrf.mxu0  ;;  %v2484_v9 = vadd.f32 %v2483_v8, %v2435_v7 }
 0x324   : > { %v2388_v35 = vadd.f32 %v4930_v21, %v2387_v25  ;;  %v2436_v26 = vpop.f32.mrf.mxu1 }
 0x326   : > { %v2527_v53 = vpop.f32.mrf.mxu3  ;;  %v2437_v17 = vadd.f32 %v2436_v26, %v2388_v35 }
 0x327   : > { %v2528_v6 = vadd.f32 %v2527_v53, %v2479_v45 }
 0x329   : > { %2550 = vst.msk [vmem:[%s4937_s15 + $0x60] sm:$0xff] %vm2537_vm0, %v2528_v6 }
 0x32a   : > { %v2485_v37 = vpop.f32.mrf.mxu2 }
 0x32b   : > { %v2486_v36 = vadd.f32 %v2485_v37, %v2437_v17 }
 0x32e   : > { %v2529_v39 = vpop.f32.mrf.mxu3 }
 0x32f   : > { %v2530_v51 = vadd.f32 %v2529_v39, %v2481_v49 }
 0x331   : > { %2551 = vst.msk [vmem:[%s4937_s15 + $0x68] sm:$0xff] %vm2537_vm0, %v2530_v51 }
 0x336   : > { %v2532_v10 = vpop.f32.mrf.mxu3 }
 0x337   : > { %v2533_v11 = vadd.f32 %v2532_v10, %v2484_v9 }
 0x339   : > { %2552 = vst.msk [vmem:[%s4937_s15 + $0x70] sm:$0xff] %vm2537_vm0, %v2533_v11 }
 0x33e   : > { %v2534_v16 = vpop.f32.mrf.mxu3 }
 0x33f   : > { %v2535_v27 = vadd.f32 %v2534_v16, %v2486_v36 }
 0x341   : > { %2553 = vst.msk [vmem:[%s4937_s15 + $0x78] sm:$0xff] %vm2537_vm0, %v2535_v27 }
 0x342 PF: > { %s15_s18 = sadd.s32 1, %s3599_s18  }
 0x343   : > { %p12_p4 = scmp.ge.s32.totalorder %s15_s18, 4  }
 0x345   :  { %14 = sbr.rel (!%p12_p4) target bundleno = 1 (0x1), region = 70 }

// kernel: _lambda_.26
= control target key start
LH: loop header
LB: loop body
LE: loop exit
PB: predicated region body
PF: predicated region fallthrough
CT: control target
= control target key end

     0   :  { %vm58_vm0 = vcmask 523264   ;;  %s153_s1 = inlined_call_operand.vmem [shape: bf16[64,64], index: 1, kind: input, shape index: {}]   ;;  %s154_s2 = inlined_call_operand.vmem [shape: f32[1,64], index: 2, kind: input, shape index: {}]   ;;  %s155_s0 = inlined_call_operand.vmem [shape: bf16[16,64], index: 0, kind: input, shape index: {}]   ;;  %s156_s3 = inlined_call_operand.vmem [shape: f32[16,64], index: 3, kind: output, shape index: {}]  }
   0x1   :  { %v107_v0 = vld [vmem:[%s153_s1 + $0x18] sm:$0xff]  ;;  %v106_v1 = vld [vmem:[%s153_s1 + $0x10] sm:$0xff]  ;;  %v105_v2 = vld [vmem:[%s153_s1 + $0x8] sm:$0xff] }
   0x2   :  { %66 = vmatpush.bf16.msra.mxu0 %v107_v0  ;;  %v104_v3 = vld [vmem:[%s153_s1] sm:$0xff] }
   0x3   :  { %v103_v4 = vld [vmem:[%s155_s0] sm:$0xff] }
   0x4   :  { %v108_v5 = vld [vmem:[%s154_s2] ss:$0 sm:$0xff] }
   0x6   :  { %67 = vmatpush.bf16.msra.mxu0 %v106_v1 }
   0xa   :  { %68 = vmatpush.bf16.msra.mxu0 %v105_v2 }
   0xe   :  { %69 = vmatpush.bf16.msra.mxu0 %v104_v3 }
  0x11   :  { %102 = vmatmul.msk.bf16.vlgmr.msra.gmra.mxu0 %vm58_vm0, %v103_v4 }
  0x8e   :  { %v71_v6 = vpop.f32.mrf.mxu0 }
  0x8f   :  { %v72_v7 = vadd.f32 %v108_v5, %v71_v6 }
  0x91   :  { %76 = vst.msk [vmem:[%s156_s3] sm:$0xff] %vm58_vm0, %v72_v7 }
  0x96   :  { %v73_v8 = vpop.f32.mrf.mxu0 }
  0x97   :  { %v74_v9 = vadd.f32 %v108_v5, %v73_v8 }
  0x99   :  { %77 = vst.msk [vmem:[%s156_s3 + $0x8] sm:$0xff] %vm58_vm0, %v74_v9 }

// kernel: _lambda_.27
= control target key start
LH: loop header
LB: loop body
LE: loop exit
PB: predicated region body
PF: predicated region fallthrough
CT: control target
= control target key end

     0   :  { %vm82_vm0 = vcmask 523264   ;;  %s599_s1 = inlined_call_operand.vmem [shape: bf16[64,256], index: 1, kind: input, shape index: {}]   ;;  %s600_s0 = inlined_call_operand.vmem [shape: bf16[16,64], index: 0, kind: input, shape index: {}]   ;;  %s601_s4 = inlined_call_operand.vmem [shape: f32[1,64], index: 4, kind: input, shape index: {}]   ;;  %s602_s3 = inlined_call_operand.vmem [shape: bf16[256,64], index: 3, kind: input, shape index: {}]   ;;  %s603_s2 = inlined_call_operand.vmem [shape: f32[1,256], index: 2, kind: input, shape index: {}]   ;;  %s604_s5 = inlined_call_operand.vmem [shape: f32[16,64], index: 5, kind: output, shape index: {}]  }
   0x1   :  { %v348_v0 = vld [vmem:[%s599_s1 + $0x30] sm:$0xf]  ;;  %v428_v1 = vld [vmem:[%s599_s1 + $0x34] sm:$0xf0]  ;;  %v427_v2 = vld [vmem:[%s599_s1 + $0x34] sm:$0xf] }
   0x2   :  { %v349_v3 = vor.u32 %v428_v1, %v348_v0  ;;  %v350_v4 = vld [vmem:[%s599_s1 + $0x38] sm:$0xf0]  ;;  %v340_v5 = vld [vmem:[%s599_s1 + $0x20] sm:$0xf]  ;;  %v426_v6 = vld [vmem:[%s599_s1 + $0x24] sm:$0xf0] }
   0x3   :  { %v353_v7 = vor.u32 %v427_v2, %v350_v4  ;;  %v425_v8 = vld [vmem:[%s599_s1 + $0x24] sm:$0xf]  ;;  %v342_v9 = vld [vmem:[%s599_s1 + $0x28] sm:$0xf0]  ;;  %v341_v10 = vor.u32 %v426_v6, %v340_v5  ;;  %v332_v12 = vld [vmem:[%s599_s1 + $0x10] sm:$0xf] }
   0x4   :  { %90 = vmatpush.bf16.msra.mxu0 %v349_v3  ;;  %v345_v11 = vor.u32 %v425_v8, %v342_v9  ;;  %v424_v13 = vld [vmem:[%s599_s1 + $0x14] sm:$0xf0]  ;;  %v423_v14 = vld [vmem:[%s599_s1 + $0x14] sm:$0xf]  ;;  %v334_v15 = vld [vmem:[%s599_s1 + $0x18] sm:$0xf0] }
   0x5   :  { %104 = vmatpush.bf16.msra.mxu1 %v353_v7  ;;  %v333_v16 = vor.u32 %v424_v13, %v332_v12  ;;  %v337_v17 = vor.u32 %v423_v14, %v334_v15  ;;  %v324_v18 = vld [vmem:[%s599_s1] sm:$0xf]  ;;  %v422_v19 = vld [vmem:[%s599_s1 + $0x4] sm:$0xf0]  ;;  %v421_v20 = vld [vmem:[%s599_s1 + $0x4] sm:$0xf] }
   0x6   :  { %v326_v21 = vld [vmem:[%s599_s1 + $0x8] sm:$0xf0]  ;;  %v325_v22 = vor.u32 %v422_v19, %v324_v18  ;;  %v420_v24 = vld [vmem:[%s600_s0] sm:$0xff]  ;;  %v436_v25 = vld [vmem:[%s602_s3 + $0x38] sm:$0xff] }
   0x7   :  { %v329_v23 = vor.u32 %v421_v20, %v326_v21  ;;  %v444_v26 = vld [vmem:[%s602_s3 + $0x78] sm:$0xff]  ;;  %284 = vmatpush.bf16.msra.mxu2 %v436_v25  ;;  %v435_v27 = vld [vmem:[%s602_s3 + $0x30] sm:$0xff]  ;;  %v434_v29 = vld [vmem:[%s602_s3 + $0x28] sm:$0xff] }
   0x8   :  { %91 = vmatpush.bf16.msra.mxu0 %v341_v10  ;;  %298 = vmatpush.bf16.msra.mxu3 %v444_v26  ;;  %v443_v28 = vld [vmem:[%s602_s3 + $0x70] sm:$0xff]  ;;  %v442_v30 = vld [vmem:[%s602_s3 + $0x68] sm:$0xff]  ;;  %v433_v31 = vld [vmem:[%s602_s3 + $0x20] sm:$0xff] }
   0x9   :  { %105 = vmatpush.bf16.msra.mxu1 %v345_v11  ;;  %v441_v32 = vld [vmem:[%s602_s3 + $0x60] sm:$0xff]  ;;  %v432_v33 = vld [vmem:[%s602_s3 + $0x18] sm:$0xff]  ;;  %v431_v35 = vld [vmem:[%s602_s3 + $0x10] sm:$0xff] }
   0xa   :  { %v440_v34 = vld [vmem:[%s602_s3 + $0x58] sm:$0xff]  ;;  %v439_v36 = vld [vmem:[%s602_s3 + $0x50] sm:$0xff]  ;;  %v430_v37 = vld [vmem:[%s602_s3 + $0x8] sm:$0xff] }
   0xb   :  { %285 = vmatpush.bf16.msra.mxu2 %v435_v27  ;;  %v438_v38 = vld [vmem:[%s602_s3 + $0x48] sm:$0xff]  ;;  %v31_v39 = vld [vmem:[%s603_s2] sm:$0x3] }
   0xc   :  { %92 = vmatpush.bf16.msra.mxu0 %v333_v16  ;;  %299 = vmatpush.bf16.msra.mxu3 %v443_v28  ;;  %v429_v40 = vld [vmem:[%s602_s3] sm:$0xff]  ;;  %v33_v42 = vperm.slane %v31_v39, 0  ;;  %v34_v43 = vperm.slane %v31_v39, 1 }
   0xd   :  { %106 = vmatpush.bf16.msra.mxu1 %v337_v17  ;;  %v437_v41 = vld [vmem:[%s602_s3 + $0x40] sm:$0xff] }
   0xe   :  { %v445_v26 = vld [vmem:[%s601_s4] ss:$0 sm:$0xff] }
   0xf   :  { %286 = vmatpush.bf16.msra.mxu2 %v434_v29 }
  0x10   :  { %93 = vmatpush.bf16.msra.mxu0 %v325_v22  ;;  %300 = vmatpush.bf16.msra.mxu3 %v442_v30 }
  0x11   :  { %107 = vmatpush.bf16.msra.mxu1 %v329_v23 }
  0x13   :  { %354 = vmatmul.msk.bf16.vlgmr.msra.gmra.mxu0 %vm82_vm0, %v420_v24  ;;  %287 = vmatpush.bf16.msra.mxu2 %v433_v31 }
  0x14   :  { %355 = vmatmul.msk.bf16.vlgmr.msra.gmra.mxu1 %vm82_vm0, %v420_v24  ;;  %301 = vmatpush.bf16.msra.mxu3 %v441_v32 }
  0x17   :  { %288 = vmatpush.bf16.msra.mxu2 %v432_v33 }
  0x18   :  { %302 = vmatpush.bf16.msra.mxu3 %v440_v34 }
  0x1b   :  { %289 = vmatpush.bf16.msra.mxu2 %v431_v35 }
  0x1c   :  { %303 = vmatpush.bf16.msra.mxu3 %v439_v36 }
  0x1f   :  { %290 = vmatpush.bf16.msra.mxu2 %v430_v37 }
  0x20   :  { %304 = vmatpush.bf16.msra.mxu3 %v438_v38 }
  0x23   :  { %291 = vmatpush.bf16.msra.mxu2 %v429_v40 }
  0x24   :  { %305 = vmatpush.bf16.msra.mxu3 %v437_v41 }
  0x90   :  { %v95_v44 = vpop.f32.mrf.mxu0 }
  0x91   :  { %v96_v45 = vadd.f32 %v95_v44, %v33_v42  ;;  %v109_v46 = vpop.f32.mrf.mxu1 }
  0x92   :  { %v110_v47 = vadd.f32 %v109_v46, %v34_v43 }
  0x93   :  { %v118_v48 = vmul.f32 0.044715, %v96_v45  ;;  %v114_v14 = vmul.f32 0.5, %v96_v45 }
  0x94   :  { %v119_v49 = vmul.f32 0.044715, %v110_v47  ;;  %v115_v17 = vmul.f32 0.5, %v110_v47 }
  0x95   :  { %v122_v50 = vmul.f32 %v118_v48, %v96_v45 }
  0x96   :  { %v123_v51 = vmul.f32 %v119_v49, %v110_v47 }
  0x97   :  { %v126_v52 = vmul.f32 %v122_v50, %v96_v45 }
  0x98   :  { %v97_v53 = vpop.f32.mrf.mxu0  ;;  %v127_v54 = vmul.f32 %v123_v51, %v110_v47 }
  0x99   :  { %v98_v55 = vadd.f32 %v97_v53, %v33_v42  ;;  %v111_v56 = vpop.f32.mrf.mxu1  ;;  %v130_v57 = vadd.f32 %v126_v52, %v96_v45 }
  0x9a   :  { %v112_v58 = vadd.f32 %v111_v56, %v34_v43  ;;  %v131_v59 = vadd.f32 %v127_v54, %v110_v47 }
  0x9b   :  { %v120_v60 = vmul.f32 0.044715, %v98_v55  ;;  %v134_v63 = vmul.f32 0.7978846, %v130_v57  ;;  %v116_v15 = vmul.f32 0.5, %v98_v55 }
  0x9c   :  { %v121_v61 = vmul.f32 0.044715, %v112_v58  ;;  %v135_v1 = vmul.f32 0.7978846, %v131_v59  ;;  %v117_v18 = vmul.f32 0.5, %v112_v58 }
  0x9d   :  { %v124_v62 = vmul.f32 %v120_v60, %v98_v55  ;;  %446 = vtanh.f32 %v134_v63 }
  0x9e   :  { %v125_v0 = vmul.f32 %v121_v61, %v112_v58  ;;  %448 = vtanh.f32 %v135_v1 }
  0x9f   :  { %v128_v2 = vmul.f32 %v124_v62, %v98_v55 }
  0xa0   :  { %v129_v3 = vmul.f32 %v125_v0, %v112_v58 }
  0xa1   :  { %v132_v4 = vadd.f32 %v128_v2, %v98_v55 }
  0xa2   :  { %v133_v5 = vadd.f32 %v129_v3, %v112_v58 }
  0xa3   :  { %v136_v6 = vmul.f32 0.7978846, %v132_v4  ;;  %v447_v8 = vpop.eup %446 }
  0xa4   :  { %v137_v7 = vmul.f32 0.7978846, %v133_v5  ;;  %v449_v9 = vpop.eup %448  ;;  %v142_v10 = vadd.f32 1.0, %v447_v8 }
  0xa5   :  { %450 = vtanh.f32 %v136_v6  ;;  %v143_v12 = vadd.f32 1.0, %v449_v9 }
  0xa6   :  { %452 = vtanh.f32 %v137_v7  ;;  %v146_v20 = vmul.f32 %v142_v10, %v114_v14 }
  0xa7   :  { %v147_v22 = vmul.f32 %v143_v12, %v115_v17 }
  0xab   :  { %v451_v11 = vpop.eup %450 }
  0xac   :  { %v453_v13 = vpop.eup %452  ;;  %v144_v16 = vadd.f32 1.0, %v451_v11 }
  0xad   :  { %v145_v19 = vadd.f32 1.0, %v453_v13 }
  0xae   :  { %v148_v21 = vmul.f32 %v144_v16, %v116_v15 }
  0xaf   :  { %v149_v23 = vmul.f32 %v145_v19, %v117_v18 }
  0xb0   :  { %v150_v24 = vpack.c.bf16 %v148_v21, %v146_v20 }
  0xb1   :  { %v151_v25 = vpack.c.bf16 %v149_v23, %v147_v22 }
  0xb2   :  { %292 = vmatmul.bf16.vlgmr.msra.gmra.mxu2 %v150_v24 }
  0xb3   :  { %306 = vmatmul.bf16.vlgmr.msra.gmra.mxu3 %v151_v25 }
 0x135   :  { %v293_v27 = vpop.f32.mrf.mxu2 }
 0x136   :  { %v294_v28 = vadd.f32 %v445_v26, %v293_v27  ;;  %v307_v29 = vpop.f32.mrf.mxu3 }
 0x138   :  { %v308_v30 = vadd.f32 %v307_v29, %v294_v28 }
 0x13a   :  { %312 = vst.msk [vmem:[%s604_s5] sm:$0xff] %vm82_vm0, %v308_v30 }
 0x13d   :  { %v295_v31 = vpop.f32.mrf.mxu2 }
 0x13e   :  { %v296_v32 = vadd.f32 %v445_v26, %v295_v31  ;;  %v309_v33 = vpop.f32.mrf.mxu3 }
 0x140   :  { %v310_v34 = vadd.f32 %v309_v33, %v296_v32 }
 0x142   :  { %313 = vst.msk [vmem:[%s604_s5 + $0x8] sm:$0xff] %vm82_vm0, %v310_v34 }

// kernel: _lambda_.43
= control target key start
LH: loop header
LB: loop body
LE: loop exit
PB: predicated region body
PF: predicated region fallthrough
CT: control target
= control target key end

     0   :  { %s342_s1 = inlined_call_operand.vmem [shape: bf16[256,128], index: 1, kind: input, shape index: {}]   ;;  %s343_s0 = inlined_call_operand.vmem [shape: bf16[2,256], index: 0, kind: input, shape index: {}]   ;;  %s344_s2 = inlined_call_operand.vmem [shape: f32[1,128], index: 2, kind: input, shape index: {}]   ;;  %s345_s3 = inlined_call_operand.vmem [shape: f32[2,128], index: 3, kind: output, shape index: {}]  }
   0x1   :  { %v255_v0 = vld [vmem:[%s342_s1 + $0x38] sm:$0xff]  ;;  %v254_v2 = vld [vmem:[%s342_s1 + $0x30] sm:$0xff]  ;;  %v14_v4 = vld [vmem:[%s343_s0] sm:$0x3] }
   0x2   :  { %v263_v1 = vld [vmem:[%s342_s1 + $0x78] sm:$0xff]  ;;  %153 = vmatpush.bf16.msra.mxu0 %v255_v0  ;;  %v262_v3 = vld [vmem:[%s342_s1 + $0x70] sm:$0xff]  ;;  %v253_v5 = vld [vmem:[%s342_s1 + $0x28] sm:$0xff]  ;;  %52 = vst [vmem:[#allocation1] ss:$9 sm:$0xff] %v14_v4 }
   0x3   :  { %166 = vmatpush.bf16.msra.mxu1 %v263_v1  ;;  %v261_v6 = vld [vmem:[%s342_s1 + $0x68] sm:$0xff]  ;;  %v252_v7 = vld [vmem:[%s342_s1 + $0x20] sm:$0xff]  ;;  %v251_v9 = vld [vmem:[%s342_s1 + $0x18] sm:$0xff] }
   0x4   :  { %v260_v8 = vld [vmem:[%s342_s1 + $0x60] sm:$0xff]  ;;  %v259_v10 = vld [vmem:[%s342_s1 + $0x58] sm:$0xff]  ;;  %v250_v11 = vld [vmem:[%s342_s1 + $0x10] sm:$0xff] }
   0x5   :  { %v258_v12 = vld [vmem:[%s342_s1 + $0x50] sm:$0xff]  ;;  %v249_v13 = vld [vmem:[%s342_s1 + $0x8] sm:$0xff]  ;;  %v248_v15 = vld [vmem:[%s342_s1] sm:$0xff] }
   0x6   :  { %154 = vmatpush.bf16.msra.mxu0 %v254_v2  ;;  %v257_v14 = vld [vmem:[%s342_s1 + $0x48] sm:$0xff]  ;;  %v256_v16 = vld [vmem:[%s342_s1 + $0x40] sm:$0xff] }
   0x7   :  { %167 = vmatpush.bf16.msra.mxu1 %v262_v3  ;;  %v264_v19 = vld [vmem:[%s344_s2] ss:$0 sm:$0xff] }
   0x9   :  { %v53_v17 = vld [vmem:[#allocation1] sm:$0xff]  ;;  %v54_v18 = vld [vmem:[#allocation1 + $0x9] sm:$0xff] }
   0xa   :  { %155 = vmatpush.bf16.msra.mxu0 %v253_v5 }
   0xb   :  { %168 = vmatpush.bf16.msra.mxu1 %v261_v6 }
   0xe   :  { %156 = vmatpush.bf16.msra.mxu0 %v252_v7 }
   0xf   :  { %169 = vmatpush.bf16.msra.mxu1 %v260_v8 }
  0x12   :  { %157 = vmatpush.bf16.msra.mxu0 %v251_v9 }
  0x13   :  { %170 = vmatpush.bf16.msra.mxu1 %v259_v10 }
  0x16   :  { %158 = vmatpush.bf16.msra.mxu0 %v250_v11 }
  0x17   :  { %171 = vmatpush.bf16.msra.mxu1 %v258_v12 }
  0x1a   :  { %159 = vmatpush.bf16.msra.mxu0 %v249_v13 }
  0x1b   :  { %172 = vmatpush.bf16.msra.mxu1 %v257_v14 }
  0x1e   :  { %160 = vmatpush.bf16.msra.mxu0 %v248_v15 }
  0x1f   :  { %173 = vmatpush.bf16.msra.mxu1 %v256_v16 }
  0x21   :  { %161 = vmatmul.bf16.vlgmr.msra.gmra.mxu0 %v53_v17 }
  0x22   :  { %174 = vmatmul.bf16.vlgmr.msra.gmra.mxu1 %v54_v18 }
  0x9e   :  { %v162_v20 = vpop.f32.mrf.mxu0 }
  0x9f   :  { %v175_v21 = vpop.f32.mrf.mxu1  ;;  %v163_v22 = vadd.f32 %v264_v19, %v162_v20 }
  0xa1   :  { %v176_v23 = vadd.f32 %v175_v21, %v163_v22 }
  0xa3   :  { %179 = vst [vmem:[%s345_s3] sm:$0x3] %v176_v23 }
  0xa6   :  { %v164_v24 = vpop.f32.mrf.mxu0 }
  0xa7   :  { %v177_v25 = vpop.f32.mrf.mxu1 }

// kernel: _lambda_.42
= control target key start
LH: loop header
LB: loop body
LE: loop exit
PB: predicated region body
PF: predicated region fallthrough
CT: control target
= control target key end

     0   :  { %vm76_vm0 = vcmask 523264   ;;  %vm365_vm1 = vcmask 1040384   ;;  %s861_s1 = inlined_call_operand.vmem [shape: bf16[64,256], index: 1, kind: input, shape index: {}]   ;;  %s862_s3 = inlined_call_operand.vmem [shape: bf16[256,256], index: 3, kind: input, shape index: {}]   ;;  %s863_s0 = inlined_call_operand.vmem [shape: bf16[2,64], index: 0, kind: input, shape index: {}]   ;;  %s864_s2 = inlined_call_operand.vmem [shape: f32[1,256], index: 2, kind: input, shape index: {}]   ;;  %s865_s4 = inlined_call_operand.vmem [shape: f32[1,256], index: 4, kind: input, shape index: {}]   ;;  %s866_s5 = inlined_call_operand.vmem [shape: bf16[2,256], index: 5, kind: output, shape index: {}]  }
   0x1   :  { %v401_v0 = vld [vmem:[%s861_s1 + $0x30] sm:$0xf]  ;;  %v544_v1 = vld [vmem:[%s861_s1 + $0x34] sm:$0xf0]  ;;  %v543_v2 = vld [vmem:[%s861_s1 + $0x34] sm:$0xf] }
   0x2   :  { %v402_v3 = vor.u32 %v544_v1, %v401_v0  ;;  %v403_v4 = vld [vmem:[%s861_s1 + $0x38] sm:$0xf0]  ;;  %v393_v5 = vld [vmem:[%s861_s1 + $0x20] sm:$0xf]  ;;  %v542_v6 = vld [vmem:[%s861_s1 + $0x24] sm:$0xf0] }
   0x3   :  { %v406_v7 = vor.u32 %v543_v2, %v403_v4  ;;  %v541_v8 = vld [vmem:[%s861_s1 + $0x24] sm:$0xf]  ;;  %v395_v9 = vld [vmem:[%s861_s1 + $0x28] sm:$0xf0]  ;;  %v394_v10 = vor.u32 %v542_v6, %v393_v5  ;;  %v385_v12 = vld [vmem:[%s861_s1 + $0x10] sm:$0xf] }
   0x4   :  { %84 = vmatpush.bf16.msra.mxu0 %v402_v3  ;;  %v398_v11 = vor.u32 %v541_v8, %v395_v9  ;;  %v540_v13 = vld [vmem:[%s861_s1 + $0x14] sm:$0xf0]  ;;  %v539_v14 = vld [vmem:[%s861_s1 + $0x14] sm:$0xf]  ;;  %v387_v15 = vld [vmem:[%s861_s1 + $0x18] sm:$0xf0] }
   0x5   :  { %97 = vmatpush.bf16.msra.mxu1 %v406_v7  ;;  %v467_v16 = vld [vmem:[%s862_s3 + $0x70] sm:$0xf]  ;;  %v377_v17 = vld [vmem:[%s861_s1] sm:$0xf]  ;;  %v560_v18 = vld [vmem:[%s862_s3 + $0x74] sm:$0xf0]  ;;  %v386_v21 = vor.u32 %v540_v13, %v385_v12  ;;  %v390_v27 = vor.u32 %v539_v14, %v387_v15 }
   0x6   :  { %v531_v19 = vld [vmem:[%s862_s3 + $0xf0] sm:$0xf]  ;;  %v576_v20 = vld [vmem:[%s862_s3 + $0xf4] sm:$0xf0]  ;;  %v538_v22 = vld [vmem:[%s861_s1 + $0x4] sm:$0xf0]  ;;  %v468_v25 = vor.u32 %v560_v18, %v467_v16 }
   0x7   :  { %v537_v23 = vld [vmem:[%s861_s1 + $0x4] sm:$0xf]  ;;  %v379_v24 = vld [vmem:[%s861_s1 + $0x8] sm:$0xf0]  ;;  %v532_v26 = vor.u32 %v576_v20, %v531_v19  ;;  %v559_v28 = vld [vmem:[%s862_s3 + $0x74] sm:$0xf]  ;;  %v378_v38 = vor.u32 %v538_v22, %v377_v17 }
   0x8   :  { %85 = vmatpush.bf16.msra.mxu0 %v394_v10  ;;  %v459_v29 = vld [vmem:[%s862_s3 + $0x60] sm:$0xf]  ;;  %v558_v30 = vld [vmem:[%s862_s3 + $0x64] sm:$0xf0]  ;;  %308 = vmatpush.bf16.msra.mxu2 %v468_v25  ;;  %v469_v31 = vld [vmem:[%s862_s3 + $0x78] sm:$0xf0]  ;;  %v382_v42 = vor.u32 %v537_v23, %v379_v24 }
   0x9   :  { %98 = vmatpush.bf16.msra.mxu1 %v398_v11  ;;  %321 = vmatpush.bf16.msra.mxu3 %v532_v26  ;;  %v460_v32 = vor.u32 %v558_v30, %v459_v29  ;;  %v523_v33 = vld [vmem:[%s862_s3 + $0xe0] sm:$0xf]  ;;  %v574_v34 = vld [vmem:[%s862_s3 + $0xe4] sm:$0xf0]  ;;  %v575_v35 = vld [vmem:[%s862_s3 + $0xf4] sm:$0xf]  ;;  %v472_v43 = vor.u32 %v559_v28, %v469_v31 }
   0xa   :  { %v533_v36 = vld [vmem:[%s862_s3 + $0xf8] sm:$0xf0]  ;;  %v524_v37 = vor.u32 %v574_v34, %v523_v33  ;;  %v451_v39 = vld [vmem:[%s862_s3 + $0x50] sm:$0xf]  ;;  %v556_v40 = vld [vmem:[%s862_s3 + $0x54] sm:$0xf0] }
   0xb   :  { %v515_v41 = vld [vmem:[%s862_s3 + $0xd0] sm:$0xf]  ;;  %v572_v44 = vld [vmem:[%s862_s3 + $0xd4] sm:$0xf0]  ;;  %v536_v45 = vor.u32 %v575_v35, %v533_v36  ;;  %v557_v46 = vld [vmem:[%s862_s3 + $0x64] sm:$0xf]  ;;  %v452_v49 = vor.u32 %v556_v40, %v451_v39 }
   0xc   :  { %86 = vmatpush.bf16.msra.mxu0 %v386_v21  ;;  %309 = vmatpush.bf16.msra.mxu2 %v460_v32  ;;  %v461_v47 = vld [vmem:[%s862_s3 + $0x68] sm:$0xf0]  ;;  %v573_v48 = vld [vmem:[%s862_s3 + $0xe4] sm:$0xf]  ;;  %v516_v51 = vor.u32 %v572_v44, %v515_v41  ;;  %v443_v52 = vld [vmem:[%s862_s3 + $0x40] sm:$0xf] }
   0xd   :  { %99 = vmatpush.bf16.msra.mxu1 %v390_v27  ;;  %322 = vmatpush.bf16.msra.mxu3 %v524_v37  ;;  %v525_v50 = vld [vmem:[%s862_s3 + $0xe8] sm:$0xf0]  ;;  %v554_v53 = vld [vmem:[%s862_s3 + $0x44] sm:$0xf0]  ;;  %v21_v54 = vld [vmem:[%s863_s0] sm:$0x1]  ;;  %v464_v57 = vor.u32 %v557_v46, %v461_v47 }
   0xe   :  { %v507_v55 = vld [vmem:[%s862_s3 + $0xc0] sm:$0xf]  ;;  %v570_v56 = vld [vmem:[%s862_s3 + $0xc4] sm:$0xf0]  ;;  %v528_v58 = vor.u32 %v573_v48, %v525_v50  ;;  %v555_v59 = vld [vmem:[%s862_s3 + $0x54] sm:$0xf]  ;;  %v444_v62 = vor.u32 %v554_v53, %v443_v52 }
   0xf   :  { %v453_v60 = vld [vmem:[%s862_s3 + $0x58] sm:$0xf0]  ;;  %v571_v61 = vld [vmem:[%s862_s3 + $0xd4] sm:$0xf]  ;;  %v508_v0 = vor.u32 %v570_v56, %v507_v55  ;;  %v435_v1 = vld [vmem:[%s862_s3 + $0x30] sm:$0xf] }
  0x10   :  { %87 = vmatpush.bf16.msra.mxu0 %v378_v38  ;;  %310 = vmatpush.bf16.msra.mxu2 %v452_v49  ;;  %v517_v63 = vld [vmem:[%s862_s3 + $0xd8] sm:$0xf0]  ;;  %v552_v2 = vld [vmem:[%s862_s3 + $0x34] sm:$0xf0]  ;;  %v499_v3 = vld [vmem:[%s862_s3 + $0xb0] sm:$0xf]  ;;  %v456_v5 = vor.u32 %v555_v59, %v453_v60 }
  0x11   :  { %100 = vmatpush.bf16.msra.mxu1 %v382_v42  ;;  %323 = vmatpush.bf16.msra.mxu3 %v516_v51  ;;  %v568_v4 = vld [vmem:[%s862_s3 + $0xb4] sm:$0xf0]  ;;  %v520_v6 = vor.u32 %v571_v61, %v517_v63  ;;  %v553_v7 = vld [vmem:[%s862_s3 + $0x44] sm:$0xf]  ;;  %v445_v8 = vld [vmem:[%s862_s3 + $0x48] sm:$0xf0]  ;;  %v436_v10 = vor.u32 %v552_v2, %v435_v1 }
  0x12   :  { %v569_v9 = vld [vmem:[%s862_s3 + $0xc4] sm:$0xf]  ;;  %v509_v11 = vld [vmem:[%s862_s3 + $0xc8] sm:$0xf0]  ;;  %v500_v12 = vor.u32 %v568_v4, %v499_v3  ;;  %v427_v13 = vld [vmem:[%s862_s3 + $0x20] sm:$0xf]  ;;  %v448_v17 = vor.u32 %v553_v7, %v445_v8 }
  0x13   :  { %407 = vmatmul.msk.bf16.vlgmr.msra.gmra.mxu0 %vm76_vm0, %v21_v54  ;;  %v550_v14 = vld [vmem:[%s862_s3 + $0x24] sm:$0xf0]  ;;  %v491_v15 = vld [vmem:[%s862_s3 + $0xa0] sm:$0xf]  ;;  %v512_v18 = vor.u32 %v569_v9, %v509_v11  ;;  %v551_v19 = vld [vmem:[%s862_s3 + $0x34] sm:$0xf] }
  0x14   :  { %334 = vmatpush.bf16.msrb.mxu0 %v472_v43  ;;  %408 = vmatmul.msk.bf16.vlgmr.msra.gmra.mxu1 %vm76_vm0, %v21_v54  ;;  %v566_v16 = vld [vmem:[%s862_s3 + $0xa4] sm:$0xf0]  ;;  %v437_v20 = vld [vmem:[%s862_s3 + $0x38] sm:$0xf0]  ;;  %v428_v21 = vor.u32 %v550_v14, %v427_v13  ;;  %v567_v22 = vld [vmem:[%s862_s3 + $0xb4] sm:$0xf] }
  0x15   :  { %347 = vmatpush.bf16.msrb.mxu1 %v536_v45  ;;  %311 = vmatpush.bf16.msra.mxu2 %v444_v62  ;;  %v501_v23 = vld [vmem:[%s862_s3 + $0xb8] sm:$0xf0]  ;;  %v492_v24 = vor.u32 %v566_v16, %v491_v15  ;;  %v440_v25 = vor.u32 %v551_v19, %v437_v20  ;;  %v549_v27 = vld [vmem:[%s862_s3 + $0x24] sm:$0xf]  ;;  %v429_v28 = vld [vmem:[%s862_s3 + $0x28] sm:$0xf0] }
  0x16   :  { %324 = vmatpush.bf16.msra.mxu3 %v508_v0  ;;  %v504_v26 = vor.u32 %v567_v22, %v501_v23  ;;  %v565_v29 = vld [vmem:[%s862_s3 + $0xa4] sm:$0xf]  ;;  %v493_v30 = vld [vmem:[%s862_s3 + $0xa8] sm:$0xf0]  ;;  %v432_v31 = vor.u32 %v549_v27, %v429_v28  ;;  %v419_v33 = vld [vmem:[%s862_s3 + $0x10] sm:$0xf] }
  0x17   :  { %v496_v32 = vor.u32 %v565_v29, %v493_v30  ;;  %v548_v34 = vld [vmem:[%s862_s3 + $0x14] sm:$0xf0]  ;;  %v483_v35 = vld [vmem:[%s862_s3 + $0x90] sm:$0xf]  ;;  %v547_v38 = vld [vmem:[%s862_s3 + $0x14] sm:$0xf] }
  0x18   :  { %335 = vmatpush.bf16.msrb.mxu0 %v464_v57  ;;  %v420_v36 = vor.u32 %v548_v34, %v419_v33  ;;  %v564_v37 = vld [vmem:[%s862_s3 + $0x94] sm:$0xf0]  ;;  %v421_v39 = vld [vmem:[%s862_s3 + $0x18] sm:$0xf0]  ;;  %v563_v42 = vld [vmem:[%s862_s3 + $0x94] sm:$0xf] }
  0x19   :  { %348 = vmatpush.bf16.msrb.mxu1 %v528_v58  ;;  %312 = vmatpush.bf16.msra.mxu2 %v436_v10  ;;  %v484_v40 = vor.u32 %v564_v37, %v483_v35  ;;  %v424_v41 = vor.u32 %v547_v38, %v421_v39  ;;  %v485_v43 = vld [vmem:[%s862_s3 + $0x98] sm:$0xf0]  ;;  %v411_v45 = vld [vmem:[%s862_s3] sm:$0xf]  ;;  %v546_v46 = vld [vmem:[%s862_s3 + $0x4] sm:$0xf0] }
  0x1a   :  { %325 = vmatpush.bf16.msra.mxu3 %v500_v12  ;;  %v488_v44 = vor.u32 %v563_v42, %v485_v43  ;;  %v475_v47 = vld [vmem:[%s862_s3 + $0x80] sm:$0xf]  ;;  %v412_v48 = vor.u32 %v546_v46, %v411_v45  ;;  %v562_v49 = vld [vmem:[%s862_s3 + $0x84] sm:$0xf0]  ;;  %v545_v50 = vld [vmem:[%s862_s3 + $0x4] sm:$0xf] }
  0x1b   :  { %v413_v51 = vld [vmem:[%s862_s3 + $0x8] sm:$0xf0]  ;;  %v476_v52 = vor.u32 %v562_v49, %v475_v47  ;;  %v561_v54 = vld [vmem:[%s862_s3 + $0x84] sm:$0xf]  ;;  %v30_v57 = vld [vmem:[%s864_s2] sm:$0x3] }
  0x1c   :  { %336 = vmatpush.bf16.msrb.mxu0 %v456_v5  ;;  %v416_v53 = vor.u32 %v545_v50, %v413_v51  ;;  %v477_v55 = vld [vmem:[%s862_s3 + $0x88] sm:$0xf0]  ;;  %v32_v58 = vperm.slane %v30_v57, 0  ;;  %v33_v59 = vperm.slane %v30_v57, 1 }
  0x1d   :  { %349 = vmatpush.bf16.msrb.mxu1 %v520_v6  ;;  %313 = vmatpush.bf16.msra.mxu2 %v428_v21  ;;  %v480_v56 = vor.u32 %v561_v54, %v477_v55  ;;  %v142_v6 = vld [vmem:[%s865_s4] sm:$0x3] }
  0x1e   :  { %326 = vmatpush.bf16.msra.mxu3 %v492_v24  ;;  %v145_v7 = vperm.slane %v142_v6, 1  ;;  %v144_v11 = vperm.slane %v142_v6, 0 }
  0x20   :  { %337 = vmatpush.bf16.msrb.mxu0 %v448_v17 }
  0x21   :  { %350 = vmatpush.bf16.msrb.mxu1 %v512_v18  ;;  %314 = vmatpush.bf16.msra.mxu2 %v420_v36 }
  0x22   :  { %327 = vmatpush.bf16.msra.mxu3 %v484_v40 }
  0x24   :  { %338 = vmatpush.bf16.msrb.mxu0 %v440_v25 }
  0x25   :  { %351 = vmatpush.bf16.msrb.mxu1 %v504_v26  ;;  %315 = vmatpush.bf16.msra.mxu2 %v412_v48 }
  0x26   :  { %328 = vmatpush.bf16.msra.mxu3 %v476_v52 }
  0x28   :  { %339 = vmatpush.bf16.msrb.mxu0 %v432_v31 }
  0x29   :  { %352 = vmatpush.bf16.msrb.mxu1 %v496_v32 }
  0x2c   :  { %340 = vmatpush.bf16.msrb.mxu0 %v424_v41 }
  0x2d   :  { %353 = vmatpush.bf16.msrb.mxu1 %v488_v44 }
  0x30   :  { %341 = vmatpush.bf16.msrb.mxu0 %v416_v53 }
  0x31   :  { %354 = vmatpush.bf16.msrb.mxu1 %v480_v56 }
  0x90   :  { %v89_v60 = vpop.f32.mrf.mxu0 }
  0x91   :  { %v90_v61 = vadd.f32 %v89_v60, %v32_v58  ;;  %v102_v62 = vpop.f32.mrf.mxu1 }
  0x92   :  { %v103_v63 = vadd.f32 %v102_v62, %v33_v59 }
  0x93   :  { %v106_v0 = vmax.f32 %v90_v61, 0.0 }
  0x94   :  { %v107_v1 = vmax.f32 %v103_v63, 0.0 }
  0x95   :  { %v108_v2 = vpack.c.bf16 %v106_v0, %v106_v0 }
  0x96   :  { %v109_v3 = vpack.c.bf16 %v107_v1, %v107_v1 }
  0x97   :  { %316 = vmatmul.bf16.vlgmr.msra.gmra.mxu2 %v108_v2  ;;  %342 = vmatmul.bf16.vlgmr.msrb.gmra.mxu0 %v108_v2 }
  0x98   :  { %329 = vmatmul.bf16.vlgmr.msra.gmra.mxu3 %v109_v3  ;;  %355 = vmatmul.bf16.vlgmr.msrb.gmra.mxu1 %v109_v3  ;;  %v91_v4 = vpop.f32.mrf.mxu0 }
  0x99   :  { %v104_v5 = vpop.f32.mrf.mxu1 }
 0x114   :  { %v343_v8 = vpop.f32.mrf.mxu0 }
 0x115   :  { %v356_v9 = vpop.f32.mrf.mxu1  ;;  %v344_v10 = vadd.f32 %v343_v8, %v145_v7 }
 0x117   :  { %v357_v13 = vadd.f32 %v356_v9, %v344_v10 }
 0x119   :  { %v361_v19 = vmax.f32 %v357_v13, 0.0 }
 0x11a   :  { %v317_v12 = vpop.f32.mrf.mxu2 }
 0x11b   :  { %v318_v14 = vadd.f32 %v317_v12, %v144_v11  ;;  %v330_v15 = vpop.f32.mrf.mxu3 }
 0x11c   :  { %v345_v16 = vpop.f32.mrf.mxu0 }
 0x11d   :  { %v331_v17 = vadd.f32 %v330_v15, %v318_v14  ;;  %v358_v18 = vpop.f32.mrf.mxu1 }
 0x11f   :  { %v360_v20 = vmax.f32 %v331_v17, 0.0 }
 0x121   :  { %v362_v21 = vpack.c.bf16 %v361_v19, %v360_v20 }
 0x122   :  { %v319_v22 = vpop.f32.mrf.mxu2 }
 0x123   :  { %v364_v23 = vrot.slane %v362_v21, 3  ;;  %v332_v24 = vpop.f32.mrf.mxu3 }
 0x125   :  { %v368_v25 = vsel %vm365_vm1, %v362_v21, %v364_v23 }
 0x126   :  { %370 = vst [vmem:[%s866_s5] sm:$0x3] %v368_v25 }

// kernel: _lambda_.40
= control target key start
LH: loop header
LB: loop body
LE: loop exit
PB: predicated region body
PF: predicated region fallthrough
CT: control target
= control target key end

     0   :  { %vm58_vm0 = vcmask 523264   ;;  %vm76_vm1 = vcmask 392192   ;;  %s154_s1 = inlined_call_operand.vmem [shape: bf16[64,48], index: 1, kind: input, shape index: {}]   ;;  %s155_s2 = inlined_call_operand.vmem [shape: f32[1,48], index: 2, kind: input, shape index: {}]   ;;  %s156_s0 = inlined_call_operand.vmem [shape: bf16[16,64], index: 0, kind: input, shape index: {}]   ;;  %s157_s3 = inlined_call_operand.vmem [shape: f32[16,48], index: 3, kind: output, shape index: {}]  }
   0x1   :  { %v108_v0 = vld [vmem:[%s154_s1 + $0x18] sm:$0xff]  ;;  %v107_v1 = vld [vmem:[%s154_s1 + $0x10] sm:$0xff]  ;;  %v106_v2 = vld [vmem:[%s154_s1 + $0x8] sm:$0xff] }
   0x2   :  { %66 = vmatpush.bf16.msra.mxu0 %v108_v0  ;;  %v105_v3 = vld [vmem:[%s154_s1] sm:$0xff] }
   0x3   :  { %v104_v4 = vld [vmem:[%s156_s0] sm:$0xff] }
   0x4   :  { %v109_v5 = vld [vmem:[%s155_s2] ss:$0 sm:$0xff] }
   0x6   :  { %67 = vmatpush.bf16.msra.mxu0 %v107_v1 }
   0xa   :  { %68 = vmatpush.bf16.msra.mxu0 %v106_v2 }
   0xe   :  { %69 = vmatpush.bf16.msra.mxu0 %v105_v3 }
  0x11   :  { %103 = vmatmul.msk.bf16.vlgmr.msra.gmra.mxu0 %vm58_vm0, %v104_v4 }
  0x8e   :  { %v71_v6 = vpop.f32.mrf.mxu0 }
  0x8f   :  { %v72_v7 = vadd.f32 %v109_v5, %v71_v6 }
  0x91   :  { %77 = vst.msk [vmem:[%s157_s3] sm:$0xff] %vm76_vm1, %v72_v7 }
  0x96   :  { %v73_v8 = vpop.f32.mrf.mxu0 }
  0x97   :  { %v74_v9 = vadd.f32 %v109_v5, %v73_v8 }
  0x99   :  { %78 = vst.msk [vmem:[%s157_s3 + $0x8] sm:$0xff] %vm76_vm1, %v74_v9 }

// kernel: _lambda_.41
= control target key start
LH: loop header
LB: loop body
LE: loop exit
PB: predicated region body
PF: predicated region fallthrough
CT: control target
= control target key end

     0   :  { %s1324_s12 = smov 0   ;;  %s1917_s0 = inlined_call_operand.vmem [shape: f32[16,16,3], index: 0, kind: input, shape index: {}]   ;;  %s1918_s1 = inlined_call_operand.vmem [shape: f32[16,16,3], index: 1, kind: input, shape index: {}]   ;;  %s1919_s2 = inlined_call_operand.vmem [shape: f32[16,16], index: 2, kind: output, shape index: {0}]   ;;  %s1920_s3 = inlined_call_operand.vmem [shape: f32[16,16], index: 3, kind: output, shape index: {1}]  }
   0x1 LB: > { %s1330_s13 = sadd.s32 4294967295, %s1299_s12   ;;  %p1260_p0 = scmp.ge.s32.totalorder %s1299_s12, 1  ;;  %s1299_s12 = sphi %s1324_s12, %s14_s12  }
   0x2   : > { %p154_p1 = scmp.lt.s32.totalorder %s1299_s12, 3 }
   0x4   : > { %p155_p2 = pnand %p1260_p0, %p154_p1 }
   0x6   : > { %158 = sbr.rel (%p155_p2) target bundleno = 523 (0x20b), region = 28 }
   0xb   : > { %s1261_s14 = sshll.u32 %s1330_s13, 3  ;;  %v1301_v0 = vmov 0   ;;  %v1302_v33 = vmov 1   ;;  %v386_v49 = vlaneseq  ;;  %vm391_vm0 = vcmask 130112   ;;  %p202_p4 = scmp.lt.s32.totalorder %s1330_s13, 1 }
   0xc   : > { %1286 = vset.pattern.permute.xlu2 %v1301_v0  ;;  %1285 = vset.pattern.permute.xlu1 %v1301_v0  ;;  %p189_p3 = scmp.lt.s32.totalorder %s1261_s14, 15  ;;  %vm989_vm1 = vcmask 130048   ;;  %vm414_vm2 = vcmask 1041409   ;;  %vm415_vm3 = vcmask 1042434   ;;  %vm417_vm4 = vcmask 1043459  }
   0xd   : > { %1284 = vset.pattern.permute.xlu0 %v1301_v0  ;;  %v1519_v52 = vand.u32 127, %v386_v49  ;;  %vm419_vm5 = vcmask 1044484   ;;  %vm421_vm6 = vcmask 1045509   ;;  %vm423_vm7 = vcmask 1046534   ;;  %s1926_s13 = smov (!%p202_p4, %s1330_s13), 1 }
   0xe   : > { %s1924_s14 = smov (!%p189_p3, %s1261_s14), 15  ;;  %s1267_s22 = sshll.u32 %s1926_s13, 3  ;;  %vm425_vm8 = vcmask 1047559  }
   0xf   : > { %s1271_s15 = sshll.u32 %s1924_s14, 4  ;;  %v1524_v54 = vadd.s32 4294967288, %v1519_v52  ;;  %s209_s25 = scalar_lea.vmem %s1920_s3, %s1267_s22 }
  0x10   : > { %s1343_s18 = scalar_lea.vmem %s1917_s0, %s1271_s15  ;;  %s1410_s21 = scalar_lea.vmem %s1918_s1, %s1271_s15 }
  0x11   : > { %v1346_v1 = vld [vmem:[%s1343_s18 + $0x20] sm:$0xff]  ;;  %v1349_v2 = vld [vmem:[%s1343_s18 + $0x10] sm:$0xff]  ;;  %v1358_v4 = vld [vmem:[%s1343_s18 + $0x28] sm:$0xff]  ;;  %s205_s28 = scalar_lea.vmem %s1919_s2, %s1267_s22 }
  0x12   : > { %v1352_v3 = vld [vmem:[%s1343_s18] sm:$0xff]  ;;  %264 = vperm.xlu2 %1286, %v1346_v1   ;;  %254 = vperm.xlu1 %1285, %v1349_v2   ;;  %v1361_v5 = vld [vmem:[%s1343_s18 + $0x18] sm:$0xff]  ;;  %v1364_v6 = vld [vmem:[%s1343_s18 + $0x8] sm:$0xff] }
  0x13   : > { %244 = vperm.xlu0 %1284, %v1352_v3   ;;  %v1370_v7 = vld [vmem:[%s1343_s18 + $0x40] sm:$0xff]  ;;  %v1373_v8 = vld [vmem:[%s1343_s18 + $0x38] sm:$0xff]  ;;  %v1376_v9 = vld [vmem:[%s1343_s18 + $0x30] sm:$0xff] }
  0x14   : > { %v1382_v10 = vld [vmem:[%s1343_s18 + $0x58] sm:$0xff]  ;;  %v1385_v11 = vld [vmem:[%s1343_s18 + $0x50] sm:$0xff]  ;;  %v1388_v12 = vld [vmem:[%s1343_s18 + $0x48] sm:$0xff] }
  0x15   : > { %v1394_v13 = vld [vmem:[%s1343_s18 + $0x70] sm:$0xff]  ;;  %v1397_v14 = vld [vmem:[%s1343_s18 + $0x68] sm:$0xff]  ;;  %v1400_v15 = vld [vmem:[%s1343_s18 + $0x60] sm:$0xff] }
  0x16   : > { %v1413_v16 = vld [vmem:[%s1410_s21 + $0x8] sm:$0xff]  ;;  %v1416_v17 = vld [vmem:[%s1410_s21] sm:$0xff]  ;;  %v1419_v18 = vld [vmem:[%s1343_s18 + $0x78] sm:$0xff] }
  0x17   : > { %v1425_v19 = vld [vmem:[%s1410_s21 + $0x20] sm:$0xff]  ;;  %v1428_v20 = vld [vmem:[%s1410_s21 + $0x18] sm:$0xff]  ;;  %v1431_v21 = vld [vmem:[%s1410_s21 + $0x10] sm:$0xff] }
  0x18   : > { %v1437_v22 = vld [vmem:[%s1410_s21 + $0x38] sm:$0xff]  ;;  %v1440_v23 = vld [vmem:[%s1410_s21 + $0x30] sm:$0xff]  ;;  %v1443_v24 = vld [vmem:[%s1410_s21 + $0x28] sm:$0xff] }
  0x19   : > { %v1449_v25 = vld [vmem:[%s1410_s21 + $0x50] sm:$0xff]  ;;  %v1452_v26 = vld [vmem:[%s1410_s21 + $0x48] sm:$0xff]  ;;  %v1455_v27 = vld [vmem:[%s1410_s21 + $0x40] sm:$0xff] }
  0x1a   : > { %269 = vperm.xlu2 %1286, %v1358_v4   ;;  %259 = vperm.xlu1 %1285, %v1361_v5   ;;  %v1461_v28 = vld [vmem:[%s1410_s21 + $0x68] sm:$0xff]  ;;  %v1464_v29 = vld [vmem:[%s1410_s21 + $0x60] sm:$0xff]  ;;  %v1467_v30 = vld [vmem:[%s1410_s21 + $0x58] sm:$0xff] }
  0x1b   : > { %249 = vperm.xlu0 %1284, %v1364_v6   ;;  %v1473_v31 = vld [vmem:[%s1410_s21 + $0x78] sm:$0xff]  ;;  %v1476_v32 = vld [vmem:[%s1410_s21 + $0x70] sm:$0xff] }
  0x22   : > { %284 = vperm.xlu2 %1286, %v1370_v7   ;;  %279 = vperm.xlu1 %1285, %v1373_v8  }
  0x23   : > { %274 = vperm.xlu0 %1284, %v1376_v9  }
  0x2a   : > { %299 = vperm.xlu2 %1286, %v1382_v10   ;;  %294 = vperm.xlu1 %1285, %v1385_v11  }
  0x2b   : > { %289 = vperm.xlu0 %1284, %v1388_v12  }
  0x32   : > { %314 = vperm.xlu2 %1286, %v1394_v13   ;;  %309 = vperm.xlu1 %1285, %v1397_v14  }
  0x33   : > { %304 = vperm.xlu0 %1284, %v1400_v15  }
  0x3a   : > { %342 = vperm.xlu2 %1286, %v1413_v16   ;;  %339 = vperm.xlu1 %1285, %v1416_v17  }
  0x3b   : > { %319 = vperm.xlu0 %1284, %v1419_v18  }
  0x42   : > { %351 = vperm.xlu2 %1286, %v1425_v19   ;;  %348 = vperm.xlu1 %1285, %v1428_v20  }
  0x43   : > { %345 = vperm.xlu0 %1284, %v1431_v21  }
  0x4a   : > { %360 = vperm.xlu2 %1286, %v1437_v22   ;;  %357 = vperm.xlu1 %1285, %v1440_v23  }
  0x4b   : > { %354 = vperm.xlu0 %1284, %v1443_v24  }
  0x52   : > { %369 = vperm.xlu2 %1286, %v1449_v25   ;;  %366 = vperm.xlu1 %1285, %v1452_v26  }
  0x53   : > { %363 = vperm.xlu0 %1284, %v1455_v27  }
  0x5a   : > { %378 = vperm.xlu2 %1286, %v1461_v28   ;;  %375 = vperm.xlu1 %1285, %v1464_v29  }
  0x5b   : > { %372 = vperm.xlu0 %1284, %v1467_v30  }
  0x62   : > { %1287 = vset.pattern.permute.xlu2 %v1302_v33  ;;  %384 = vperm.xlu1 %1285, %v1473_v31  }
  0x63   : > { %381 = vperm.xlu0 %1284, %v1476_v32   ;;  %510 = vperm.xlu2 %1287, %v1352_v3  }
  0x6a   : > { %1289 = vset.pattern.permute.xlu1 %v1302_v33 }
  0x6b   : > { %1288 = vset.pattern.permute.xlu0 %v1302_v33  ;;  %518 = vperm.xlu1 %1289, %v1349_v2  }
  0x6c   : > { %522 = vperm.xlu2 %1287, %v1361_v5   ;;  %514 = vperm.xlu0 %1288, %v1364_v6   ;;  %v1484_v34 = vpop.permute.xlu2 %264 }
  0x73   : > { %526 = vperm.xlu1 %1289, %v1346_v1  }
  0x74   : > { %530 = vperm.xlu2 %1287, %v1358_v4   ;;  %534 = vperm.xlu0 %1288, %v1376_v9   ;;  %v1489_v35 = vpop.permute.xlu2 %269 }
  0x7b   : > { %538 = vperm.xlu1 %1289, %v1373_v8  }
  0x7c   : > { %542 = vperm.xlu2 %1287, %v1370_v7   ;;  %546 = vperm.xlu0 %1288, %v1388_v12   ;;  %v1494_v36 = vpop.permute.xlu2 %284 }
  0x83   : > { %550 = vperm.xlu1 %1289, %v1385_v11  }
  0x84   : > { %554 = vperm.xlu2 %1287, %v1382_v10   ;;  %558 = vperm.xlu0 %1288, %v1400_v15   ;;  %v1499_v37 = vpop.permute.xlu2 %299  ;;  %v255_v38 = vpop.permute.xlu1 %254 }
  0x85   : > { %v245_v39 = vpop.permute.xlu0 %244 }
  0x8b   : > { %562 = vperm.xlu1 %1289, %v1397_v14  }
  0x8c   : > { %566 = vperm.xlu2 %1287, %v1394_v13   ;;  %570 = vperm.xlu0 %1288, %v1419_v18   ;;  %v1504_v40 = vpop.permute.xlu2 %314  ;;  %v260_v41 = vpop.permute.xlu1 %259 }
  0x8d   : > { %1921 = vst [vmem:[#allocation2_spill] sm:$0xff] %v1504_v40  ;;  %v250_v42 = vpop.permute.xlu0 %249 }
  0x93   : > { %574 = vperm.xlu1 %1289, %v1416_v17  }
  0x94   : > { %577 = vperm.xlu2 %1287, %v1413_v16   ;;  %580 = vperm.xlu0 %1288, %v1431_v21   ;;  %v343_v43 = vpop.permute.xlu2 %342  ;;  %v280_v44 = vpop.permute.xlu1 %279 }
  0x95   : > { %v275_v45 = vpop.permute.xlu0 %274  ;;  %v390_v57 = vperm.slane %v343_v43, %v1524_v54 }
  0x9b   : > { %583 = vperm.xlu1 %1289, %v1428_v20  }
  0x9c   : > { %586 = vperm.xlu2 %1287, %v1425_v19   ;;  %589 = vperm.xlu0 %1288, %v1443_v24   ;;  %v352_v46 = vpop.permute.xlu2 %351  ;;  %v1512_v47 = vpop.permute.xlu1 %294 }
  0x9d   : > { %v290_v48 = vpop.permute.xlu0 %289 }
  0xa3   : > { %592 = vperm.xlu1 %1289, %v1440_v23  }
  0xa4   : > { %595 = vperm.xlu2 %1287, %v1437_v22   ;;  %598 = vperm.xlu0 %1288, %v1455_v27   ;;  %v361_v50 = vpop.permute.xlu2 %360  ;;  %v1517_v51 = vpop.permute.xlu1 %309 }
  0xa5   : > { %v1521_v53 = vpop.permute.xlu0 %304 }
  0xab   : > { %601 = vperm.xlu1 %1289, %v1452_v26  }
  0xac   : > { %604 = vperm.xlu2 %1287, %v1449_v25   ;;  %607 = vperm.xlu0 %1288, %v1467_v30   ;;  %v1529_v55 = vpop.permute.xlu2 %369  ;;  %v340_v56 = vpop.permute.xlu1 %339 }
  0xad   : > { %v388_v58 = vperm.slane %v340_v56, %v1519_v52  ;;  %v1533_v59 = vpop.permute.xlu0 %319 }
  0xaf   : > { %v392_v60 = vsel %vm391_vm0, %v390_v57, %v388_v58 }
  0xb0   : > { %v1536_v61 = vsub.f32 %v245_v39, %v392_v60  ;;  %v1538_v62 = vsub.f32 %v250_v42, %v392_v60  ;;  %v1303_v42 = vmov 2   ;;  %v400_v60 = vperm.slane %v361_v50, %v1524_v54 }
  0xb3   : > { %610 = vperm.xlu1 %1289, %v1464_v29  }
  0xb4   : > { %613 = vperm.xlu2 %1287, %v1461_v28   ;;  %616 = vperm.xlu0 %1288, %v1476_v32   ;;  %v379_v63 = vpop.permute.xlu2 %378  ;;  %v349_v0 = vpop.permute.xlu1 %348 }
  0xb5   : > { %v394_v33 = vperm.slane %v349_v0, %v1524_v54  ;;  %v346_v43 = vpop.permute.xlu0 %345 }
  0xb6   : > { %v393_v49 = vperm.slane %v346_v43, %v1519_v52 }
  0xb8   : > { %v395_v56 = vsel %vm391_vm0, %v394_v33, %v393_v49 }
  0xb9   : > { %v1546_v57 = vsub.f32 %v255_v38, %v395_v56  ;;  %v1548_v39 = vsub.f32 %v260_v41, %v395_v56  ;;  %v396_v38 = vperm.slane %v352_v46, %v1519_v52 }
  0xbb   : > { %619 = vperm.xlu1 %1289, %v1473_v31  }
  0xbc   : > { %1290 = vset.pattern.permute.xlu2 %v1303_v42  ;;  %1291 = vset.pattern.permute.xlu0 %v1303_v42  ;;  %v358_v58 = vpop.permute.xlu1 %357 }
  0xbd   : > { %v399_v40 = vperm.slane %v358_v58, %v1519_v52  ;;  %750 = vperm.xlu2 %1290, %v1352_v3   ;;  %754 = vperm.xlu0 %1291, %v1364_v6   ;;  %v355_v0 = vpop.permute.xlu0 %354  ;;  %v1555_v33 = vpop.permute.xlu2 %510 }
  0xbe   : > { %v397_v41 = vperm.slane %v355_v0, %v1524_v54 }
  0xbf   : > { %v401_v43 = vsel %vm391_vm0, %v400_v60, %v399_v40  ;;  %v405_v60 = vperm.slane %v1529_v55, %v1519_v52 }
  0xc0   : > { %v1560_v49 = vsub.f32 %v275_v45, %v401_v43  ;;  %v1562_v56 = vsub.f32 %v280_v44, %v401_v43  ;;  %v1565_v50 = vsel %vm391_vm0, %v397_v41, %v396_v38 }
  0xc3   : > { %1292 = vset.pattern.permute.xlu1 %v1303_v42  ;;  %v409_v42 = vperm.slane %v379_v63, %v1524_v54 }
  0xc4   : > { %758 = vperm.xlu1 %1292, %v1349_v2   ;;  %v367_v3 = vpop.permute.xlu1 %366 }
  0xc5   : > { %v403_v6 = vperm.slane %v367_v3, %v1524_v54  ;;  %762 = vperm.xlu2 %1290, %v1361_v5   ;;  %774 = vperm.xlu0 %1291, %v1376_v9   ;;  %v364_v46 = vpop.permute.xlu0 %363 }
  0xc6   : > { %v402_v40 = vperm.slane %v364_v46, %v1519_v52  ;;  %v1572_v45 = vpop.permute.xlu2 %522 }
  0xc8   : > { %v1575_v44 = vsel %vm391_vm0, %v403_v6, %v402_v40 }
  0xc9   : > { %v1578_v58 = vsub.f32 %v290_v48, %v1575_v44 }
  0xcc   : > { %766 = vperm.xlu1 %1292, %v1346_v1   ;;  %v376_v2 = vpop.permute.xlu1 %375 }
  0xcd   : > { %v408_v5 = vperm.slane %v376_v2, %v1519_v52  ;;  %770 = vperm.xlu2 %1290, %v1358_v4   ;;  %786 = vperm.xlu0 %1291, %v1388_v12   ;;  %v373_v9 = vpop.permute.xlu0 %372 }
  0xce   : > { %v406_v0 = vperm.slane %v373_v9, %v1524_v54  ;;  %v1588_v38 = vpop.permute.xlu2 %530 }
  0xcf   : > { %v410_v48 = vsel %vm391_vm0, %v409_v42, %v408_v5 }
  0xd0   : > { %v1592_v1 = vsub.f32 %v1521_v53, %v410_v48  ;;  %v1595_v63 = vsub.f32 %v1517_v51, %v410_v48  ;;  %v1598_v4 = vsel %vm391_vm0, %v406_v0, %v405_v60 }
  0xd1   : > { %v1602_v12 = vsub.f32 %v1512_v47, %v1598_v4 }
  0xd4   : > { %778 = vperm.xlu1 %1292, %v1373_v8   ;;  %v385_v55 = vpop.permute.xlu1 %384 }
  0xd5   : > { %v412_v41 = vperm.slane %v385_v55, %v1524_v54  ;;  %782 = vperm.xlu2 %1290, %v1370_v7   ;;  %798 = vperm.xlu0 %1291, %v1400_v15   ;;  %v382_v53 = vpop.permute.xlu0 %381 }
  0xd6   : > { %v411_v51 = vperm.slane %v382_v53, %v1519_v52  ;;  %v1609_v43 = vpop.permute.xlu2 %542 }
  0xd8   : > { %v1612_v3 = vsel %vm391_vm0, %v412_v41, %v411_v51 }
  0xd9   : > { %v1616_v47 = vsub.f32 %v1533_v59, %v1612_v3 }
  0xdc   : > { %790 = vperm.xlu1 %1292, %v1385_v11  }
  0xdd   : > { %794 = vperm.xlu2 %1290, %v1382_v10   ;;  %810 = vperm.xlu0 %1291, %v1419_v18   ;;  %v519_v7 = vpop.permute.xlu1 %518 }
  0xde   : > { %v1621_v8 = vpop.permute.xlu2 %554  ;;  %v515_v15 = vpop.permute.xlu0 %514 }
  0xe4   : > { %802 = vperm.xlu1 %1292, %v1397_v14  }
  0xe5   : > { %806 = vperm.xlu2 %1290, %v1394_v13   ;;  %820 = vperm.xlu0 %1291, %v1431_v21   ;;  %v527_v6 = vpop.permute.xlu1 %526 }
  0xe6   : > { %v1626_v46 = vpop.permute.xlu2 %566  ;;  %v1628_v59 = vpop.permute.xlu0 %534 }
  0xec   : > { %814 = vperm.xlu1 %1292, %v1416_v17  }
  0xed   : > { %817 = vperm.xlu2 %1290, %v1413_v16   ;;  %829 = vperm.xlu0 %1291, %v1443_v24   ;;  %v1633_v10 = vpop.permute.xlu1 %538 }
  0xee   : > { %v578_v11 = vpop.permute.xlu2 %577  ;;  %v1635_v18 = vpop.permute.xlu0 %546 }
  0xf4   : > { %823 = vperm.xlu1 %1292, %v1428_v20   ;;  %v622_v20 = vperm.slane %v578_v11, %v1524_v54 }
  0xf5   : > { %826 = vperm.xlu2 %1290, %v1425_v19   ;;  %838 = vperm.xlu0 %1291, %v1455_v27   ;;  %v1640_v13 = vpop.permute.xlu1 %550 }
  0xf6   : > { %v587_v14 = vpop.permute.xlu2 %586  ;;  %v1642_v21 = vpop.permute.xlu0 %558 }
  0xf7   : > { %v627_v55 = vperm.slane %v587_v14, %v1519_v52  ;;  %v496_v14 = vmul.f32 %v1548_v39, %v1548_v39 }
  0xfc   : > { %832 = vperm.xlu1 %1292, %v1440_v23  }
  0xfd   : > { %835 = vperm.xlu2 %1290, %v1437_v22   ;;  %847 = vperm.xlu0 %1291, %v1467_v30   ;;  %v1647_v16 = vpop.permute.xlu1 %562 }
  0xfe   : > { %v596_v17 = vpop.permute.xlu2 %595  ;;  %v1649_v24 = vpop.permute.xlu0 %570 }
 0x104   : > { %841 = vperm.xlu1 %1292, %v1452_v26   ;;  %v493_v26 = vmul.f32 %v1536_v61, %v1536_v61 }
 0x105   : > { %844 = vperm.xlu2 %1290, %v1449_v25   ;;  %856 = vperm.xlu0 %1291, %v1476_v32   ;;  %v575_v19 = vpop.permute.xlu1 %574  ;;  %v494_v25 = vmul.f32 %v1538_v62, %v1538_v62 }
 0x106   : > { %v621_v23 = vperm.slane %v575_v19, %v1519_v52  ;;  %v1656_v27 = vpop.permute.xlu2 %604  ;;  %v581_v22 = vpop.permute.xlu0 %580 }
 0x108   : > { %v623_v30 = vsel %vm391_vm0, %v622_v20, %v621_v23 }
 0x109   : > { %v701_v40 = vsub.f32 %v1555_v33, %v623_v30  ;;  %v702_v2 = vsub.f32 %v515_v15, %v623_v30  ;;  %v624_v33 = vperm.slane %v581_v22, %v1519_v52 }
 0x10b   : > { %v717_v42 = vmul.f32 %v701_v40, %v701_v40  ;;  %v718_v32 = vmul.f32 %v702_v2, %v702_v2 }
 0x10c   : > { %850 = vperm.xlu1 %1292, %v1464_v29   ;;  %v481_v29 = vsub.f32 %v1484_v34, %v1565_v50  ;;  %v495_v34 = vmul.f32 %v1546_v57, %v1546_v57 }
 0x10d   : > { %853 = vperm.xlu2 %1290, %v1461_v28   ;;  %v584_v5 = vpop.permute.xlu1 %583  ;;  %v1666_v9 = vadd.f32 %v717_v42, %v493_v26  ;;  %v1668_v60 = vadd.f32 %v718_v32, %v494_v25  ;;  %v482_v28 = vsub.f32 %v1489_v35, %v1565_v50  ;;  %v499_v32 = vmul.f32 %v1560_v49, %v1560_v49 }
 0x10e   : > { %v625_v0 = vperm.slane %v584_v5, %v1524_v54  ;;  %v1672_v48 = vpop.permute.xlu2 %613  ;;  %v590_v61 = vpop.permute.xlu0 %589  ;;  %v636_v49 = vperm.slane %v1656_v27, %v1519_v52  ;;  %v502_v27 = vmul.f32 %v1578_v58, %v1578_v58 }
 0x10f   : > { %v628_v62 = vperm.slane %v590_v61, %v1524_v54  ;;  %v498_v35 = vmul.f32 %v482_v28, %v482_v28 }
 0x110   : > { %v626_v41 = vsel %vm391_vm0, %v625_v0, %v624_v33 }
 0x111   : > { %v703_v53 = vsub.f32 %v519_v7, %v626_v41  ;;  %v704_v51 = vsub.f32 %v1572_v45, %v626_v41  ;;  %v629_v15 = vsel %vm391_vm0, %v628_v62, %v627_v55  ;;  %v497_v7 = vmul.f32 %v481_v29, %v481_v29 }
 0x112   : > { %v705_v11 = vsub.f32 %v527_v6, %v629_v15  ;;  %v706_v19 = vsub.f32 %v1588_v38, %v629_v15  ;;  %v631_v38 = vperm.slane %v596_v17, %v1524_v54  ;;  %v500_v17 = vmul.f32 %v1562_v56, %v1562_v56 }
 0x113   : > { %v720_v20 = vmul.f32 %v704_v51, %v704_v51  ;;  %v719_v23 = vmul.f32 %v703_v53, %v703_v53  ;;  %v488_v41 = vsub.f32 %v1499_v37, %v1598_v4  ;;  %v503_v4 = vmul.f32 %v1602_v12, %v1602_v12 }
 0x114   : > { %859 = vperm.xlu1 %1292, %v1473_v31   ;;  %v722_v50 = vmul.f32 %v706_v19, %v706_v19  ;;  %v721_v22 = vmul.f32 %v705_v11, %v705_v11 }
 0x115   : > { %v593_v45 = vpop.permute.xlu1 %592  ;;  %v1689_v30 = vadd.f32 %v720_v20, %v496_v14  ;;  %v1691_v6 = vadd.f32 %v719_v23, %v495_v34  ;;  %v504_v34 = vmul.f32 %v488_v41, %v488_v41 }
 0x116   : > { %v630_v39 = vperm.slane %v593_v45, %v1519_v52  ;;  %v599_v40 = vpop.permute.xlu0 %598  ;;  %v1695_v2 = vadd.f32 %v722_v50, %v498_v35  ;;  %v1697_v57 = vadd.f32 %v721_v22, %v497_v7 }
 0x117   : > { %v1699_v26 = vpop.permute.xlu2 %750  ;;  %v633_v62 = vperm.slane %v599_v40, %v1519_v52 }
 0x118   : > { %v632_v31 = vsel %vm391_vm0, %v631_v38, %v630_v39  ;;  %v505_v39 = vmul.f32 %v1592_v1, %v1592_v1 }
 0x119   : > { %v707_v42 = vsub.f32 %v1628_v59, %v632_v31  ;;  %v708_v25 = vsub.f32 %v1633_v10, %v632_v31  ;;  %v485_v10 = vsub.f32 %v1494_v36, %v1575_v44 }
 0x11b   : > { %v723_v5 = vmul.f32 %v707_v42, %v707_v42  ;;  %v724_v33 = vmul.f32 %v708_v25, %v708_v25  ;;  %v501_v14 = vmul.f32 %v485_v10, %v485_v10 }
 0x11d   : > { %v602_v0 = vpop.permute.xlu1 %601  ;;  %v1708_v61 = vadd.f32 %v723_v5, %v499_v32  ;;  %v1710_v55 = vadd.f32 %v724_v33, %v500_v17 }
 0x11e   : > { %v634_v29 = vperm.slane %v602_v0, %v1524_v54  ;;  %v608_v59 = vpop.permute.xlu0 %607 }
 0x11f   : > { %v637_v28 = vperm.slane %v608_v59, %v1524_v54  ;;  %v1719_v56 = vpop.permute.xlu2 %762 }
 0x120   : > { %v635_v53 = vsel %vm391_vm0, %v634_v29, %v633_v62  ;;  %v508_v29 = vmul.f32 %v1616_v47, %v1616_v47 }
 0x121   : > { %v709_v51 = vsub.f32 %v1609_v43, %v635_v53  ;;  %v710_v15 = vsub.f32 %v1635_v18, %v635_v53  ;;  %v638_v11 = vsel %vm391_vm0, %v637_v28, %v636_v49 }
 0x122   : > { %v711_v36 = vsub.f32 %v1640_v13, %v638_v11  ;;  %v712_v44 = vsub.f32 %v1621_v8, %v638_v11  ;;  %v640_v8 = vperm.slane %v1672_v48, %v1524_v54  ;;  %v506_v48 = vmul.f32 %v1595_v63, %v1595_v63 }
 0x123   : > { %v726_v19 = vmul.f32 %v710_v15, %v710_v15  ;;  %v725_v20 = vmul.f32 %v709_v51, %v709_v51 }
 0x124   : > { %v728_v37 = vmul.f32 %v712_v44, %v712_v44  ;;  %v727_v43 = vmul.f32 %v711_v36, %v711_v36 }
 0x125   : > { %v611_v23 = vpop.permute.xlu1 %610  ;;  %v1733_v18 = vadd.f32 %v726_v19, %v502_v27  ;;  %v1735_v35 = vadd.f32 %v725_v20, %v501_v14 }
 0x126   : > { %v639_v13 = vperm.slane %v611_v23, %v1519_v52  ;;  %v617_v58 = vpop.permute.xlu0 %616  ;;  %v1740_v50 = vadd.f32 %v728_v37, %v504_v34  ;;  %v1742_v7 = vadd.f32 %v727_v43, %v503_v4 }
 0x127   : > { %v771_v22 = vpop.permute.xlu2 %770  ;;  %v642_v5 = vperm.slane %v617_v58, %v1519_v52 }
 0x128   : > { %v641_v45 = vsel %vm391_vm0, %v640_v8, %v639_v13 }
 0x129   : > { %v713_v12 = vsub.f32 %v1642_v21, %v641_v45  ;;  %v714_v38 = vsub.f32 %v1647_v16, %v641_v45  ;;  %v1922_v21 = vld [vmem:[#allocation2_spill] sm:$0xff] }
 0x12a   : > { %v491_v16 = vsub.f32 %v1922_v21, %v1612_v3 }
 0x12b   : > { %v729_v40 = vmul.f32 %v713_v12, %v713_v12  ;;  %v730_v31 = vmul.f32 %v714_v38, %v714_v38 }
 0x12c   : > { %v507_v10 = vmul.f32 %v491_v16, %v491_v16 }
 0x12d   : > { %v620_v42 = vpop.permute.xlu1 %619  ;;  %v1751_v25 = vadd.f32 %v729_v40, %v505_v39  ;;  %v1753_v32 = vadd.f32 %v730_v31, %v506_v48 }
 0x12e   : > { %v643_v17 = vperm.slane %v620_v42, %v1524_v54 }
 0x12f   : > { %v755_v33 = vpop.permute.xlu0 %754  ;;  %v1760_v0 = vpop.permute.xlu2 %782 }
 0x130   : > { %v644_v1 = vsel %vm391_vm0, %v643_v17, %v642_v5 }
 0x131   : > { %v715_v63 = vsub.f32 %v1626_v46, %v644_v1  ;;  %v716_v62 = vsub.f32 %v1649_v24, %v644_v1 }
 0x133   : > { %v732_v59 = vmul.f32 %v716_v62, %v716_v62  ;;  %v731_v49 = vmul.f32 %v715_v63, %v715_v63 }
 0x135   : > { %v1766_v28 = vadd.f32 %v732_v59, %v508_v29  ;;  %v1768_v41 = vadd.f32 %v731_v49, %v507_v10 }
 0x136   : > { %v759_v3 = vpop.permute.xlu1 %758 }
 0x137   : > { %v1770_v53 = vpop.permute.xlu0 %774  ;;  %v1772_v51 = vpop.permute.xlu2 %794 }
 0x13e   : > { %v767_v15 = vpop.permute.xlu1 %766 }
 0x13f   : > { %v1774_v11 = vpop.permute.xlu0 %786  ;;  %v1776_v46 = vpop.permute.xlu2 %806 }
 0x146   : > { %v1778_v24 = vpop.permute.xlu1 %778 }
 0x147   : > { %v1780_v47 = vpop.permute.xlu0 %798  ;;  %v818_v36 = vpop.permute.xlu2 %817 }
 0x148   : > { %v862_v37 = vperm.slane %v818_v36, %v1524_v54 }
 0x14e   : > { %v1782_v44 = vpop.permute.xlu1 %790 }
 0x14f   : > { %v1784_v27 = vpop.permute.xlu0 %810  ;;  %v827_v20 = vpop.permute.xlu2 %826 }
 0x150   : > { %v867_v23 = vperm.slane %v827_v20, %v1519_v52 }
 0x156   : > { %v1786_v19 = vpop.permute.xlu1 %802 }
 0x157   : > { %v821_v14 = vpop.permute.xlu0 %820  ;;  %v836_v58 = vpop.permute.xlu2 %835 }
 0x158   : > { %v864_v1 = vperm.slane %v821_v14, %v1519_v52 }
 0x15e   : > { %v815_v34 = vpop.permute.xlu1 %814 }
 0x15f   : > { %v861_v4 = vperm.slane %v815_v34, %v1519_v52  ;;  %v830_v43 = vpop.permute.xlu0 %829  ;;  %v845_v14 = vpop.permute.xlu2 %844 }
 0x160   : > { %v868_v8 = vperm.slane %v830_v43, %v1524_v54 }
 0x161   : > { %v863_v13 = vsel %vm391_vm0, %v862_v37, %v861_v4 }
 0x162   : > { %v869_v45 = vsel %vm391_vm0, %v868_v8, %v867_v23  ;;  %v941_v12 = vsub.f32 %v1699_v26, %v863_v13  ;;  %v942_v38 = vsub.f32 %v755_v33, %v863_v13  ;;  %v871_v13 = vperm.slane %v836_v58, %v1524_v54 }
 0x163   : > { %v946_v39 = vsub.f32 %v771_v22, %v869_v45  ;;  %v945_v40 = vsub.f32 %v767_v15, %v869_v45  ;;  %v876_v45 = vperm.slane %v845_v14, %v1519_v52 }
 0x164   : > { %v957_v48 = vmul.f32 %v941_v12, %v941_v12  ;;  %v958_v31 = vmul.f32 %v942_v38, %v942_v38 }
 0x165   : > { %v962_v42 = vmul.f32 %v946_v39, %v946_v39  ;;  %v961_v5 = vmul.f32 %v945_v40, %v945_v40 }
 0x166   : > { %v824_v17 = vpop.permute.xlu1 %823  ;;  %v973_v21 = vadd.f32 %v957_v48, %v1666_v9  ;;  %v974_v16 = vadd.f32 %v958_v31, %v1668_v60 }
 0x167   : > { %v865_v63 = vperm.slane %v824_v17, %v1524_v54  ;;  %v1799_v62 = vpop.permute.xlu0 %838  ;;  %v978_v26 = vadd.f32 %v962_v42, %v1695_v2  ;;  %v977_v22 = vadd.f32 %v961_v5, %v1697_v57 }
 0x168   : > { %v990_v33 = vsel %vm989_vm1, %v973_v21, inf  ;;  %v993_v29 = vsel %vm989_vm1, %v974_v16, inf }
 0x169   : > { %v866_v59 = vsel %vm391_vm0, %v865_v63, %v864_v1  ;;  %991 = vmin.xlane.f32.xlu2 %v990_v33  ;;  %994 = vmin.xlane.f32.xlu0 %v993_v29  ;;  %v1087_v9 = vmin.f32 %v990_v33, %v993_v29  ;;  %v1005_v60 = vsel %vm989_vm1, %v978_v26, inf  ;;  %v1002_v10 = vsel %vm989_vm1, %v977_v22, inf }
 0x16a   : > { %v944_v49 = vsub.f32 %v1719_v56, %v866_v59  ;;  %v943_v15 = vsub.f32 %v759_v3, %v866_v59  ;;  %v1101_v36 = vmin.f32 %v1002_v10, %v1005_v60  ;;  %v873_v29 = vperm.slane %v1799_v62, %v1519_v52 }
 0x16b   : > { %v1088_v2 = vrot.slane %v1087_v9, 4 }
 0x16c   : > { %v960_v57 = vmul.f32 %v944_v49, %v944_v49  ;;  %v959_v20 = vmul.f32 %v943_v15, %v943_v15  ;;  %v1102_v34 = vrot.slane %v1101_v36, 4 }
 0x16d   : > { %v1089_v37 = vmin.f32 %v1087_v9, %v1088_v2 }
 0x16e   : > { %v833_v4 = vpop.permute.xlu1 %832  ;;  %v976_v43 = vadd.f32 %v960_v57, %v1689_v30  ;;  %v975_v23 = vadd.f32 %v959_v20, %v1691_v6  ;;  %v1103_v8 = vmin.f32 %v1101_v36, %v1102_v34  ;;  %v854_v34 = vpop.permute.xlu2 %853 }
 0x16f   : > { %v870_v56 = vperm.slane %v833_v4, %v1519_v52  ;;  %v848_v3 = vpop.permute.xlu0 %847  ;;  %v1090_v12 = vrot.slane %v1089_v37, 2 }
 0x170   : > { %v877_v38 = vperm.slane %v848_v3, %v1524_v54  ;;  %v999_v39 = vsel %vm989_vm1, %v976_v43, inf  ;;  %v996_v40 = vsel %vm989_vm1, %v975_v23, inf  ;;  %v1104_v31 = vrot.slane %v1103_v8, 2 }
 0x171   : > { %v872_v48 = vsel %vm391_vm0, %v871_v13, %v870_v56  ;;  %1000 = vmin.xlane.f32.xlu2 %v999_v39  ;;  %997 = vmin.xlane.f32.xlu1 %v996_v40  ;;  %v1094_v30 = vmin.f32 %v996_v40, %v999_v39  ;;  %v1091_v16 = vmin.f32 %v1089_v37, %v1090_v12 }
 0x172   : > { %v878_v6 = vsel %vm391_vm0, %v877_v38, %v876_v45  ;;  %1006 = vmin.xlane.f32.xlu0 %v1005_v60  ;;  %v947_v58 = vsub.f32 %v1770_v53, %v872_v48  ;;  %v948_v42 = vsub.f32 %v1778_v24, %v872_v48  ;;  %v1105_v9 = vmin.f32 %v1103_v8, %v1104_v31 }
 0x173   : > { %v1095_v5 = vrot.slane %v1094_v30, 4  ;;  %v952_v17 = vsub.f32 %v1772_v51, %v878_v6  ;;  %v951_v21 = vsub.f32 %v1782_v44, %v878_v6  ;;  %v1092_v15 = vrot.slane %v1091_v16, 1 }
 0x174   : > { %v963_v1 = vmul.f32 %v947_v58, %v947_v58  ;;  %v964_v63 = vmul.f32 %v948_v42, %v948_v42  ;;  %v1106_v57 = vrot.slane %v1105_v9, 1  ;;  %v880_v3 = vperm.slane %v854_v34, %v1524_v54 }
 0x175   : > { %v1096_v26 = vmin.f32 %v1094_v30, %v1095_v5  ;;  %v968_v22 = vmul.f32 %v952_v17, %v952_v17  ;;  %v967_v33 = vmul.f32 %v951_v21, %v951_v21  ;;  %v1093_v13 = vmin.f32 %v1091_v16, %v1092_v15 }
 0x176   : > { %v842_v59 = vpop.permute.xlu1 %841  ;;  %v979_v53 = vadd.f32 %v963_v1, %v1708_v61  ;;  %v980_v24 = vadd.f32 %v964_v63, %v1710_v55  ;;  %v1107_v12 = vmin.f32 %v1105_v9, %v1106_v57 }
 0x177   : > { %v1097_v60 = vrot.slane %v1096_v26, 2  ;;  %v874_v51 = vperm.slane %v842_v59, %v1524_v54  ;;  %v984_v44 = vadd.f32 %v968_v22, %v1740_v50  ;;  %v983_v49 = vadd.f32 %v967_v33, %v1742_v7  ;;  %v857_v63 = vpop.permute.xlu0 %856 }
 0x178   : > { %v1008_v36 = vsel %vm989_vm1, %v979_v53, inf  ;;  %v1011_v2 = vsel %vm989_vm1, %v980_v24, inf }
 0x179   : > { %v1098_v14 = vmin.f32 %v1096_v26, %v1097_v60  ;;  %v875_v62 = vsel %vm391_vm0, %v874_v51, %v873_v29  ;;  %1009 = vmin.xlane.f32.xlu1 %v1008_v36  ;;  %1003 = vmin.xlane.f32.xlu2 %v1002_v10  ;;  %v1108_v61 = vmin.f32 %v1008_v36, %v1011_v2  ;;  %v1023_v55 = vsel %vm989_vm1, %v984_v44, inf }
 0x17a   : > { %v950_v20 = vsub.f32 %v1774_v11, %v875_v62  ;;  %v949_v50 = vsub.f32 %v1760_v0, %v875_v62  ;;  %v1020_v7 = vsel %vm989_vm1, %v983_v49, inf  ;;  %v882_v60 = vperm.slane %v857_v63, %v1519_v52 }
 0x17b   : > { %v1099_v37 = vrot.slane %v1098_v14, 1  ;;  %v1109_v4 = vrot.slane %v1108_v61, 4  ;;  %v1122_v43 = vmin.f32 %v1020_v7, %v1023_v55 }
 0x17c   : > { %v966_v23 = vmul.f32 %v950_v20, %v950_v20  ;;  %v965_v8 = vmul.f32 %v949_v50, %v949_v50 }
 0x17d   : > { %v1100_v10 = vmin.f32 %v1098_v14, %v1099_v37  ;;  %v1110_v45 = vmin.f32 %v1108_v61, %v1109_v4  ;;  %v1123_v56 = vrot.slane %v1122_v43, 4 }
 0x17e   : > { %v851_v11 = vpop.permute.xlu1 %850  ;;  %v982_v0 = vadd.f32 %v966_v23, %v1733_v18  ;;  %v981_v38 = vadd.f32 %v965_v8, %v1735_v35 }
 0x17f   : > { %v879_v39 = vperm.slane %v851_v11, %v1519_v52  ;;  %v1111_v40 = vrot.slane %v1110_v45, 2  ;;  %v1124_v48 = vmin.f32 %v1122_v43, %v1123_v56  ;;  %v1151_v30 = vsel %vm414_vm2, %v1100_v10, %v1093_v13 }
 0x180   : > { %v1017_v6 = vsel %vm989_vm1, %v982_v0, inf  ;;  %v1014_v58 = vsel %vm989_vm1, %v981_v38, inf  ;;  %v1152_v31 = vsel %vm415_vm3, %v1107_v12, %v1151_v30 }
 0x181   : > { %v881_v42 = vsel %vm391_vm0, %v880_v3, %v879_v39  ;;  %v1112_v5 = vmin.f32 %v1110_v45, %v1111_v40  ;;  %1012 = vmin.xlane.f32.xlu2 %v1011_v2  ;;  %1018 = vmin.xlane.f32.xlu1 %v1017_v6  ;;  %v1115_v18 = vmin.f32 %v1014_v58, %v1017_v6  ;;  %v1125_v17 = vrot.slane %v1124_v48, 2 }
 0x182   : > { %1015 = vmin.xlane.f32.xlu0 %v1014_v58  ;;  %v953_v35 = vsub.f32 %v1780_v47, %v881_v42  ;;  %v954_v21 = vsub.f32 %v1786_v19, %v881_v42 }
 0x183   : > { %v1113_v16 = vrot.slane %v1112_v5, 1  ;;  %v1116_v1 = vrot.slane %v1115_v18, 4  ;;  %v1126_v9 = vmin.f32 %v1124_v48, %v1125_v17 }
 0x184   : > { %v969_v26 = vmul.f32 %v953_v35, %v953_v35  ;;  %v970_v22 = vmul.f32 %v954_v21, %v954_v21 }
 0x185   : > { %v1114_v33 = vmin.f32 %v1112_v5, %v1113_v16  ;;  %v1117_v29 = vmin.f32 %v1115_v18, %v1116_v1  ;;  %v1127_v2 = vrot.slane %v1126_v9, 1 }
 0x186   : > { %v860_v59 = vpop.permute.xlu1 %859  ;;  %v985_v53 = vadd.f32 %v969_v26, %v1751_v25  ;;  %v986_v24 = vadd.f32 %v970_v22, %v1753_v32 }
 0x187   : > { %v1118_v47 = vrot.slane %v1117_v29, 2  ;;  %v883_v51 = vperm.slane %v860_v59, %v1524_v54  ;;  %v1153_v19 = vsel %vm417_vm4, %v1114_v33, %v1152_v31  ;;  %v1128_v37 = vmin.f32 %v1126_v9, %v1127_v2 }
 0x188   : > { %v1026_v44 = vsel %vm989_vm1, %v985_v53, inf  ;;  %v1029_v49 = vsel %vm989_vm1, %v986_v24, inf }
 0x189   : > { %v1119_v15 = vmin.f32 %v1117_v29, %v1118_v47  ;;  %v884_v36 = vsel %vm391_vm0, %v883_v51, %v882_v60  ;;  %1027 = vmin.xlane.f32.xlu1 %v1026_v44  ;;  %1021 = vmin.xlane.f32.xlu2 %v1020_v7  ;;  %v1129_v25 = vmin.f32 %v1026_v44, %v1029_v49 }
 0x18a   : > { %1024 = vmin.xlane.f32.xlu0 %v1023_v55  ;;  %v956_v32 = vsub.f32 %v1784_v27, %v884_v36  ;;  %v955_v14 = vsub.f32 %v1776_v46, %v884_v36 }
 0x18b   : > { %v1120_v62 = vrot.slane %v1119_v15, 1  ;;  %v1130_v61 = vrot.slane %v1129_v25, 4 }
 0x18c   : > { %v972_v57 = vmul.f32 %v956_v32, %v956_v32  ;;  %v971_v20 = vmul.f32 %v955_v14, %v955_v14 }
 0x18d   : > { %v1121_v50 = vmin.f32 %v1119_v15, %v1120_v62  ;;  %v1131_v34 = vmin.f32 %v1129_v25, %v1130_v61 }
 0x18e   : > { %v988_v4 = vadd.f32 %v972_v57, %v1766_v28  ;;  %v987_v7 = vadd.f32 %v971_v20, %v1768_v41 }
 0x18f   : > { %v1132_v55 = vrot.slane %v1131_v34, 2  ;;  %v1154_v27 = vsel %vm419_vm5, %v1121_v50, %v1153_v19 }
 0x190   : > { %v1035_v46 = vsel %vm989_vm1, %v988_v4, inf  ;;  %v1032_v43 = vsel %vm989_vm1, %v987_v7, inf  ;;  %v1155_v23 = vsel %vm421_vm6, %v1128_v37, %v1154_v27 }
 0x191   : > { %v1133_v8 = vmin.f32 %v1131_v34, %v1132_v55  ;;  %1030 = vmin.xlane.f32.xlu2 %v1029_v49  ;;  %1036 = vmin.xlane.f32.xlu1 %v1035_v46  ;;  %v1136_v13 = vmin.f32 %v1032_v43, %v1035_v46 }
 0x192   : > { %1033 = vmin.xlane.f32.xlu0 %v1032_v43 }
 0x193   : > { %v1134_v10 = vrot.slane %v1133_v8, 1  ;;  %v1137_v28 = vrot.slane %v1136_v13, 4 }
 0x195   : > { %v1135_v41 = vmin.f32 %v1133_v8, %v1134_v10  ;;  %v1138_v45 = vmin.f32 %v1136_v13, %v1137_v28 }
 0x197   : > { %v1139_v56 = vrot.slane %v1138_v45, 2  ;;  %v1156_v3 = vsel %vm423_vm7, %v1135_v41, %v1155_v23 }
 0x199   : > { %v1140_v12 = vmin.f32 %v1138_v45, %v1139_v56 }
 0x19b   : > { %v1141_v11 = vrot.slane %v1140_v12, 1 }
 0x19d   : > { %v1142_v0 = vmin.f32 %v1140_v12, %v1141_v11 }
 0x19f   : > { %v1157_v38 = vsel %vm425_vm8, %v1142_v0, %v1156_v3 }
 0x1a0   : > { %1159 = vst.msk [vmem:[%s209_s25] sm:$0xff] %vm989_vm1, %v1157_v38 }
 0x1dc   : > { %v992_v39 = vpop.xlane.xlu2 %991  ;;  %v995_v40 = vpop.xlane.xlu0 %994 }
 0x1dd   : > { %v1054_v16 = vperm.slane %v992_v39, %v1519_v52  ;;  %v1055_v1 = vperm.slane %v995_v40, %v1524_v54 }
 0x1df   : > { %v1056_v47 = vsel %vm391_vm0, %v1055_v1, %v1054_v16 }
 0x1e4   : > { %v1001_v48 = vpop.xlane.xlu2 %1000  ;;  %v998_v30 = vpop.xlane.xlu1 %997 }
 0x1e5   : > { %v1007_v31 = vpop.xlane.xlu0 %1006  ;;  %v1058_v35 = vperm.slane %v1001_v48, %v1524_v54  ;;  %v1057_v17 = vperm.slane %v998_v30, %v1519_v52 }
 0x1e6   : > { %v1061_v33 = vperm.slane %v1007_v31, %v1524_v54 }
 0x1e7   : > { %v1059_v59 = vsel %vm391_vm0, %v1058_v35, %v1057_v17 }
 0x1e8   : > { %v1078_v49 = vsel %vm414_vm2, %v1059_v59, %v1056_v47 }
 0x1ec   : > { %v1010_v6 = vpop.xlane.xlu1 %1009  ;;  %v1004_v58 = vpop.xlane.xlu2 %1003 }
 0x1ed   : > { %v1060_v21 = vperm.slane %v1004_v58, %v1519_v52  ;;  %v1063_v53 = vperm.slane %v1010_v6, %v1519_v52 }
 0x1ef   : > { %v1062_v9 = vsel %vm391_vm0, %v1061_v33, %v1060_v21 }
 0x1f0   : > { %v1079_v15 = vsel %vm415_vm3, %v1062_v9, %v1078_v49 }
 0x1f4   : > { %v1013_v42 = vpop.xlane.xlu2 %1012  ;;  %v1019_v5 = vpop.xlane.xlu1 %1018 }
 0x1f5   : > { %v1016_v18 = vpop.xlane.xlu0 %1015  ;;  %v1064_v63 = vperm.slane %v1013_v42, %v1524_v54  ;;  %v1067_v24 = vperm.slane %v1019_v5, %v1524_v54 }
 0x1f6   : > { %v1066_v60 = vperm.slane %v1016_v18, %v1519_v52 }
 0x1f7   : > { %v1065_v51 = vsel %vm391_vm0, %v1064_v63, %v1063_v53 }
 0x1f8   : > { %v1080_v36 = vsel %vm417_vm4, %v1065_v51, %v1079_v15  ;;  %v1068_v25 = vsel %vm391_vm0, %v1067_v24, %v1066_v60 }
 0x1f9   : > { %v1081_v50 = vsel %vm419_vm5, %v1068_v25, %v1080_v36 }
 0x1fc   : > { %v1028_v26 = vpop.xlane.xlu1 %1027  ;;  %v1022_v22 = vpop.xlane.xlu2 %1021 }
 0x1fd   : > { %v1025_v29 = vpop.xlane.xlu0 %1024  ;;  %v1069_v19 = vperm.slane %v1022_v22, %v1519_v52  ;;  %v1072_v62 = vperm.slane %v1028_v26, %v1519_v52 }
 0x1fe   : > { %v1070_v44 = vperm.slane %v1025_v29, %v1524_v54 }
 0x200   : > { %v1071_v2 = vsel %vm391_vm0, %v1070_v44, %v1069_v19 }
 0x201   : > { %v1082_v37 = vsel %vm421_vm6, %v1071_v2, %v1081_v50 }
 0x204   : > { %v1031_v32 = vpop.xlane.xlu2 %1030  ;;  %v1037_v14 = vpop.xlane.xlu1 %1036 }
 0x205   : > { %v1073_v61 = vperm.slane %v1031_v32, %v1524_v54  ;;  %v1076_v57 = vperm.slane %v1037_v14, %v1524_v54  ;;  %v1034_v20 = vpop.xlane.xlu0 %1033 }
 0x206   : > { %v1075_v34 = vperm.slane %v1034_v20, %v1519_v52 }
 0x207   : > { %v1074_v4 = vsel %vm391_vm0, %v1073_v61, %v1072_v62 }
 0x208   : > { %v1083_v7 = vsel %vm423_vm7, %v1074_v4, %v1082_v37  ;;  %v1077_v55 = vsel %vm391_vm0, %v1076_v57, %v1075_v34 }
 0x209   : > { %v1084_v54 = vsel %vm425_vm8, %v1077_v55, %v1083_v7 }
 0x20a   : > { %1086 = vst.msk [vmem:[%s205_s28] sm:$0xff] %vm989_vm1, %v1084_v54 }
 0x20b PF: > { %s14_s12 = sadd.s32 1, %s1299_s12  }
 0x20c   : > { %p11_p5 = scmp.ge.s32.totalorder %s14_s12, 4  }
 0x20e   :  { %13 = sbr.rel (!%p11_p5) target bundleno = 1 (0x1), region = 73 }

</bundles_post_ra>
